<compile_context>
chip_gen: v7x
topology: tpu7x:2x2x1
jax: 0.10.0
libtpu: 0.0.40
codegen_flags: <defaults>
</compile_context>

<pallas_src>
import math
from functools import partial

import jax
import jax.numpy as jnp
from jax.experimental import pallas as pl
from jax.experimental.pallas import tpu as pltpu


def _round_up(x, m):
    return ((x + m - 1) // m) * m


def _cdiv(a, b):
    return (a + b - 1) // b


def _const_index(i):
    return (0, 0)


# ---------------------------------------------------------------------------
# Probe (once) whether single-buffered grid-invariant operands are supported.
# ---------------------------------------------------------------------------
_SINGLE_BUFFER_OK = None


def _single_buffer_supported():
    global _SINGLE_BUFFER_OK
    if _SINGLE_BUFFER_OK is None:
        try:
            def _copy(x_ref, o_ref):
                o_ref[...] = x_ref[...]

            out = pl.pallas_call(
                _copy,
                out_shape=jax.ShapeDtypeStruct((16, 128), jnp.float32),
                grid=(2,),
                in_specs=[pl.BlockSpec((8, 128), _const_index,
                                       pipeline_mode=pl.Buffered(1))],
                out_specs=pl.BlockSpec((8, 128), lambda i: (i, 0)),
            )(jnp.ones((8, 128), jnp.float32))
            jax.block_until_ready(out)
            _SINGLE_BUFFER_OK = True
        except Exception:  # pragma: no cover - older jax / unsupported backend
            _SINGLE_BUFFER_OK = False
    return _SINGLE_BUFFER_OK


# ---------------------------------------------------------------------------
# Kernel
# ---------------------------------------------------------------------------
def make_implicit_net_kernel(layer_is_skip, matmul_dtype, final_layer_f32,
                             chunk, nchunks):
    """Kernel over one (d_in, tm) lane-dense tile of points."""
    n_layers = len(layer_is_skip)

    def kernel(*refs):
        # refs = (x_ref, <per-layer weight piece(s) + bias>..., o_ref)
        x_ref = refs[0]
        o_ref = refs[-1]
        params = refs[1:-1]

        # Fully-unrolled chunk loop over the lane axis: all layers per chunk,
        # activations stay in vregs (acc (32,512) f32 = 16 vregs), static
        # pl.ds offsets.  Chunk results are independent, so liveness is
        # bounded by dataflow.
        for c in range(nchunks):
            start = c * chunk
            x_f32 = x_ref[:, pl.ds(start, chunk)].astype(jnp.float32)
            h_f32 = x_f32
            acc = None
            idx = 0
            for li, is_skip in enumerate(layer_is_skip):
                last = li == n_layers - 1
                op_dt = jnp.float32 if (final_layer_f32 and last) else matmul_dtype

                w = params[idx][...]
                idx += 1
                if is_skip:
                    w_x = params[idx][...]
                    idx += 1
                b = params[idx][...]            # (out, 1), f32
                idx += 1

                h_op = h_f32.astype(op_dt)
                # W[out, in] @ h[in, chunk] -> (out, chunk); f32 MXU accumulation.
                acc = jnp.dot(w, h_op, preferred_element_type=jnp.float32)
                if is_skip:
                    # torch.cat([h, x], -1)/sqrt(2) then Linear ==
                    # (W_h/sqrt2) @ h + (W_x/sqrt2) @ x  (scale folded into W
                    # in the wrapper): no concat/relayout, no full-tile scale.
                    acc = acc + jnp.dot(w_x, x_f32.astype(op_dt),
                                        preferred_element_type=jnp.float32)
                acc = acc + b                   # lane-broadcast bias add (VPU)
                # ReLU after EVERY layer: the reference guard
                # `layer < num_layers - 1` is always true inside its loop, so
                # the last layer is clamped too.
                acc = jnp.maximum(acc, 0.0)
                h_f32 = acc

            o_ref[:, pl.ds(start, chunk)] = acc.astype(o_ref.dtype)

    return kernel


# ---------------------------------------------------------------------------
# Parameter preparation (done under the same jit; tiny arrays)
# ---------------------------------------------------------------------------
def prepare_params(weights, biases, skip_in, d_in, matmul_dtype, final_layer_f32):
    """Split/scale skip weights, cast matmul operands, reshape biases.

    weights[l]: PyTorch orientation [out_dim, in_dim]; biases[l]: [out_dim].
    """
    inv_sqrt2 = 1.0 / math.sqrt(2.0)
    skip_set = set(skip_in)
    n_layers = len(weights)
    layer_is_skip = []
    flat = []
    for layer, (w, b) in enumerate(zip(weights, biases)):
        is_skip = layer in skip_set
        layer_is_skip.append(is_skip)
        op_dt = (jnp.float32 if (final_layer_f32 and layer == n_layers - 1)
                 else matmul_dtype)
        w = jnp.asarray(w, jnp.float32)
        if is_skip:
            flat.append((w[:, :-d_in] * inv_sqrt2).astype(op_dt))   # acts on h
            flat.append((w[:, -d_in:] * inv_sqrt2).astype(op_dt))   # acts on x
        else:
            flat.append(w.astype(op_dt))
        # Bias is added AFTER the matmul -> NOT scaled by 1/sqrt(2).
        flat.append(jnp.asarray(b, jnp.float32).reshape(-1, 1))
    return tuple(layer_is_skip), flat


# ---------------------------------------------------------------------------
# Forward (core: points-on-lanes [d_in, N] input — no transpose / pad passes)
# ---------------------------------------------------------------------------
def _forward_points_on_lanes(x_t, weights, biases, skip_in=(), *,
                             tm_max=16384, chunk=512,
                             matmul_dtype=jnp.bfloat16, final_layer_f32=True):
    """x_t: [d_in, N] float32 (points on the lane axis). Returns [N, 1] f32."""
    d_in, N = x_t.shape
    lanes = 128

    chunk = max(lanes, _round_up(int(chunk), lanes))
    tm_max = max(chunk, (int(tm_max) // chunk) * chunk)

    # Tile-size selection: minimal padding, >= 2 (even) grid steps for v7x's
    # two TensorCores, big tiles to amortise per-grid-step overhead.
    steps = _cdiv(N, tm_max)
    if N > lanes:
        steps = max(steps, 2)
    if steps > 1 and steps % 2 == 1:
        steps += 1
    tm = min(tm_max, _round_up(_cdiv(N, steps), chunk))
    grid_steps = _cdiv(N, tm)
    nchunks = tm // chunk

    layer_is_skip, flat_params = prepare_params(
        weights, biases, skip_in, d_in, matmul_dtype, final_layer_f32)

    x_t = x_t.astype(jnp.float32)

    # Grid-invariant weights/biases: constant index map; single VMEM buffer
    # when pl.Buffered(1) is supported (probed once), else default pipelining.
    if _single_buffer_supported():
        def weight_spec(shape):
            return pl.BlockSpec(shape, _const_index, pipeline_mode=pl.Buffered(1))
    else:
        def weight_spec(shape):
            return pl.BlockSpec(shape, _const_index)

    in_specs = [pl.BlockSpec((d_in, tm), lambda i: (0, i))]
    for p in flat_params:
        in_specs.append(weight_spec(p.shape))
    out_spec = pl.BlockSpec((1, tm), lambda i: (0, i))   # lane-dense output store

    # Advisory cost estimate so XLA schedules surrounding ops sensibly.
    flops_per_pt = sum(2 * int(w.shape[0]) * int(w.shape[1]) for w in weights)
    param_bytes = sum(int(p.size) * jnp.dtype(p.dtype).itemsize for p in flat_params)
    cost = pl.CostEstimate(
        flops=flops_per_pt * grid_steps * tm,
        transcendentals=0,
        bytes_accessed=d_in * N * 4 + N * 4 + param_bytes,
    )

    # VMEM estimate: account for the x / out tiles being padded to 8 sublanes
    # in VMEM and double-buffered; weights are single-buffered; chunked
    # activations live in vregs (small fudge term).
    def padded_bytes(shape, dtype):
        r = _round_up(int(shape[0]), 8)
        c = _round_up(int(shape[1]), 128)
        return r * c * jnp.dtype(dtype).itemsize

    est_vmem = (2 * padded_bytes((d_in, tm), jnp.float32)
                + 2 * padded_bytes((1, tm), jnp.float32)
                + sum(padded_bytes(p.shape, p.dtype) for p in flat_params)
                + 64 * 1024)
    compiler_kwargs = dict(dimension_semantics=("parallel",))
    if est_vmem > 12 * 1024 * 1024:
        # Only triggers for very large tm_max; stay within v7x's 64 MiB VMEM
        # and above v5e's 16 MiB scoped default.
        compiler_kwargs["vmem_limit_bytes"] = int(min(2 * est_vmem, 56 * 1024 * 1024))

    out = pl.pallas_call(
        make_implicit_net_kernel(layer_is_skip, matmul_dtype, final_layer_f32,
                                 chunk, nchunks),
        out_shape=jax.ShapeDtypeStruct((1, N), jnp.float32),
        grid=(grid_steps,),
        in_specs=in_specs,
        out_specs=out_spec,
        cost_estimate=cost,
        compiler_params=pltpu.CompilerParams(**compiler_kwargs),
    )(x_t, *flat_params)

    # (1, N) -> (N, 1): pure metadata reshape, no extra HBM pass.
    return out.reshape(N, 1)


_STATIC = ("skip_in", "tm_max", "chunk", "matmul_dtype", "final_layer_f32")

# Preferred entry point for upstream code that can provide points as [d_in, N]
# (avoids the transpose HBM pass entirely).
implicit_net_forward_t = jax.jit(_forward_points_on_lanes, static_argnames=_STATIC)


@partial(jax.jit, static_argnames=_STATIC)
def implicit_net_forward(x, weights, biases, skip_in=(), *,
                         tm_max=16384, chunk=512,
                         matmul_dtype=jnp.bfloat16, final_layer_f32=True):
    """PyTorch-interface entry: x [N, d_in] float32 -> [N, 1] float32.

    The transpose to [d_in, N] is the only extra HBM pass and is done under
    the same jit; prefer `implicit_net_forward_t` with a [d_in, N] array to
    skip it.
    """
    x_t = jnp.asarray(x, jnp.float32).T
    return _forward_points_on_lanes(
        x_t, weights, biases, skip_in, tm_max=tm_max, chunk=chunk,
        matmul_dtype=matmul_dtype, final_layer_f32=final_layer_f32)


# ---------------------------------------------------------------------------
# Synthetic params + pure-JAX reference (mirrors the PyTorch module)
# ---------------------------------------------------------------------------
def build_params(key, d_in, dims, skip_in):
    """Deterministic synthetic parameters mirroring ImplicitNet.__init__ shapes.

    Weights are stored in PyTorch orientation [out_dim, in_dim]."""
    full_dims = [d_in] + dims + [1]
    num_layers = len(full_dims)
    weights, biases = [], []
    for layer in range(num_layers - 1):
        in_dim = full_dims[layer]
        if layer + 1 in skip_in:
            out_dim = full_dims[layer + 1] - d_in
        else:
            out_dim = full_dims[layer + 1]
        key, kw, kb = jax.random.split(key, 3)
        bound = 1.0 / math.sqrt(in_dim)
        w = jax.random.uniform(kw, (out_dim, in_dim), jnp.float32, -bound, bound)
        b = jax.random.uniform(kb, (out_dim,), jnp.float32, -bound, bound)
        weights.append(w)
        biases.append(b)
    return weights, biases


def reference_forward(x, weights, biases, skip_in):
    """Pure-JAX reference reproducing the PyTorch forward (f32)."""
    inv_sqrt2 = 1.0 / math.sqrt(2.0)
    h = x
    for layer in range(len(weights)):
        if layer in skip_in:
            h = jnp.concatenate([h, x], axis=-1) * inv_sqrt2
        h = h @ weights[layer].T + biases[layer]
        # Guard `layer < num_layers - 1` is always true in the PyTorch loop,
        # so ReLU follows every layer including the last.
        h = jnp.maximum(h, 0.0)
    return h


if __name__ == "__main__":
    key = jax.random.PRNGKey(0)

    d_in = 2
    dims = [32, 32, 32, 32]
    skip_in = (2,)
    # N is NOT a multiple of the tile/chunk sizes -> exercises the ragged
    # (OOB-dropped) last block; with the default tm_max this runs 2 grid
    # steps of tm=3072 (so both v7x TensorCores get work).
    N = 6000

    key, kx, kp = jax.random.split(key, 3)
    x = jax.random.uniform(kx, (N, d_in), jnp.float32, -1.0, 1.0)
    weights, biases = build_params(kp, d_in, dims, skip_in)

    ref = reference_forward(x, weights, biases, skip_in)

    # f32 MXU operands: bit-accurate check against the PyTorch-equivalent reference.
    out_f32 = implicit_net_forward(x, weights, biases, skip_in,
                                   matmul_dtype=jnp.float32)
    out_f32 = jax.block_until_ready(out_f32)
    assert out_f32.shape == (N, 1)
    assert jnp.allclose(out_f32, ref, atol=1e-5, rtol=1e-5), "f32 mismatch vs reference"

    # Default fast path: bf16 operands (f32 accumulation), final layer in f32.
    out_bf16 = jax.block_until_ready(implicit_net_forward(x, weights, biases, skip_in))
    assert out_bf16.shape == (N, 1)
    max_err = float(jnp.max(jnp.abs(out_bf16 - ref)))
    assert max_err < 5e-2, f"bf16 path mismatch vs reference: max abs err {max_err}"

    # [d_in, N] entry point (no wrapper transpose pass) matches the shim path.
    out_t = jax.block_until_ready(
        implicit_net_forward_t(x.T, weights, biases, skip_in))
    assert out_t.shape == (N, 1)
    assert jnp.allclose(out_t, out_bf16, atol=1e-6, rtol=1e-6)

    print("KERNEL_OK")
</pallas_src>

<mosaic_0001>
module attributes {stable_mosaic.version = 11 : i64} {
  func.func @kernel(%arg0: i32, %arg1: memref<2x3072xf32, #tpu.memory_space<vmem>>, %arg2: memref<32x2xf32, #tpu.memory_space<vmem>>, %arg3: memref<32x1xf32, #tpu.memory_space<vmem>>, %arg4: memref<30x32xf32, #tpu.memory_space<vmem>>, %arg5: memref<30x1xf32, #tpu.memory_space<vmem>>, %arg6: memref<32x30xf32, #tpu.memory_space<vmem>>, %arg7: memref<32x2xf32, #tpu.memory_space<vmem>>, %arg8: memref<32x1xf32, #tpu.memory_space<vmem>>, %arg9: memref<32x32xf32, #tpu.memory_space<vmem>>, %arg10: memref<32x1xf32, #tpu.memory_space<vmem>>, %arg11: memref<1x32xf32, #tpu.memory_space<vmem>>, %arg12: memref<1x1xf32, #tpu.memory_space<vmem>>, %arg13: memref<1x3072xf32, #tpu.memory_space<vmem>>) attributes {dimension_semantics = [#tpu.dimension_semantics<parallel>], iteration_bounds = array<i64: 2>, scalar_prefetch = 0 : i64, scratch_operands = 0 : i64, tpu.core_type = #tpu.core_type<tc>, window_params = [{transform_indices = @transform_0, window_bounds = array<i64: 2, 3072>}, {pipeline_mode = #tpu.pipeline_mode<synchronous>, transform_indices = @transform_1, window_bounds = array<i64: 32, 2>}, {pipeline_mode = #tpu.pipeline_mode<synchronous>, transform_indices = @transform_2, window_bounds = array<i64: 32, 1>}, {pipeline_mode = #tpu.pipeline_mode<synchronous>, transform_indices = @transform_3, window_bounds = array<i64: 30, 32>}, {pipeline_mode = #tpu.pipeline_mode<synchronous>, transform_indices = @transform_4, window_bounds = array<i64: 30, 1>}, {pipeline_mode = #tpu.pipeline_mode<synchronous>, transform_indices = @transform_5, window_bounds = array<i64: 32, 30>}, {pipeline_mode = #tpu.pipeline_mode<synchronous>, transform_indices = @transform_6, window_bounds = array<i64: 32, 2>}, {pipeline_mode = #tpu.pipeline_mode<synchronous>, transform_indices = @transform_7, window_bounds = array<i64: 32, 1>}, {pipeline_mode = #tpu.pipeline_mode<synchronous>, transform_indices = @transform_8, window_bounds = array<i64: 32, 32>}, {pipeline_mode = #tpu.pipeline_mode<synchronous>, transform_indices = @transform_9, window_bounds = array<i64: 32, 1>}, {pipeline_mode = #tpu.pipeline_mode<synchronous>, transform_indices = @transform_10, window_bounds = array<i64: 1, 32>}, {pipeline_mode = #tpu.pipeline_mode<synchronous>, transform_indices = @transform_11, window_bounds = array<i64: 1, 1>}, {transform_indices = @transform_12, window_bounds = array<i64: 1, 3072>}]} {
    %c0 = arith.constant 0 : index
    %c0_0 = arith.constant 0 : index
    %0 = vector.load %arg1[%c0, %c0_0] : memref<2x3072xf32, #tpu.memory_space<vmem>>, vector<2x512xf32>
    %c0_1 = arith.constant 0 : index
    %c0_2 = arith.constant 0 : index
    %1 = vector.load %arg2[%c0_1, %c0_2] : memref<32x2xf32, #tpu.memory_space<vmem>>, vector<32x2xf32>
    %c0_3 = arith.constant 0 : index
    %c0_4 = arith.constant 0 : index
    %2 = vector.load %arg3[%c0_3, %c0_4] : memref<32x1xf32, #tpu.memory_space<vmem>>, vector<32x1xf32>
    %cst = arith.constant dense<0.000000e+00> : vector<32x512xf32>
    %3 = tpu.matmul %1, %0, %cst {dimension_numbers = #tpu.dot_dimension_numbers<[1], [0], [0], [1], [0, 0, 1, 1], [], []>} : vector<32x2xf32>, vector<2x512xf32>, vector<32x512xf32> -> vector<32x512xf32>
    %4 = vector.broadcast %2 : vector<32x1xf32> to vector<32x512xf32>
    %5 = arith.addf %3, %4 : vector<32x512xf32>
    %cst_5 = arith.constant 0.000000e+00 : f32
    %6 = vector.broadcast %cst_5 : f32 to vector<32x512xf32>
    %7 = arith.maximumf %5, %6 : vector<32x512xf32>
    %c0_6 = arith.constant 0 : index
    %c0_7 = arith.constant 0 : index
    %8 = vector.load %arg4[%c0_6, %c0_7] : memref<30x32xf32, #tpu.memory_space<vmem>>, vector<30x32xf32>
    %c0_8 = arith.constant 0 : index
    %c0_9 = arith.constant 0 : index
    %9 = vector.load %arg5[%c0_8, %c0_9] : memref<30x1xf32, #tpu.memory_space<vmem>>, vector<30x1xf32>
    %cst_10 = arith.constant dense<0.000000e+00> : vector<30x512xf32>
    %10 = tpu.matmul %8, %7, %cst_10 {dimension_numbers = #tpu.dot_dimension_numbers<[1], [0], [0], [1], [0, 0, 1, 1], [], []>} : vector<30x32xf32>, vector<32x512xf32>, vector<30x512xf32> -> vector<30x512xf32>
    %11 = vector.broadcast %9 : vector<30x1xf32> to vector<30x512xf32>
    %12 = arith.addf %10, %11 : vector<30x512xf32>
    %cst_11 = arith.constant 0.000000e+00 : f32
    %13 = vector.broadcast %cst_11 : f32 to vector<30x512xf32>
    %14 = arith.maximumf %12, %13 : vector<30x512xf32>
    %c0_12 = arith.constant 0 : index
    %c0_13 = arith.constant 0 : index
    %15 = vector.load %arg6[%c0_12, %c0_13] : memref<32x30xf32, #tpu.memory_space<vmem>>, vector<32x30xf32>
    %c0_14 = arith.constant 0 : index
    %c0_15 = arith.constant 0 : index
    %16 = vector.load %arg7[%c0_14, %c0_15] : memref<32x2xf32, #tpu.memory_space<vmem>>, vector<32x2xf32>
    %c0_16 = arith.constant 0 : index
    %c0_17 = arith.constant 0 : index
    %17 = vector.load %arg8[%c0_16, %c0_17] : memref<32x1xf32, #tpu.memory_space<vmem>>, vector<32x1xf32>
    %cst_18 = arith.constant dense<0.000000e+00> : vector<32x512xf32>
    %18 = tpu.matmul %15, %14, %cst_18 {dimension_numbers = #tpu.dot_dimension_numbers<[1], [0], [0], [1], [0, 0, 1, 1], [], []>} : vector<32x30xf32>, vector<30x512xf32>, vector<32x512xf32> -> vector<32x512xf32>
    %cst_19 = arith.constant dense<0.000000e+00> : vector<32x512xf32>
    %19 = tpu.matmul %16, %0, %cst_19 {dimension_numbers = #tpu.dot_dimension_numbers<[1], [0], [0], [1], [0, 0, 1, 1], [], []>} : vector<32x2xf32>, vector<2x512xf32>, vector<32x512xf32> -> vector<32x512xf32>
    %20 = arith.addf %18, %19 : vector<32x512xf32>
    %21 = vector.broadcast %17 : vector<32x1xf32> to vector<32x512xf32>
    %22 = arith.addf %20, %21 : vector<32x512xf32>
    %cst_20 = arith.constant 0.000000e+00 : f32
    %23 = vector.broadcast %cst_20 : f32 to vector<32x512xf32>
    %24 = arith.maximumf %22, %23 : vector<32x512xf32>
    %c0_21 = arith.constant 0 : index
    %c0_22 = arith.constant 0 : index
    %25 = vector.load %arg9[%c0_21, %c0_22] : memref<32x32xf32, #tpu.memory_space<vmem>>, vector<32x32xf32>
    %c0_23 = arith.constant 0 : index
    %c0_24 = arith.constant 0 : index
    %26 = vector.load %arg10[%c0_23, %c0_24] : memref<32x1xf32, #tpu.memory_space<vmem>>, vector<32x1xf32>
    %cst_25 = arith.constant dense<0.000000e+00> : vector<32x512xf32>
    %27 = tpu.matmul %25, %24, %cst_25 {dimension_numbers = #tpu.dot_dimension_numbers<[1], [0], [0], [1], [0, 0, 1, 1], [], []>} : vector<32x32xf32>, vector<32x512xf32>, vector<32x512xf32> -> vector<32x512xf32>
    %28 = vector.broadcast %26 : vector<32x1xf32> to vector<32x512xf32>
    %29 = arith.addf %27, %28 : vector<32x512xf32>
    %cst_26 = arith.constant 0.000000e+00 : f32
    %30 = vector.broadcast %cst_26 : f32 to vector<32x512xf32>
    %31 = arith.maximumf %29, %30 : vector<32x512xf32>
    %c0_27 = arith.constant 0 : index
    %c0_28 = arith.constant 0 : index
    %32 = vector.load %arg11[%c0_27, %c0_28] : memref<1x32xf32, #tpu.memory_space<vmem>>, vector<1x32xf32>
    %c0_29 = arith.constant 0 : index
    %c0_30 = arith.constant 0 : index
    %33 = vector.load %arg12[%c0_29, %c0_30] : memref<1x1xf32, #tpu.memory_space<vmem>>, vector<1x1xf32>
    %cst_31 = arith.constant dense<0.000000e+00> : vector<1x512xf32>
    %34 = tpu.matmul %32, %31, %cst_31 {dimension_numbers = #tpu.dot_dimension_numbers<[1], [0], [0], [1], [0, 0, 1, 1], [], []>} : vector<1x32xf32>, vector<32x512xf32>, vector<1x512xf32> -> vector<1x512xf32>
    %35 = vector.broadcast %33 : vector<1x1xf32> to vector<1x512xf32>
    %36 = arith.addf %34, %35 : vector<1x512xf32>
    %cst_32 = arith.constant 0.000000e+00 : f32
    %37 = vector.broadcast %cst_32 : f32 to vector<1x512xf32>
    %38 = arith.maximumf %36, %37 : vector<1x512xf32>
    %c0_33 = arith.constant 0 : index
    %c0_34 = arith.constant 0 : index
    %39 = vector.load %arg13[%c0_33, %c0_34] : memref<1x3072xf32, #tpu.memory_space<vmem>>, vector<1x512xf32>
    tpu.vector_store %arg13[%c0_33, %c0_34], %38 {strides = array<i32>} : memref<1x3072xf32, #tpu.memory_space<vmem>>, vector<1x512xf32>,
    %c0_35 = arith.constant 0 : index
    %c512 = arith.constant 512 : index
    %40 = vector.load %arg1[%c0_35, %c512] : memref<2x3072xf32, #tpu.memory_space<vmem>>, vector<2x512xf32>
    %c0_36 = arith.constant 0 : index
    %c0_37 = arith.constant 0 : index
    %41 = vector.load %arg2[%c0_36, %c0_37] : memref<32x2xf32, #tpu.memory_space<vmem>>, vector<32x2xf32>
    %c0_38 = arith.constant 0 : index
    %c0_39 = arith.constant 0 : index
    %42 = vector.load %arg3[%c0_38, %c0_39] : memref<32x1xf32, #tpu.memory_space<vmem>>, vector<32x1xf32>
    %cst_40 = arith.constant dense<0.000000e+00> : vector<32x512xf32>
    %43 = tpu.matmul %41, %40, %cst_40 {dimension_numbers = #tpu.dot_dimension_numbers<[1], [0], [0], [1], [0, 0, 1, 1], [], []>} : vector<32x2xf32>, vector<2x512xf32>, vector<32x512xf32> -> vector<32x512xf32>
    %44 = vector.broadcast %42 : vector<32x1xf32> to vector<32x512xf32>
    %45 = arith.addf %43, %44 : vector<32x512xf32>
    %cst_41 = arith.constant 0.000000e+00 : f32
    %46 = vector.broadcast %cst_41 : f32 to vector<32x512xf32>
    %47 = arith.maximumf %45, %46 : vector<32x512xf32>
    %c0_42 = arith.constant 0 : index
    %c0_43 = arith.constant 0 : index
    %48 = vector.load %arg4[%c0_42, %c0_43] : memref<30x32xf32, #tpu.memory_space<vmem>>, vector<30x32xf32>
    %c0_44 = arith.constant 0 : index
    %c0_45 = arith.constant 0 : index
    %49 = vector.load %arg5[%c0_44, %c0_45] : memref<30x1xf32, #tpu.memory_space<vmem>>, vector<30x1xf32>
    %cst_46 = arith.constant dense<0.000000e+00> : vector<30x512xf32>
    %50 = tpu.matmul %48, %47, %cst_46 {dimension_numbers = #tpu.dot_dimension_numbers<[1], [0], [0], [1], [0, 0, 1, 1], [], []>} : vector<30x32xf32>, vector<32x512xf32>, vector<30x512xf32> -> vector<30x512xf32>
    %51 = vector.broadcast %49 : vector<30x1xf32> to vector<30x512xf32>
    %52 = arith.addf %50, %51 : vector<30x512xf32>
    %cst_47 = arith.constant 0.000000e+00 : f32
    %53 = vector.broadcast %cst_47 : f32 to vector<30x512xf32>
    %54 = arith.maximumf %52, %53 : vector<30x512xf32>
    %c0_48 = arith.constant 0 : index
    %c0_49 = arith.constant 0 : index
    %55 = vector.load %arg6[%c0_48, %c0_49] : memref<32x30xf32, #tpu.memory_space<vmem>>, vector<32x30xf32>
    %c0_50 = arith.constant 0 : index
    %c0_51 = arith.constant 0 : index
    %56 = vector.load %arg7[%c0_50, %c0_51] : memref<32x2xf32, #tpu.memory_space<vmem>>, vector<32x2xf32>
    %c0_52 = arith.constant 0 : index
    %c0_53 = arith.constant 0 : index
    %57 = vector.load %arg8[%c0_52, %c0_53] : memref<32x1xf32, #tpu.memory_space<vmem>>, vector<32x1xf32>
    %cst_54 = arith.constant dense<0.000000e+00> : vector<32x512xf32>
    %58 = tpu.matmul %55, %54, %cst_54 {dimension_numbers = #tpu.dot_dimension_numbers<[1], [0], [0], [1], [0, 0, 1, 1], [], []>} : vector<32x30xf32>, vector<30x512xf32>, vector<32x512xf32> -> vector<32x512xf32>
    %cst_55 = arith.constant dense<0.000000e+00> : vector<32x512xf32>
    %59 = tpu.matmul %56, %40, %cst_55 {dimension_numbers = #tpu.dot_dimension_numbers<[1], [0], [0], [1], [0, 0, 1, 1], [], []>} : vector<32x2xf32>, vector<2x512xf32>, vector<32x512xf32> -> vector<32x512xf32>
    %60 = arith.addf %58, %59 : vector<32x512xf32>
    %61 = vector.broadcast %57 : vector<32x1xf32> to vector<32x512xf32>
    %62 = arith.addf %60, %61 : vector<32x512xf32>
    %cst_56 = arith.constant 0.000000e+00 : f32
    %63 = vector.broadcast %cst_56 : f32 to vector<32x512xf32>
    %64 = arith.maximumf %62, %63 : vector<32x512xf32>
    %c0_57 = arith.constant 0 : index
    %c0_58 = arith.constant 0 : index
    %65 = vector.load %arg9[%c0_57, %c0_58] : memref<32x32xf32, #tpu.memory_space<vmem>>, vector<32x32xf32>
    %c0_59 = arith.constant 0 : index
    %c0_60 = arith.constant 0 : index
    %66 = vector.load %arg10[%c0_59, %c0_60] : memref<32x1xf32, #tpu.memory_space<vmem>>, vector<32x1xf32>
    %cst_61 = arith.constant dense<0.000000e+00> : vector<32x512xf32>
    %67 = tpu.matmul %65, %64, %cst_61 {dimension_numbers = #tpu.dot_dimension_numbers<[1], [0], [0], [1], [0, 0, 1, 1], [], []>} : vector<32x32xf32>, vector<32x512xf32>, vector<32x512xf32> -> vector<32x512xf32>
    %68 = vector.broadcast %66 : vector<32x1xf32> to vector<32x512xf32>
    %69 = arith.addf %67, %68 : vector<32x512xf32>
    %cst_62 = arith.constant 0.000000e+00 : f32
    %70 = vector.broadcast %cst_62 : f32 to vector<32x512xf32>
    %71 = arith.maximumf %69, %70 : vector<32x512xf32>
    %c0_63 = arith.constant 0 : index
    %c0_64 = arith.constant 0 : index
    %72 = vector.load %arg11[%c0_63, %c0_64] : memref<1x32xf32, #tpu.memory_space<vmem>>, vector<1x32xf32>
    %c0_65 = arith.constant 0 : index
    %c0_66 = arith.constant 0 : index
    %73 = vector.load %arg12[%c0_65, %c0_66] : memref<1x1xf32, #tpu.memory_space<vmem>>, vector<1x1xf32>
    %cst_67 = arith.constant dense<0.000000e+00> : vector<1x512xf32>
    %74 = tpu.matmul %72, %71, %cst_67 {dimension_numbers = #tpu.dot_dimension_numbers<[1], [0], [0], [1], [0, 0, 1, 1], [], []>} : vector<1x32xf32>, vector<32x512xf32>, vector<1x512xf32> -> vector<1x512xf32>
    %75 = vector.broadcast %73 : vector<1x1xf32> to vector<1x512xf32>
    %76 = arith.addf %74, %75 : vector<1x512xf32>
    %cst_68 = arith.constant 0.000000e+00 : f32
    %77 = vector.broadcast %cst_68 : f32 to vector<1x512xf32>
    %78 = arith.maximumf %76, %77 : vector<1x512xf32>
    %c0_69 = arith.constant 0 : index
    %c512_70 = arith.constant 512 : index
    %79 = vector.load %arg13[%c0_69, %c512_70] : memref<1x3072xf32, #tpu.memory_space<vmem>>, vector<1x512xf32>
    tpu.vector_store %arg13[%c0_69, %c512_70], %78 {strides = array<i32>} : memref<1x3072xf32, #tpu.memory_space<vmem>>, vector<1x512xf32>,
    %c0_71 = arith.constant 0 : index
    %c1024 = arith.constant 1024 : index
    %80 = vector.load %arg1[%c0_71, %c1024] : memref<2x3072xf32, #tpu.memory_space<vmem>>, vector<2x512xf32>
    %c0_72 = arith.constant 0 : index
    %c0_73 = arith.constant 0 : index
    %81 = vector.load %arg2[%c0_72, %c0_73] : memref<32x2xf32, #tpu.memory_space<vmem>>, vector<32x2xf32>
    %c0_74 = arith.constant 0 : index
    %c0_75 = arith.constant 0 : index
    %82 = vector.load %arg3[%c0_74, %c0_75] : memref<32x1xf32, #tpu.memory_space<vmem>>, vector<32x1xf32>
    %cst_76 = arith.constant dense<0.000000e+00> : vector<32x512xf32>
    %83 = tpu.matmul %81, %80, %cst_76 {dimension_numbers = #tpu.dot_dimension_numbers<[1], [0], [0], [1], [0, 0, 1, 1], [], []>} : vector<32x2xf32>, vector<2x512xf32>, vector<32x512xf32> -> vector<32x512xf32>
    %84 = vector.broadcast %82 : vector<32x1xf32> to vector<32x512xf32>
    %85 = arith.addf %83, %84 : vector<32x512xf32>
    %cst_77 = arith.constant 0.000000e+00 : f32
    %86 = vector.broadcast %cst_77 : f32 to vector<32x512xf32>
    %87 = arith.maximumf %85, %86 : vector<32x512xf32>
    %c0_78 = arith.constant 0 : index
    %c0_79 = arith.constant 0 : index
    %88 = vector.load %arg4[%c0_78, %c0_79] : memref<30x32xf32, #tpu.memory_space<vmem>>, vector<30x32xf32>
    %c0_80 = arith.constant 0 : index
    %c0_81 = arith.constant 0 : index
    %89 = vector.load %arg5[%c0_80, %c0_81] : memref<30x1xf32, #tpu.memory_space<vmem>>, vector<30x1xf32>
    %cst_82 = arith.constant dense<0.000000e+00> : vector<30x512xf32>
    %90 = tpu.matmul %88, %87, %cst_82 {dimension_numbers = #tpu.dot_dimension_numbers<[1], [0], [0], [1], [0, 0, 1, 1], [], []>} : vector<30x32xf32>, vector<32x512xf32>, vector<30x512xf32> -> vector<30x512xf32>
    %91 = vector.broadcast %89 : vector<30x1xf32> to vector<30x512xf32>
    %92 = arith.addf %90, %91 : vector<30x512xf32>
    %cst_83 = arith.constant 0.000000e+00 : f32
    %93 = vector.broadcast %cst_83 : f32 to vector<30x512xf32>
    %94 = arith.maximumf %92, %93 : vector<30x512xf32>
    %c0_84 = arith.constant 0 : index
    %c0_85 = arith.constant 0 : index
    %95 = vector.load %arg6[%c0_84, %c0_85] : memref<32x30xf32, #tpu.memory_space<vmem>>, vector<32x30xf32>
    %c0_86 = arith.constant 0 : index
    %c0_87 = arith.constant 0 : index
    %96 = vector.load %arg7[%c0_86, %c0_87] : memref<32x2xf32, #tpu.memory_space<vmem>>, vector<32x2xf32>
    %c0_88 = arith.constant 0 : index
    %c0_89 = arith.constant 0 : index
    %97 = vector.load %arg8[%c0_88, %c0_89] : memref<32x1xf32, #tpu.memory_space<vmem>>, vector<32x1xf32>
    %cst_90 = arith.constant dense<0.000000e+00> : vector<32x512xf32>
    %98 = tpu.matmul %95, %94, %cst_90 {dimension_numbers = #tpu.dot_dimension_numbers<[1], [0], [0], [1], [0, 0, 1, 1], [], []>} : vector<32x30xf32>, vector<30x512xf32>, vector<32x512xf32> -> vector<32x512xf32>
    %cst_91 = arith.constant dense<0.000000e+00> : vector<32x512xf32>
    %99 = tpu.matmul %96, %80, %cst_91 {dimension_numbers = #tpu.dot_dimension_numbers<[1], [0], [0], [1], [0, 0, 1, 1], [], []>} : vector<32x2xf32>, vector<2x512xf32>, vector<32x512xf32> -> vector<32x512xf32>
    %100 = arith.addf %98, %99 : vector<32x512xf32>
    %101 = vector.broadcast %97 : vector<32x1xf32> to vector<32x512xf32>
    %102 = arith.addf %100, %101 : vector<32x512xf32>
    %cst_92 = arith.constant 0.000000e+00 : f32
    %103 = vector.broadcast %cst_92 : f32 to vector<32x512xf32>
    %104 = arith.maximumf %102, %103 : vector<32x512xf32>
    %c0_93 = arith.constant 0 : index
    %c0_94 = arith.constant 0 : index
    %105 = vector.load %arg9[%c0_93, %c0_94] : memref<32x32xf32, #tpu.memory_space<vmem>>, vector<32x32xf32>
    %c0_95 = arith.constant 0 : index
    %c0_96 = arith.constant 0 : index
    %106 = vector.load %arg10[%c0_95, %c0_96] : memref<32x1xf32, #tpu.memory_space<vmem>>, vector<32x1xf32>
    %cst_97 = arith.constant dense<0.000000e+00> : vector<32x512xf32>
    %107 = tpu.matmul %105, %104, %cst_97 {dimension_numbers = #tpu.dot_dimension_numbers<[1], [0], [0], [1], [0, 0, 1, 1], [], []>} : vector<32x32xf32>, vector<32x512xf32>, vector<32x512xf32> -> vector<32x512xf32>
    %108 = vector.broadcast %106 : vector<32x1xf32> to vector<32x512xf32>
    %109 = arith.addf %107, %108 : vector<32x512xf32>
    %cst_98 = arith.constant 0.000000e+00 : f32
    %110 = vector.broadcast %cst_98 : f32 to vector<32x512xf32>
    %111 = arith.maximumf %109, %110 : vector<32x512xf32>
    %c0_99 = arith.constant 0 : index
    %c0_100 = arith.constant 0 : index
    %112 = vector.load %arg11[%c0_99, %c0_100] : memref<1x32xf32, #tpu.memory_space<vmem>>, vector<1x32xf32>
    %c0_101 = arith.constant 0 : index
    %c0_102 = arith.constant 0 : index
    %113 = vector.load %arg12[%c0_101, %c0_102] : memref<1x1xf32, #tpu.memory_space<vmem>>, vector<1x1xf32>
    %cst_103 = arith.constant dense<0.000000e+00> : vector<1x512xf32>
    %114 = tpu.matmul %112, %111, %cst_103 {dimension_numbers = #tpu.dot_dimension_numbers<[1], [0], [0], [1], [0, 0, 1, 1], [], []>} : vector<1x32xf32>, vector<32x512xf32>, vector<1x512xf32> -> vector<1x512xf32>
    %115 = vector.broadcast %113 : vector<1x1xf32> to vector<1x512xf32>
    %116 = arith.addf %114, %115 : vector<1x512xf32>
    %cst_104 = arith.constant 0.000000e+00 : f32
    %117 = vector.broadcast %cst_104 : f32 to vector<1x512xf32>
    %118 = arith.maximumf %116, %117 : vector<1x512xf32>
    %c0_105 = arith.constant 0 : index
    %c1024_106 = arith.constant 1024 : index
    %119 = vector.load %arg13[%c0_105, %c1024_106] : memref<1x3072xf32, #tpu.memory_space<vmem>>, vector<1x512xf32>
    tpu.vector_store %arg13[%c0_105, %c1024_106], %118 {strides = array<i32>} : memref<1x3072xf32, #tpu.memory_space<vmem>>, vector<1x512xf32>,
    %c0_107 = arith.constant 0 : index
    %c1536 = arith.constant 1536 : index
    %120 = vector.load %arg1[%c0_107, %c1536] : memref<2x3072xf32, #tpu.memory_space<vmem>>, vector<2x512xf32>
    %c0_108 = arith.constant 0 : index
    %c0_109 = arith.constant 0 : index
    %121 = vector.load %arg2[%c0_108, %c0_109] : memref<32x2xf32, #tpu.memory_space<vmem>>, vector<32x2xf32>
    %c0_110 = arith.constant 0 : index
    %c0_111 = arith.constant 0 : index
    %122 = vector.load %arg3[%c0_110, %c0_111] : memref<32x1xf32, #tpu.memory_space<vmem>>, vector<32x1xf32>
    %cst_112 = arith.constant dense<0.000000e+00> : vector<32x512xf32>
    %123 = tpu.matmul %121, %120, %cst_112 {dimension_numbers = #tpu.dot_dimension_numbers<[1], [0], [0], [1], [0, 0, 1, 1], [], []>} : vector<32x2xf32>, vector<2x512xf32>, vector<32x512xf32> -> vector<32x512xf32>
    %124 = vector.broadcast %122 : vector<32x1xf32> to vector<32x512xf32>
    %125 = arith.addf %123, %124 : vector<32x512xf32>
    %cst_113 = arith.constant 0.000000e+00 : f32
    %126 = vector.broadcast %cst_113 : f32 to vector<32x512xf32>
    %127 = arith.maximumf %125, %126 : vector<32x512xf32>
    %c0_114 = arith.constant 0 : index
    %c0_115 = arith.constant 0 : index
    %128 = vector.load %arg4[%c0_114, %c0_115] : memref<30x32xf32, #tpu.memory_space<vmem>>, vector<30x32xf32>
    %c0_116 = arith.constant 0 : index
    %c0_117 = arith.constant 0 : index
    %129 = vector.load %arg5[%c0_116, %c0_117] : memref<30x1xf32, #tpu.memory_space<vmem>>, vector<30x1xf32>
    %cst_118 = arith.constant dense<0.000000e+00> : vector<30x512xf32>
    %130 = tpu.matmul %128, %127, %cst_118 {dimension_numbers = #tpu.dot_dimension_numbers<[1], [0], [0], [1], [0, 0, 1, 1], [], []>} : vector<30x32xf32>, vector<32x512xf32>, vector<30x512xf32> -> vector<30x512xf32>
    %131 = vector.broadcast %129 : vector<30x1xf32> to vector<30x512xf32>
    %132 = arith.addf %130, %131 : vector<30x512xf32>
    %cst_119 = arith.constant 0.000000e+00 : f32
    %133 = vector.broadcast %cst_119 : f32 to vector<30x512xf32>
    %134 = arith.maximumf %132, %133 : vector<30x512xf32>
    %c0_120 = arith.constant 0 : index
    %c0_121 = arith.constant 0 : index
    %135 = vector.load %arg6[%c0_120, %c0_121] : memref<32x30xf32, #tpu.memory_space<vmem>>, vector<32x30xf32>
    %c0_122 = arith.constant 0 : index
    %c0_123 = arith.constant 0 : index
    %136 = vector.load %arg7[%c0_122, %c0_123] : memref<32x2xf32, #tpu.memory_space<vmem>>, vector<32x2xf32>
    %c0_124 = arith.constant 0 : index
    %c0_125 = arith.constant 0 : index
    %137 = vector.load %arg8[%c0_124, %c0_125] : memref<32x1xf32, #tpu.memory_space<vmem>>, vector<32x1xf32>
    %cst_126 = arith.constant dense<0.000000e+00> : vector<32x512xf32>
    %138 = tpu.matmul %135, %134, %cst_126 {dimension_numbers = #tpu.dot_dimension_numbers<[1], [0], [0], [1], [0, 0, 1, 1], [], []>} : vector<32x30xf32>, vector<30x512xf32>, vector<32x512xf32> -> vector<32x512xf32>
    %cst_127 = arith.constant dense<0.000000e+00> : vector<32x512xf32>
    %139 = tpu.matmul %136, %120, %cst_127 {dimension_numbers = #tpu.dot_dimension_numbers<[1], [0], [0], [1], [0, 0, 1, 1], [], []>} : vector<32x2xf32>, vector<2x512xf32>, vector<32x512xf32> -> vector<32x512xf32>
    %140 = arith.addf %138, %139 : vector<32x512xf32>
    %141 = vector.broadcast %137 : vector<32x1xf32> to vector<32x512xf32>
    %142 = arith.addf %140, %141 : vector<32x512xf32>
    %cst_128 = arith.constant 0.000000e+00 : f32
    %143 = vector.broadcast %cst_128 : f32 to vector<32x512xf32>
    %144 = arith.maximumf %142, %143 : vector<32x512xf32>
    %c0_129 = arith.constant 0 : index
    %c0_130 = arith.constant 0 : index
    %145 = vector.load %arg9[%c0_129, %c0_130] : memref<32x32xf32, #tpu.memory_space<vmem>>, vector<32x32xf32>
    %c0_131 = arith.constant 0 : index
    %c0_132 = arith.constant 0 : index
    %146 = vector.load %arg10[%c0_131, %c0_132] : memref<32x1xf32, #tpu.memory_space<vmem>>, vector<32x1xf32>
    %cst_133 = arith.constant dense<0.000000e+00> : vector<32x512xf32>
    %147 = tpu.matmul %145, %144, %cst_133 {dimension_numbers = #tpu.dot_dimension_numbers<[1], [0], [0], [1], [0, 0, 1, 1], [], []>} : vector<32x32xf32>, vector<32x512xf32>, vector<32x512xf32> -> vector<32x512xf32>
    %148 = vector.broadcast %146 : vector<32x1xf32> to vector<32x512xf32>
    %149 = arith.addf %147, %148 : vector<32x512xf32>
    %cst_134 = arith.constant 0.000000e+00 : f32
    %150 = vector.broadcast %cst_134 : f32 to vector<32x512xf32>
    %151 = arith.maximumf %149, %150 : vector<32x512xf32>
    %c0_135 = arith.constant 0 : index
    %c0_136 = arith.constant 0 : index
    %152 = vector.load %arg11[%c0_135, %c0_136] : memref<1x32xf32, #tpu.memory_space<vmem>>, vector<1x32xf32>
    %c0_137 = arith.constant 0 : index
    %c0_138 = arith.constant 0 : index
    %153 = vector.load %arg12[%c0_137, %c0_138] : memref<1x1xf32, #tpu.memory_space<vmem>>, vector<1x1xf32>
    %cst_139 = arith.constant dense<0.000000e+00> : vector<1x512xf32>
    %154 = tpu.matmul %152, %151, %cst_139 {dimension_numbers = #tpu.dot_dimension_numbers<[1], [0], [0], [1], [0, 0, 1, 1], [], []>} : vector<1x32xf32>, vector<32x512xf32>, vector<1x512xf32> -> vector<1x512xf32>
    %155 = vector.broadcast %153 : vector<1x1xf32> to vector<1x512xf32>
    %156 = arith.addf %154, %155 : vector<1x512xf32>
    %cst_140 = arith.constant 0.000000e+00 : f32
    %157 = vector.broadcast %cst_140 : f32 to vector<1x512xf32>
    %158 = arith.maximumf %156, %157 : vector<1x512xf32>
    %c0_141 = arith.constant 0 : index
    %c1536_142 = arith.constant 1536 : index
    %159 = vector.load %arg13[%c0_141, %c1536_142] : memref<1x3072xf32, #tpu.memory_space<vmem>>, vector<1x512xf32>
    tpu.vector_store %arg13[%c0_141, %c1536_142], %158 {strides = array<i32>} : memref<1x3072xf32, #tpu.memory_space<vmem>>, vector<1x512xf32>,
    %c0_143 = arith.constant 0 : index
    %c2048 = arith.constant 2048 : index
    %160 = vector.load %arg1[%c0_143, %c2048] : memref<2x3072xf32, #tpu.memory_space<vmem>>, vector<2x512xf32>
    %c0_144 = arith.constant 0 : index
    %c0_145 = arith.constant 0 : index
    %161 = vector.load %arg2[%c0_144, %c0_145] : memref<32x2xf32, #tpu.memory_space<vmem>>, vector<32x2xf32>
    %c0_146 = arith.constant 0 : index
    %c0_147 = arith.constant 0 : index
    %162 = vector.load %arg3[%c0_146, %c0_147] : memref<32x1xf32, #tpu.memory_space<vmem>>, vector<32x1xf32>
    %cst_148 = arith.constant dense<0.000000e+00> : vector<32x512xf32>
    %163 = tpu.matmul %161, %160, %cst_148 {dimension_numbers = #tpu.dot_dimension_numbers<[1], [0], [0], [1], [0, 0, 1, 1], [], []>} : vector<32x2xf32>, vector<2x512xf32>, vector<32x512xf32> -> vector<32x512xf32>
    %164 = vector.broadcast %162 : vector<32x1xf32> to vector<32x512xf32>
    %165 = arith.addf %163, %164 : vector<32x512xf32>
    %cst_149 = arith.constant 0.000000e+00 : f32
    %166 = vector.broadcast %cst_149 : f32 to vector<32x512xf32>
    %167 = arith.maximumf %165, %166 : vector<32x512xf32>
    %c0_150 = arith.constant 0 : index
    %c0_151 = arith.constant 0 : index
    %168 = vector.load %arg4[%c0_150, %c0_151] : memref<30x32xf32, #tpu.memory_space<vmem>>, vector<30x32xf32>
    %c0_152 = arith.constant 0 : index
    %c0_153 = arith.constant 0 : index
    %169 = vector.load %arg5[%c0_152, %c0_153] : memref<30x1xf32, #tpu.memory_space<vmem>>, vector<30x1xf32>
    %cst_154 = arith.constant dense<0.000000e+00> : vector<30x512xf32>
    %170 = tpu.matmul %168, %167, %cst_154 {dimension_numbers = #tpu.dot_dimension_numbers<[1], [0], [0], [1], [0, 0, 1, 1], [], []>} : vector<30x32xf32>, vector<32x512xf32>, vector<30x512xf32> -> vector<30x512xf32>
    %171 = vector.broadcast %169 : vector<30x1xf32> to vector<30x512xf32>
    %172 = arith.addf %170, %171 : vector<30x512xf32>
    %cst_155 = arith.constant 0.000000e+00 : f32
    %173 = vector.broadcast %cst_155 : f32 to vector<30x512xf32>
    %174 = arith.maximumf %172, %173 : vector<30x512xf32>
    %c0_156 = arith.constant 0 : index
    %c0_157 = arith.constant 0 : index
    %175 = vector.load %arg6[%c0_156, %c0_157] : memref<32x30xf32, #tpu.memory_space<vmem>>, vector<32x30xf32>
    %c0_158 = arith.constant 0 : index
    %c0_159 = arith.constant 0 : index
    %176 = vector.load %arg7[%c0_158, %c0_159] : memref<32x2xf32, #tpu.memory_space<vmem>>, vector<32x2xf32>
    %c0_160 = arith.constant 0 : index
    %c0_161 = arith.constant 0 : index
    %177 = vector.load %arg8[%c0_160, %c0_161] : memref<32x1xf32, #tpu.memory_space<vmem>>, vector<32x1xf32>
    %cst_162 = arith.constant dense<0.000000e+00> : vector<32x512xf32>
    %178 = tpu.matmul %175, %174, %cst_162 {dimension_numbers = #tpu.dot_dimension_numbers<[1], [0], [0], [1], [0, 0, 1, 1], [], []>} : vector<32x30xf32>, vector<30x512xf32>, vector<32x512xf32> -> vector<32x512xf32>
    %cst_163 = arith.constant dense<0.000000e+00> : vector<32x512xf32>
    %179 = tpu.matmul %176, %160, %cst_163 {dimension_numbers = #tpu.dot_dimension_numbers<[1], [0], [0], [1], [0, 0, 1, 1], [], []>} : vector<32x2xf32>, vector<2x512xf32>, vector<32x512xf32> -> vector<32x512xf32>
    %180 = arith.addf %178, %179 : vector<32x512xf32>
    %181 = vector.broadcast %177 : vector<32x1xf32> to vector<32x512xf32>
    %182 = arith.addf %180, %181 : vector<32x512xf32>
    %cst_164 = arith.constant 0.000000e+00 : f32
    %183 = vector.broadcast %cst_164 : f32 to vector<32x512xf32>
    %184 = arith.maximumf %182, %183 : vector<32x512xf32>
    %c0_165 = arith.constant 0 : index
    %c0_166 = arith.constant 0 : index
    %185 = vector.load %arg9[%c0_165, %c0_166] : memref<32x32xf32, #tpu.memory_space<vmem>>, vector<32x32xf32>
    %c0_167 = arith.constant 0 : index
    %c0_168 = arith.constant 0 : index
    %186 = vector.load %arg10[%c0_167, %c0_168] : memref<32x1xf32, #tpu.memory_space<vmem>>, vector<32x1xf32>
    %cst_169 = arith.constant dense<0.000000e+00> : vector<32x512xf32>
    %187 = tpu.matmul %185, %184, %cst_169 {dimension_numbers = #tpu.dot_dimension_numbers<[1], [0], [0], [1], [0, 0, 1, 1], [], []>} : vector<32x32xf32>, vector<32x512xf32>, vector<32x512xf32> -> vector<32x512xf32>
    %188 = vector.broadcast %186 : vector<32x1xf32> to vector<32x512xf32>
    %189 = arith.addf %187, %188 : vector<32x512xf32>
    %cst_170 = arith.constant 0.000000e+00 : f32
    %190 = vector.broadcast %cst_170 : f32 to vector<32x512xf32>
    %191 = arith.maximumf %189, %190 : vector<32x512xf32>
    %c0_171 = arith.constant 0 : index
    %c0_172 = arith.constant 0 : index
    %192 = vector.load %arg11[%c0_171, %c0_172] : memref<1x32xf32, #tpu.memory_space<vmem>>, vector<1x32xf32>
    %c0_173 = arith.constant 0 : index
    %c0_174 = arith.constant 0 : index
    %193 = vector.load %arg12[%c0_173, %c0_174] : memref<1x1xf32, #tpu.memory_space<vmem>>, vector<1x1xf32>
    %cst_175 = arith.constant dense<0.000000e+00> : vector<1x512xf32>
    %194 = tpu.matmul %192, %191, %cst_175 {dimension_numbers = #tpu.dot_dimension_numbers<[1], [0], [0], [1], [0, 0, 1, 1], [], []>} : vector<1x32xf32>, vector<32x512xf32>, vector<1x512xf32> -> vector<1x512xf32>
    %195 = vector.broadcast %193 : vector<1x1xf32> to vector<1x512xf32>
    %196 = arith.addf %194, %195 : vector<1x512xf32>
    %cst_176 = arith.constant 0.000000e+00 : f32
    %197 = vector.broadcast %cst_176 : f32 to vector<1x512xf32>
    %198 = arith.maximumf %196, %197 : vector<1x512xf32>
    %c0_177 = arith.constant 0 : index
    %c2048_178 = arith.constant 2048 : index
    %199 = vector.load %arg13[%c0_177, %c2048_178] : memref<1x3072xf32, #tpu.memory_space<vmem>>, vector<1x512xf32>
    tpu.vector_store %arg13[%c0_177, %c2048_178], %198 {strides = array<i32>} : memref<1x3072xf32, #tpu.memory_space<vmem>>, vector<1x512xf32>,
    %c0_179 = arith.constant 0 : index
    %c2560 = arith.constant 2560 : index
    %200 = vector.load %arg1[%c0_179, %c2560] : memref<2x3072xf32, #tpu.memory_space<vmem>>, vector<2x512xf32>
    %c0_180 = arith.constant 0 : index
    %c0_181 = arith.constant 0 : index
    %201 = vector.load %arg2[%c0_180, %c0_181] : memref<32x2xf32, #tpu.memory_space<vmem>>, vector<32x2xf32>
    %c0_182 = arith.constant 0 : index
    %c0_183 = arith.constant 0 : index
    %202 = vector.load %arg3[%c0_182, %c0_183] : memref<32x1xf32, #tpu.memory_space<vmem>>, vector<32x1xf32>
    %cst_184 = arith.constant dense<0.000000e+00> : vector<32x512xf32>
    %203 = tpu.matmul %201, %200, %cst_184 {dimension_numbers = #tpu.dot_dimension_numbers<[1], [0], [0], [1], [0, 0, 1, 1], [], []>} : vector<32x2xf32>, vector<2x512xf32>, vector<32x512xf32> -> vector<32x512xf32>
    %204 = vector.broadcast %202 : vector<32x1xf32> to vector<32x512xf32>
    %205 = arith.addf %203, %204 : vector<32x512xf32>
    %cst_185 = arith.constant 0.000000e+00 : f32
    %206 = vector.broadcast %cst_185 : f32 to vector<32x512xf32>
    %207 = arith.maximumf %205, %206 : vector<32x512xf32>
    %c0_186 = arith.constant 0 : index
    %c0_187 = arith.constant 0 : index
    %208 = vector.load %arg4[%c0_186, %c0_187] : memref<30x32xf32, #tpu.memory_space<vmem>>, vector<30x32xf32>
    %c0_188 = arith.constant 0 : index
    %c0_189 = arith.constant 0 : index
    %209 = vector.load %arg5[%c0_188, %c0_189] : memref<30x1xf32, #tpu.memory_space<vmem>>, vector<30x1xf32>
    %cst_190 = arith.constant dense<0.000000e+00> : vector<30x512xf32>
    %210 = tpu.matmul %208, %207, %cst_190 {dimension_numbers = #tpu.dot_dimension_numbers<[1], [0], [0], [1], [0, 0, 1, 1], [], []>} : vector<30x32xf32>, vector<32x512xf32>, vector<30x512xf32> -> vector<30x512xf32>
    %211 = vector.broadcast %209 : vector<30x1xf32> to vector<30x512xf32>
    %212 = arith.addf %210, %211 : vector<30x512xf32>
    %cst_191 = arith.constant 0.000000e+00 : f32
    %213 = vector.broadcast %cst_191 : f32 to vector<30x512xf32>
    %214 = arith.maximumf %212, %213 : vector<30x512xf32>
    %c0_192 = arith.constant 0 : index
    %c0_193 = arith.constant 0 : index
    %215 = vector.load %arg6[%c0_192, %c0_193] : memref<32x30xf32, #tpu.memory_space<vmem>>, vector<32x30xf32>
    %c0_194 = arith.constant 0 : index
    %c0_195 = arith.constant 0 : index
    %216 = vector.load %arg7[%c0_194, %c0_195] : memref<32x2xf32, #tpu.memory_space<vmem>>, vector<32x2xf32>
    %c0_196 = arith.constant 0 : index
    %c0_197 = arith.constant 0 : index
    %217 = vector.load %arg8[%c0_196, %c0_197] : memref<32x1xf32, #tpu.memory_space<vmem>>, vector<32x1xf32>
    %cst_198 = arith.constant dense<0.000000e+00> : vector<32x512xf32>
    %218 = tpu.matmul %215, %214, %cst_198 {dimension_numbers = #tpu.dot_dimension_numbers<[1], [0], [0], [1], [0, 0, 1, 1], [], []>} : vector<32x30xf32>, vector<30x512xf32>, vector<32x512xf32> -> vector<32x512xf32>
    %cst_199 = arith.constant dense<0.000000e+00> : vector<32x512xf32>
    %219 = tpu.matmul %216, %200, %cst_199 {dimension_numbers = #tpu.dot_dimension_numbers<[1], [0], [0], [1], [0, 0, 1, 1], [], []>} : vector<32x2xf32>, vector<2x512xf32>, vector<32x512xf32> -> vector<32x512xf32>
    %220 = arith.addf %218, %219 : vector<32x512xf32>
    %221 = vector.broadcast %217 : vector<32x1xf32> to vector<32x512xf32>
    %222 = arith.addf %220, %221 : vector<32x512xf32>
    %cst_200 = arith.constant 0.000000e+00 : f32
    %223 = vector.broadcast %cst_200 : f32 to vector<32x512xf32>
    %224 = arith.maximumf %222, %223 : vector<32x512xf32>
    %c0_201 = arith.constant 0 : index
    %c0_202 = arith.constant 0 : index
    %225 = vector.load %arg9[%c0_201, %c0_202] : memref<32x32xf32, #tpu.memory_space<vmem>>, vector<32x32xf32>
    %c0_203 = arith.constant 0 : index
    %c0_204 = arith.constant 0 : index
    %226 = vector.load %arg10[%c0_203, %c0_204] : memref<32x1xf32, #tpu.memory_space<vmem>>, vector<32x1xf32>
    %cst_205 = arith.constant dense<0.000000e+00> : vector<32x512xf32>
    %227 = tpu.matmul %225, %224, %cst_205 {dimension_numbers = #tpu.dot_dimension_numbers<[1], [0], [0], [1], [0, 0, 1, 1], [], []>} : vector<32x32xf32>, vector<32x512xf32>, vector<32x512xf32> -> vector<32x512xf32>
    %228 = vector.broadcast %226 : vector<32x1xf32> to vector<32x512xf32>
    %229 = arith.addf %227, %228 : vector<32x512xf32>
    %cst_206 = arith.constant 0.000000e+00 : f32
    %230 = vector.broadcast %cst_206 : f32 to vector<32x512xf32>
    %231 = arith.maximumf %229, %230 : vector<32x512xf32>
    %c0_207 = arith.constant 0 : index
    %c0_208 = arith.constant 0 : index
    %232 = vector.load %arg11[%c0_207, %c0_208] : memref<1x32xf32, #tpu.memory_space<vmem>>, vector<1x32xf32>
    %c0_209 = arith.constant 0 : index
    %c0_210 = arith.constant 0 : index
    %233 = vector.load %arg12[%c0_209, %c0_210] : memref<1x1xf32, #tpu.memory_space<vmem>>, vector<1x1xf32>
    %cst_211 = arith.constant dense<0.000000e+00> : vector<1x512xf32>
    %234 = tpu.matmul %232, %231, %cst_211 {dimension_numbers = #tpu.dot_dimension_numbers<[1], [0], [0], [1], [0, 0, 1, 1], [], []>} : vector<1x32xf32>, vector<32x512xf32>, vector<1x512xf32> -> vector<1x512xf32>
    %235 = vector.broadcast %233 : vector<1x1xf32> to vector<1x512xf32>
    %236 = arith.addf %234, %235 : vector<1x512xf32>
    %cst_212 = arith.constant 0.000000e+00 : f32
    %237 = vector.broadcast %cst_212 : f32 to vector<1x512xf32>
    %238 = arith.maximumf %236, %237 : vector<1x512xf32>
    %c0_213 = arith.constant 0 : index
    %c2560_214 = arith.constant 2560 : index
    %239 = vector.load %arg13[%c0_213, %c2560_214] : memref<1x3072xf32, #tpu.memory_space<vmem>>, vector<1x512xf32>
    tpu.vector_store %arg13[%c0_213, %c2560_214], %238 {strides = array<i32>} : memref<1x3072xf32, #tpu.memory_space<vmem>>, vector<1x512xf32>,
    return
  }
  func.func @transform_0(%arg0: i32) -> (i32, i32) {
    %c0_i32 = arith.constant 0 : i32
    %c0_i32_0 = arith.constant 0 : i32
    return %c0_i32, %arg0 : i32, i32
  }
  func.func @transform_1(%arg0: i32) -> (i32, i32) {
    %c0_i32 = arith.constant 0 : i32
    %c0_i32_0 = arith.constant 0 : i32
    %c0_i32_1 = arith.constant 0 : i32
    return %c0_i32, %c0_i32_0 : i32, i32
  }
  func.func @transform_2(%arg0: i32) -> (i32, i32) {
    %c0_i32 = arith.constant 0 : i32
    %c0_i32_0 = arith.constant 0 : i32
    %c0_i32_1 = arith.constant 0 : i32
    return %c0_i32, %c0_i32_0 : i32, i32
  }
  func.func @transform_3(%arg0: i32) -> (i32, i32) {
    %c0_i32 = arith.constant 0 : i32
    %c0_i32_0 = arith.constant 0 : i32
    %c0_i32_1 = arith.constant 0 : i32
    return %c0_i32, %c0_i32_0 : i32, i32
  }
  func.func @transform_4(%arg0: i32) -> (i32, i32) {
    %c0_i32 = arith.constant 0 : i32
    %c0_i32_0 = arith.constant 0 : i32
    %c0_i32_1 = arith.constant 0 : i32
    return %c0_i32, %c0_i32_0 : i32, i32
  }
  func.func @transform_5(%arg0: i32) -> (i32, i32) {
    %c0_i32 = arith.constant 0 : i32
    %c0_i32_0 = arith.constant 0 : i32
    %c0_i32_1 = arith.constant 0 : i32
    return %c0_i32, %c0_i32_0 : i32, i32
  }
  func.func @transform_6(%arg0: i32) -> (i32, i32) {
    %c0_i32 = arith.constant 0 : i32
    %c0_i32_0 = arith.constant 0 : i32
    %c0_i32_1 = arith.constant 0 : i32
    return %c0_i32, %c0_i32_0 : i32, i32
  }
  func.func @transform_7(%arg0: i32) -> (i32, i32) {
    %c0_i32 = arith.constant 0 : i32
    %c0_i32_0 = arith.constant 0 : i32
    %c0_i32_1 = arith.constant 0 : i32
    return %c0_i32, %c0_i32_0 : i32, i32
  }
  func.func @transform_8(%arg0: i32) -> (i32, i32) {
    %c0_i32 = arith.constant 0 : i32
    %c0_i32_0 = arith.constant 0 : i32
    %c0_i32_1 = arith.constant 0 : i32
    return %c0_i32, %c0_i32_0 : i32, i32
  }
  func.func @transform_9(%arg0: i32) -> (i32, i32) {
    %c0_i32 = arith.constant 0 : i32
    %c0_i32_0 = arith.constant 0 : i32
    %c0_i32_1 = arith.constant 0 : i32
    return %c0_i32, %c0_i32_0 : i32, i32
  }
  func.func @transform_10(%arg0: i32) -> (i32, i32) {
    %c0_i32 = arith.constant 0 : i32
    %c0_i32_0 = arith.constant 0 : i32
    %c0_i32_1 = arith.constant 0 : i32
    return %c0_i32, %c0_i32_0 : i32, i32
  }
  func.func @transform_11(%arg0: i32) -> (i32, i32) {
    %c0_i32 = arith.constant 0 : i32
    %c0_i32_0 = arith.constant 0 : i32
    %c0_i32_1 = arith.constant 0 : i32
    return %c0_i32, %c0_i32_0 : i32, i32
  }
  func.func @transform_12(%arg0: i32) -> (i32, i32) {
    %c0_i32 = arith.constant 0 : i32
    %c0_i32_0 = arith.constant 0 : i32
    return %c0_i32, %arg0 : i32, i32
  }
}

</mosaic_0001>

<bundles_post_ra>
// kernel: implicit_net_forward.1
= control target key start
LH: loop header
LB: loop body
LE: loop exit
PB: predicated region body
PF: predicated region fallthrough
CT: control target
= control target key end

     0   :  { %s11884_s0 = inlined_call_operand.vmem [shape: f32[2,6000], index: 0, kind: input, shape index: {}]   ;;  %s11885_s1 = inlined_call_operand.vmem [shape: f32[32,2], index: 1, kind: input, shape index: {}]   ;;  %s11886_s2 = inlined_call_operand.vmem [shape: f32[32,1], index: 2, kind: input, shape index: {}]   ;;  %s11887_s3 = inlined_call_operand.vmem [shape: f32[30,32], index: 3, kind: input, shape index: {}]   ;;  %s11888_s4 = inlined_call_operand.vmem [shape: f32[30,1], index: 4, kind: input, shape index: {}]   ;;  %s11889_s5 = inlined_call_operand.vmem [shape: f32[32,30], index: 5, kind: input, shape index: {}]   ;;  %s11890_s6 = inlined_call_operand.vmem [shape: f32[32,2], index: 6, kind: input, shape index: {}]   ;;  %s11891_s7 = inlined_call_operand.vmem [shape: f32[32,1], index: 7, kind: input, shape index: {}]   ;;  %s11892_s8 = inlined_call_operand.vmem [shape: f32[32,32], index: 8, kind: input, shape index: {}]   ;;  %s11893_s9 = inlined_call_operand.vmem [shape: f32[32,1], index: 9, kind: input, shape index: {}]   ;;  %s11894_s10 = inlined_call_operand.vmem [shape: f32[1,32], index: 10, kind: input, shape index: {}]   ;;  %s11895_s11 = inlined_call_operand.<no memory space> [shape: f32[1,1], index: 11, kind: input, shape index: {}]   ;;  %s11896_s12 = inlined_call_operand.hbm [shape: f32[1,6000], index: 12, kind: output, shape index: {}]  }
   0x1   :  { %11946 = sst [smem:[#allocation52_spill]] %s11884_s0  ;;  %v17_v0 = vstv %s11895_s11 }
   0x2   :  { %18 = vst [vmem:[#allocation2] sm:$0x1] %v17_v0 }
   0x3   :  { %19 = vsyncpa [#allocation4], 0 }
   0x4   :  { %21 = vsyncpa [#allocation4 + $0x1], 0  ;;  %s9808_s23 = smov 0   ;;  %s9810_s24 = smov 0  }
   0x5   :  { %s9812_s25 = smov 0   ;;  %s9814_s26 = smov 0  }
   0x6 LB: > { %s9829_s11 = sadd.s32 4294967295, %s9732_s26   ;;  %s8779_s27 = sadd.s32 4294967294, %s9732_s26   ;;  %s9732_s26 = sphi %s9814_s26, %s12051_s26   ;;  %s9728_s25 = sphi %s9812_s25, %s12050_s25   ;;  %s9724_s24 = sphi %s9810_s24, %s12049_s24   ;;  %s9720_s23 = sphi %s9808_s23, %s12048_s23  }
   0x7   : > { %s9833_s28 = sadd.s32 1, %s9732_s26   ;;  %s291_s29 = sadd.s32 1, %s9728_s25 }
   0x8   : > { %s288_s30 = ssub.s32 %s9732_s26, %s9833_s28  ;;  %p301_p0 = scmp.ne.s32.totalorder %s9728_s25, %s9724_s24 }
   0x9   : > { %p289_p1 = scmp.eq.s32.totalorder %s288_s30, 0  ;;  %p302_p2 = scmp.eq.s32.totalorder %s9829_s11, 1 }
   0xa   : > { %p307_p3 = scmp.ne.s32.totalorder %s9724_s24, %s9720_s23  ;;  %p308_p4 = scmp.eq.s32.totalorder %s8779_s27, 1 }
   0xb   : > { %s9844_s13 = scalar_select %p289_p1, %s9728_s25, %s291_s29  }
   0xc   : > { %p9846_p5 = por %p302_p2, %p301_p0  ;;  %p9850_p6 = por %p308_p4, %p307_p3 }
   0xd   : > { %p8782_p7 = scmp.ge.s32.totalorder %s9732_s26, 1  ;;  %p376_p8 = scmp.lt.s32.totalorder %s9732_s26, 3 }
   0xf   : > { %p377_p9 = pnand %p8782_p7, %p376_p8 }
  0x11   : > { %380 = sbr.rel (%p377_p9) target bundleno = 5955 (0x1743), region = 68 }
  0x18   : > { %v9859_v1 = vld [vmem:[%s11886_s2 + $0x10] sm:$0xff]  ;;  %v9864_v2 = vld [vmem:[%s11886_s2] sm:$0xff]  ;;  %s9867_s20 = smul.u32 24, %s9829_s11  ;;  %v11899_v3 = vlaneseq  ;;  %v9734_v4 = vmov 0   ;;  %v9735_v5 = vmov 1983009808  }
  0x19   : > { %9663 = vset.pattern.permute.xlu1 %v9734_v4  ;;  %9662 = vset.pattern.permute.xlu0 %v9734_v4  ;;  %v473_v6 = vunpack.c.l.s4 %v9735_v5  ;;  %v9878_v8 = vld [vmem:[%s11886_s2 + $0x18] sm:$0xff]  ;;  %v9883_v9 = vld [vmem:[%s11886_s2 + $0x8] sm:$0xff]  ;;  %v11897_v10 = vmov 0.0   ;;  %v9901_v14 = vld [vmem:[%s11888_s4] sm:$0xff]  ;;  %s11949_s0 = sld [smem:[#allocation52_spill]]  ;;  %vm501_vm0 = vcmask 1041408  }
  0x1a   : > { %462 = vperm.xlu1 %9663, %v9859_v1   ;;  %452 = vperm.xlu0 %9662, %v9864_v2   ;;  %p427_p10 = scmp.lt.s32.totalorder %s9867_s20, 46  ;;  %v9873_v7 = vshrl.u32 %v11899_v3, 7  ;;  %v9896_v13 = vld [vmem:[%s11888_s4 + $0x8] sm:$0xff]  ;;  %v711_v19 = vld [vmem:[%s11888_s4 + $0x18] sm:$0x3f]  ;;  %v9924_v20 = vld [vmem:[%s11888_s4 + $0x10] sm:$0xff] }
  0x1b   : > { %574 = vmatprep.mubr.f32.mxu0 %v11897_v10  ;;  %663 = vmatprep.mubr.f32.mxu1 %v11897_v10  ;;  %v474_v11 = vunpack.c.0.s8 %v473_v6  ;;  %v442_v22 = vld [vmem:[%s11885_s1] sm:$0xff]  ;;  %vm488_vm1 = vcmask 15360   ;;  %v9946_v24 = vld [vmem:[%s11891_s7 + $0x8] sm:$0xff]  ;;  %v9967_v27 = vld [vmem:[%s11891_s7 + $0x18] sm:$0xff]  ;;  %vm732_vm2 = vcmask 261120   ;;  %vm1154_vm3 = vcmask 1045504  }
  0x1c   : > { %s428_s30 = scalar_select %p427_p10, %s9867_s20, 46  ;;  %v9951_v25 = vld [vmem:[%s11891_s7] sm:$0xff]  ;;  %v443_v26 = vld [vmem:[%s11885_s1 + $0x8] sm:$0xff]  ;;  %v9972_v28 = vld [vmem:[%s11891_s7 + $0x10] sm:$0xff]  ;;  %vm9737_vm4 = vmmov 1   ;;  %vm1141_vm6 = vcmask 244736  }
  0x1d   : > { %v9891_v12 = vsub.s32 %v474_v11, %v9873_v7  ;;  %v444_v29 = vld [vmem:[%s11885_s1 + $0x10] sm:$0xff]  ;;  %v9986_v30 = vld [vmem:[%s11893_s9 + $0x8] sm:$0xff]  ;;  %v9991_v31 = vld [vmem:[%s11893_s9] sm:$0xff]  ;;  %s8709_s27 = ssub.s32 (%p9846_p5), 47, %s9867_s20 }
  0x1e   : > { %467 = vperm.xlu1 %9663, %v9878_v8   ;;  %457 = vperm.xlu0 %9662, %v9883_v9   ;;  %s8783_s16 = sshll.u32 %s428_s30, 1  ;;  %v445_v32 = vld [vmem:[%s11885_s1 + $0x18] sm:$0xff]  ;;  %v10010_v34 = vld [vmem:[%s11893_s9 + $0x10] sm:$0xff]  ;;  %v3011_v40 = vld [vmem:[#allocation2] sm:$0x1]  ;;  %s419_s30 = sand.u32 1, %s9724_s24  }
  0x1f   : > { %s9906_s29 = scalar_lea.vmem %s11949_s0, %s8783_s16  ;;  %v10005_v33 = vld [vmem:[%s11893_s9 + $0x18] sm:$0xff]  ;;  %v1632_v41 = vld [vmem:[#allocation2] sm:$0x1]  ;;  %vm10200_vm5 = vmpackc.low %vm1154_vm3, %vm9737_vm4  ;;  %s10466_s17 = smul.u32 24, %s419_s30 }
  0x20   : > { %v441_v15 = vld [vmem:[%s9906_s29] sm:$0xff]  ;;  %v2093_v35 = vld [vmem:[%s11888_s4 + $0x18] sm:$0x3f]  ;;  %p8710_p11 = scmp.lt.s32.totalorder (%p9846_p5), %s8709_s27, 24 }
  0x21   : > { %v9910_v16 = vrot.slane %v441_v15, %v9891_v12  ;;  %v471_v17 = vcombine.high %v441_v15, %v441_v15  ;;  %v3468_v36 = vld [vmem:[%s11888_s4 + $0x18] sm:$0x3f]  ;;  %v5761_v42 = vld [vmem:[#allocation2] sm:$0x1]  ;;  %s10480_s16 = scalar_lea.vmem [#allocation3], %s10466_s17 }
  0x22   : > { %719 = vperm.xlu1 %9663, %v9896_v13   ;;  %714 = vperm.xlu0 %9662, %v9901_v14   ;;  %v4843_v37 = vld [vmem:[%s11888_s4 + $0x18] sm:$0x3f]  ;;  %v4386_v43 = vld [vmem:[#allocation2] sm:$0x1] }
  0x23   : > { %v9916_v18 = vcombine.high %v9910_v16, %v9910_v16  ;;  %v9927_v21 = vrot.slane %v471_v17, %v9891_v12  ;;  %v6218_v38 = vld [vmem:[%s11888_s4 + $0x18] sm:$0x3f]  ;;  %v8511_v46 = vld [vmem:[#allocation2] sm:$0x1] }
  0x24   : > { %v7593_v39 = vld [vmem:[%s11888_s4 + $0x18] sm:$0x3f]  ;;  %v7136_v47 = vld [vmem:[#allocation2] sm:$0x1] }
  0x25   : > { %8784 = vmatprep.subr.msk.mxu0 %vm501_vm0, %v9916_v18  ;;  %v9936_v23 = vcombine.high %v9927_v21, %v9927_v21 }
  0x26   : > { %729 = vperm.xlu1 %9663, %v711_v19   ;;  %724 = vperm.xlu0 %9662, %v9924_v20  }
  0x27   : > { %8785 = vmatpush1.msk.msra.mxu0 %vm501_vm0, %v9910_v16  ;;  %8790 = vmatprep.subr.msk.mxu1 %vm501_vm0, %v9936_v23 }
  0x28   : > { %8786 = vmatmul.mubr.msk.f32.vlgmr.msra.gmra.mrb[0].mxu0 %vm488_vm1, %v442_v22  ;;  %8791 = vmatpush1.msk.msra.mxu1 %vm501_vm0, %v9927_v21 }
  0x29   : > { %8792 = vmatmul.mubr.msk.f32.vlgmr.msra.gmra.mrb[0].mxu1 %vm488_vm1, %v442_v22  ;;  %580 = vmatprep.mubr.f32.mxu0 %v11897_v10 }
  0x2a   : > { %1352 = vperm.xlu1 %9663, %v9946_v24   ;;  %1347 = vperm.xlu0 %9662, %v9951_v25  }
  0x2b   : > { %669 = vmatprep.mubr.f32.mxu1 %v11897_v10 }
  0x2c   : > { %8787 = vmatmul.mubr.msk.f32.gmra.mrb[2].mxu0 %vm488_vm1, %v443_v26 }
  0x2d   : > { %8793 = vmatmul.mubr.msk.f32.gmra.mrb[2].mxu1 %vm488_vm1, %v443_v26  ;;  %586 = vmatprep.mubr.f32.mxu0 %v11897_v10 }
  0x2e   : > { %1362 = vperm.xlu1 %9663, %v9967_v27   ;;  %1357 = vperm.xlu0 %9662, %v9972_v28  }
  0x2f   : > { %675 = vmatprep.mubr.f32.mxu1 %v11897_v10 }
  0x30   : > { %8788 = vmatmul.mubr.msk.f32.gmra.mrb[4].mxu0 %vm488_vm1, %v444_v29 }
  0x31   : > { %8794 = vmatmul.mubr.msk.f32.gmra.mrb[4].mxu1 %vm488_vm1, %v444_v29  ;;  %592 = vmatprep.mubr.f32.mxu0 %v11897_v10 }
  0x32   : > { %1412 = vperm.xlu1 %9663, %v9986_v30   ;;  %1407 = vperm.xlu0 %9662, %v9991_v31  }
  0x33   : > { %681 = vmatprep.mubr.f32.mxu1 %v11897_v10 }
  0x34   : > { %8789 = vmatmul.mubr.msk.f32.gmra.mrb[6].mxu0 %vm488_vm1, %v445_v32 }
  0x35   : > { %8795 = vmatmul.mubr.msk.f32.gmra.mrb[6].mxu1 %vm488_vm1, %v445_v32  ;;  %809 = vmatprep.mubr.f32.mxu0 %v11897_v10 }
  0x36   : > { %1422 = vperm.xlu1 %9663, %v10005_v33   ;;  %1417 = vperm.xlu0 %9662, %v10010_v34  }
  0x37   : > { %898 = vmatprep.mubr.f32.mxu1 %v11897_v10 }
  0x3a   : > { %1841 = vperm.xlu1 %9663, %v9883_v9   ;;  %1836 = vperm.xlu0 %9662, %v9864_v2  }
  0x3e   : > { %1851 = vperm.xlu1 %9663, %v9878_v8   ;;  %1846 = vperm.xlu0 %9662, %v9859_v1  }
  0x42   : > { %2101 = vperm.xlu1 %9663, %v9896_v13   ;;  %2096 = vperm.xlu0 %9662, %v9901_v14  }
  0x46   : > { %2111 = vperm.xlu1 %9663, %v2093_v35   ;;  %2106 = vperm.xlu0 %9662, %v9924_v20  }
  0x4a   : > { %2731 = vperm.xlu1 %9663, %v9946_v24   ;;  %2726 = vperm.xlu0 %9662, %v9951_v25  }
  0x4e   : > { %2741 = vperm.xlu1 %9663, %v9967_v27   ;;  %2736 = vperm.xlu0 %9662, %v9972_v28  }
  0x52   : > { %2791 = vperm.xlu1 %9663, %v9986_v30   ;;  %2786 = vperm.xlu0 %9662, %v9991_v31  }
  0x56   : > { %2801 = vperm.xlu1 %9663, %v10005_v33   ;;  %2796 = vperm.xlu0 %9662, %v10010_v34  }
  0x5a   : > { %3216 = vperm.xlu1 %9663, %v9883_v9   ;;  %3211 = vperm.xlu0 %9662, %v9864_v2  }
  0x5e   : > { %3226 = vperm.xlu1 %9663, %v9878_v8   ;;  %3221 = vperm.xlu0 %9662, %v9859_v1  }
  0x62   : > { %3476 = vperm.xlu1 %9663, %v9896_v13   ;;  %3471 = vperm.xlu0 %9662, %v9901_v14  }
  0x66   : > { %3486 = vperm.xlu1 %9663, %v3468_v36   ;;  %3481 = vperm.xlu0 %9662, %v9924_v20  }
  0x6a   : > { %4106 = vperm.xlu1 %9663, %v9946_v24   ;;  %4101 = vperm.xlu0 %9662, %v9951_v25  }
  0x6e   : > { %4116 = vperm.xlu1 %9663, %v9967_v27   ;;  %4111 = vperm.xlu0 %9662, %v9972_v28  }
  0x72   : > { %4166 = vperm.xlu1 %9663, %v9986_v30   ;;  %4161 = vperm.xlu0 %9662, %v9991_v31  }
  0x76   : > { %4176 = vperm.xlu1 %9663, %v10005_v33   ;;  %4171 = vperm.xlu0 %9662, %v10010_v34  }
  0x7a   : > { %4591 = vperm.xlu1 %9663, %v9883_v9   ;;  %4586 = vperm.xlu0 %9662, %v9864_v2  }
  0x7e   : > { %4601 = vperm.xlu1 %9663, %v9878_v8   ;;  %4596 = vperm.xlu0 %9662, %v9859_v1  }
  0x82   : > { %4851 = vperm.xlu1 %9663, %v9896_v13   ;;  %4846 = vperm.xlu0 %9662, %v9901_v14  }
  0x86   : > { %4861 = vperm.xlu1 %9663, %v4843_v37   ;;  %4856 = vperm.xlu0 %9662, %v9924_v20  }
  0x8a   : > { %5481 = vperm.xlu1 %9663, %v9946_v24   ;;  %5476 = vperm.xlu0 %9662, %v9951_v25  }
  0x8e   : > { %5491 = vperm.xlu1 %9663, %v9967_v27   ;;  %5486 = vperm.xlu0 %9662, %v9972_v28  }
  0x92   : > { %5541 = vperm.xlu1 %9663, %v9986_v30   ;;  %5536 = vperm.xlu0 %9662, %v9991_v31  }
  0x96   : > { %5551 = vperm.xlu1 %9663, %v10005_v33   ;;  %5546 = vperm.xlu0 %9662, %v10010_v34  }
  0x99   : > { %v463_v44 = vpop.permute.xlu1 %462  ;;  %v453_v45 = vpop.permute.xlu0 %452 }
  0x9a   : > { %5966 = vperm.xlu1 %9663, %v9883_v9   ;;  %5961 = vperm.xlu0 %9662, %v9864_v2  }
  0x9d   : > { %v468_v48 = vpop.permute.xlu1 %467  ;;  %v458_v49 = vpop.permute.xlu0 %457 }
  0x9e   : > { %5976 = vperm.xlu1 %9663, %v9878_v8   ;;  %5971 = vperm.xlu0 %9662, %v9859_v1  }
  0xa2   : > { %6226 = vperm.xlu1 %9663, %v9896_v13   ;;  %6221 = vperm.xlu0 %9662, %v9901_v14  }
  0xa6   : > { %6236 = vperm.xlu1 %9663, %v6218_v38   ;;  %6231 = vperm.xlu0 %9662, %v9924_v20  }
  0xaa   : > { %6856 = vperm.xlu1 %9663, %v9946_v24   ;;  %6851 = vperm.xlu0 %9662, %v9951_v25  }
  0xae   : > { %6866 = vperm.xlu1 %9663, %v9967_v27   ;;  %6861 = vperm.xlu0 %9662, %v9972_v28  }
  0xb2   : > { %6916 = vperm.xlu1 %9663, %v9986_v30   ;;  %6911 = vperm.xlu0 %9662, %v9991_v31  }
  0xb6   : > { %6926 = vperm.xlu1 %9663, %v10005_v33   ;;  %6921 = vperm.xlu0 %9662, %v10010_v34  }
  0xba   : > { %7341 = vperm.xlu1 %9663, %v9883_v9   ;;  %7336 = vperm.xlu0 %9662, %v9864_v2  }
  0xbe   : > { %7351 = vperm.xlu1 %9663, %v9878_v8   ;;  %7346 = vperm.xlu0 %9662, %v9859_v1  }
  0xc2   : > { %7601 = vperm.xlu1 %9663, %v9896_v13   ;;  %7596 = vperm.xlu0 %9662, %v9901_v14  }
  0xc6   : > { %7611 = vperm.xlu1 %9663, %v7593_v39   ;;  %7606 = vperm.xlu0 %9662, %v9924_v20  }
  0xca   : > { %8231 = vperm.xlu1 %9663, %v9946_v24   ;;  %8226 = vperm.xlu0 %9662, %v9951_v25  }
  0xce   : > { %8241 = vperm.xlu1 %9663, %v9967_v27   ;;  %8236 = vperm.xlu0 %9662, %v9972_v28  }
  0xd2   : > { %8291 = vperm.xlu1 %9663, %v9986_v30   ;;  %8286 = vperm.xlu0 %9662, %v9991_v31  }
  0xd6   : > { %8301 = vperm.xlu1 %9663, %v10005_v33   ;;  %8296 = vperm.xlu0 %9662, %v10010_v34  }
  0xda   : > { %3014 = vperm.xlu1 %9663, %v3011_v40   ;;  %1635 = vperm.xlu0 %9662, %v1632_v41  }
  0xde   : > { %5764 = vperm.xlu1 %9663, %v5761_v42   ;;  %4389 = vperm.xlu0 %9662, %v4386_v43  }
  0xe2   : > { %8514 = vperm.xlu1 %9663, %v8511_v46   ;;  %7139 = vperm.xlu0 %9662, %v7136_v47  }
  0xfb   : > { %v576_v50 = vpop.f32.mrb[0].mxu0 }
  0xfc   : > { %v578_v51 = vpop.f32.mrb[1].mxu0  ;;  %v665_v52 = vpop.f32.mrb[0].mxu1  ;;  %v577_v53 = vadd.f32 %v576_v50, %v453_v45 }
  0xfd   : > { %v579_v54 = vadd.f32 %v578_v51, %v453_v45  ;;  %v667_v55 = vpop.f32.mrb[1].mxu1  ;;  %v666_v56 = vadd.f32 %v665_v52, %v453_v45  ;;  %v10181_v52 = vld [vmem:[%s11890_s6 + $0x10] sm:$0xff] }
  0xfe   : > { %v668_v61 = vadd.f32 %v667_v55, %v453_v45  ;;  %v688_v0 = vmax.f32 %v577_v53, 0.0  ;;  %v10192_v53 = vld [vmem:[%s11890_s6 + $0x18] sm:$0xff] }
  0xff   : > { %v582_v57 = vpop.f32.mrb[2].mxu0  ;;  %v689_v1 = vmax.f32 %v579_v54, 0.0  ;;  %v690_v5 = vmax.f32 %v666_v56, 0.0  ;;  %v715_v56 = vpop.permute.xlu0 %714 }
 0x100   : > { %v583_v58 = vadd.f32 %v582_v57, %v458_v49  ;;  %v584_v59 = vpop.f32.mrb[3].mxu0  ;;  %v671_v60 = vpop.f32.mrb[2].mxu1  ;;  %v691_v17 = vmax.f32 %v668_v61, 0.0 }
 0x101   : > { %v585_v62 = vadd.f32 %v584_v59, %v458_v49  ;;  %v672_v63 = vadd.f32 %v671_v60, %v458_v49  ;;  %v673_v4 = vpop.f32.mrb[3].mxu1  ;;  %v720_v60 = vpop.permute.xlu1 %719 }
 0x102   : > { %v692_v2 = vmax.f32 %v583_v58, 0.0  ;;  %v674_v9 = vadd.f32 %v673_v4, %v458_v49 }
 0x103   : > { %v693_v6 = vmax.f32 %v585_v62, 0.0  ;;  %v694_v8 = vmax.f32 %v672_v63, 0.0  ;;  %v588_v11 = vpop.f32.mrb[4].mxu0 }
 0x104   : > { %v9116_v13 = vpack.c.bf16 %v692_v2, %v688_v0  ;;  %v590_v14 = vpop.f32.mrb[5].mxu0  ;;  %v677_v15 = vpop.f32.mrb[4].mxu1  ;;  %v695_v22 = vmax.f32 %v674_v9, 0.0  ;;  %v589_v24 = vadd.f32 %v588_v11, %v463_v44 }
 0x105   : > { %v9114_v19 = vpack.c.bf16 %v693_v6, %v689_v1  ;;  %v9124_v20 = vpack.c.bf16 %v694_v8, %v690_v5  ;;  %v591_v25 = vadd.f32 %v590_v14, %v463_v44  ;;  %v679_v26 = vpop.f32.mrb[5].mxu1  ;;  %v678_v28 = vadd.f32 %v677_v15, %v463_v44 }
 0x106   : > { %v9122_v27 = vpack.c.bf16 %v695_v22, %v691_v17  ;;  %v680_v33 = vadd.f32 %v679_v26, %v463_v44  ;;  %v696_v36 = vmax.f32 %v589_v24, 0.0  ;;  %v10111_v44 = vld [vmem:[%s11887_s3] sm:$0xff] }
 0x107   : > { %v594_v29 = vpop.f32.mrb[6].mxu0  ;;  %9115 = vmatprep.subr.bf16.mxu0 %v9114_v19  ;;  %v697_v37 = vmax.f32 %v591_v25, 0.0  ;;  %v698_v40 = vmax.f32 %v678_v28, 0.0  ;;  %v725_v25 = vpop.permute.xlu0 %724 }
 0x108   : > { %v595_v30 = vadd.f32 %v594_v29, %v468_v48  ;;  %v596_v31 = vpop.f32.mrb[7].mxu0  ;;  %9117 = vmatpush1.bf16.msra.mxu0 %v9116_v13  ;;  %v683_v32 = vpop.f32.mrb[6].mxu1  ;;  %9123 = vmatprep.subr.bf16.mxu1 %v9122_v27  ;;  %v699_v46 = vmax.f32 %v680_v33, 0.0 }
 0x109   : > { %v597_v34 = vadd.f32 %v596_v31, %v468_v48  ;;  %v684_v35 = vadd.f32 %v683_v32, %v468_v48  ;;  %v685_v39 = vpop.f32.mrb[7].mxu1  ;;  %9125 = vmatpush1.bf16.msra.mxu1 %v9124_v20  ;;  %v730_v33 = vpop.permute.xlu1 %729 }
 0x10a   : > { %v700_v38 = vmax.f32 %v595_v30, 0.0  ;;  %v686_v43 = vadd.f32 %v685_v39, %v468_v48  ;;  %v10123_v48 = vld [vmem:[%s11887_s3 + $0x8] sm:$0xff] }
 0x10b   : > { %v701_v41 = vmax.f32 %v597_v34, 0.0  ;;  %v702_v42 = vmax.f32 %v684_v35, 0.0 }
 0x10c   : > { %v9120_v45 = vpack.c.bf16 %v700_v38, %v696_v36  ;;  %v703_v50 = vmax.f32 %v686_v43, 0.0 }
 0x10d   : > { %v9118_v47 = vpack.c.bf16 %v701_v41, %v697_v37  ;;  %v9128_v49 = vpack.c.bf16 %v702_v42, %v698_v40 }
 0x10e   : > { %v9126_v51 = vpack.c.bf16 %v703_v50, %v699_v46 }
 0x10f   : > { %9119 = vmatprep.subr.bf16.mxu0 %v9118_v47 }
 0x110   : > { %9121 = vmatpush1.bf16.msra.mxu0 %v9120_v45  ;;  %9127 = vmatprep.subr.bf16.mxu1 %v9126_v51 }
 0x111   : > { %8804 = vmatprep.subr.msk.mxu0 %vm501_vm0, %v9916_v18  ;;  %9129 = vmatpush1.bf16.msra.mxu1 %v9128_v49  ;;  %v10138_v18 = vld [vmem:[%s11887_s3 + $0x10] sm:$0xff] }
 0x112   : > { %8810 = vmatprep.subr.msk.mxu1 %vm501_vm0, %v9936_v23  ;;  %v10170_v23 = vld [vmem:[%s11890_s6 + $0x8] sm:$0xff] }
 0x113   : > { %8796 = vmatmul.mubr.msk.f32.vlgmr.msra.gmra.mrb[8].mxu0 %vm732_vm2, %v10111_v44 }
 0x114   : > { %815 = vmatprep.mubr.f32.mxu0 %v11897_v10  ;;  %8805 = vmatpush1.msk.msra.mxu0 %vm501_vm0, %v9910_v16  ;;  %v707_v16 = vld [vmem:[%s11887_s3 + $0x18] sm:$0x3f] }
 0x115   : > { %8800 = vmatmul.mubr.msk.f32.vlgmr.msra.gmra.mrb[8].mxu1 %vm732_vm2, %v10111_v44 }
 0x116   : > { %904 = vmatprep.mubr.f32.mxu1 %v11897_v10  ;;  %8811 = vmatpush1.msk.msra.mxu1 %vm501_vm0, %v9927_v21  ;;  %v10159_v21 = vld [vmem:[%s11890_s6] sm:$0xff] }
 0x117   : > { %8797 = vmatmul.mubr.msk.f32.gmra.mrb[10].mxu0 %vm732_vm2, %v10123_v48 }
 0x118   : > { %821 = vmatprep.mubr.f32.mxu0 %v11897_v10 }
 0x119   : > { %8801 = vmatmul.mubr.msk.f32.gmra.mrb[10].mxu1 %vm732_vm2, %v10123_v48 }
 0x11a   : > { %910 = vmatprep.mubr.f32.mxu1 %v11897_v10 }
 0x11b   : > { %8798 = vmatmul.mubr.msk.f32.gmra.mrb[12].mxu0 %vm732_vm2, %v10138_v18 }
 0x11c   : > { %827 = vmatprep.mubr.f32.mxu0 %v11897_v10 }
 0x11d   : > { %8802 = vmatmul.mubr.msk.f32.gmra.mrb[12].mxu1 %vm732_vm2, %v10138_v18 }
 0x11e   : > { %916 = vmatprep.mubr.f32.mxu1 %v11897_v10 }
 0x11f   : > { %8799 = vmatmul.mubr.msk.f32.gmra.mrb[14].mxu0 %vm732_vm2, %v707_v16 }
 0x120   : > { %1027 = vmatprep.mubr.f32.mxu0 %v11897_v10 }
 0x121   : > { %8803 = vmatmul.mubr.msk.f32.gmra.mrb[14].mxu1 %vm732_vm2, %v707_v16 }
 0x122   : > { %1116 = vmatprep.mubr.f32.mxu1 %v11897_v10 }
 0x123   : > { %8806 = vmatmul.mubr.msk.f32.vlgmr.msra.gmra.mrb[16].mxu0 %vm488_vm1, %v10159_v21 }
 0x124   : > { %1033 = vmatprep.mubr.f32.mxu0 %v11897_v10 }
 0x125   : > { %8812 = vmatmul.mubr.msk.f32.vlgmr.msra.gmra.mrb[16].mxu1 %vm488_vm1, %v10159_v21 }
 0x126   : > { %1122 = vmatprep.mubr.f32.mxu1 %v11897_v10 }
 0x127   : > { %8807 = vmatmul.mubr.msk.f32.gmra.mrb[18].mxu0 %vm488_vm1, %v10170_v23 }
 0x128   : > { %1039 = vmatprep.mubr.f32.mxu0 %v11897_v10 }
 0x129   : > { %8813 = vmatmul.mubr.msk.f32.gmra.mrb[18].mxu1 %vm488_vm1, %v10170_v23 }
 0x12a   : > { %1128 = vmatprep.mubr.f32.mxu1 %v11897_v10 }
 0x12b   : > { %8808 = vmatmul.mubr.msk.f32.gmra.mrb[20].mxu0 %vm488_vm1, %v10181_v52 }
 0x12c   : > { %1045 = vmatprep.mubr.f32.mxu0 %v11897_v10 }
 0x12d   : > { %8814 = vmatmul.mubr.msk.f32.gmra.mrb[20].mxu1 %vm488_vm1, %v10181_v52 }
 0x12e   : > { %1134 = vmatprep.mubr.f32.mxu1 %v11897_v10 }
 0x12f   : > { %8809 = vmatmul.mubr.msk.f32.gmra.mrb[22].mxu0 %vm488_vm1, %v10192_v53 }
 0x130   : > { %1231 = vmatprep.mubr.f32.mxu0 %v11897_v10 }
 0x131   : > { %8815 = vmatmul.mubr.msk.f32.gmra.mrb[22].mxu1 %vm488_vm1, %v10192_v53 }
 0x132   : > { %1320 = vmatprep.mubr.f32.mxu1 %v11897_v10 }
 0x1e6   : > { %v811_v54 = vpop.f32.mrb[8].mxu0 }
 0x1e7   : > { %v813_v55 = vpop.f32.mrb[9].mxu0  ;;  %v812_v58 = vadd.f32 %v811_v54, %v715_v56 }
 0x1e8   : > { %v900_v57 = vpop.f32.mrb[8].mxu1  ;;  %v814_v61 = vadd.f32 %v813_v55, %v715_v56 }
 0x1e9   : > { %v902_v59 = vpop.f32.mrb[9].mxu1  ;;  %v901_v63 = vadd.f32 %v900_v57, %v715_v56  ;;  %v923_v6 = vmax.f32 %v812_v58, 0.0 }
 0x1ea   : > { %v817_v62 = vpop.f32.mrb[10].mxu0  ;;  %v903_v2 = vadd.f32 %v902_v59, %v715_v56  ;;  %v924_v13 = vmax.f32 %v814_v61, 0.0 }
 0x1eb   : > { %v818_v0 = vadd.f32 %v817_v62, %v720_v60  ;;  %v819_v1 = vpop.f32.mrb[11].mxu0  ;;  %v925_v19 = vmax.f32 %v901_v63, 0.0  ;;  %v10211_v62 = vld [vmem:[%s11889_s5] sm:$0xff]  ;;  %v10223_v63 = vld [vmem:[%s11889_s5 + $0x8] sm:$0xff] }
 0x1ec   : > { %v820_v4 = vadd.f32 %v819_v1, %v720_v60  ;;  %v906_v5 = vpop.f32.mrb[10].mxu1  ;;  %v926_v26 = vmax.f32 %v903_v2, 0.0  ;;  %v10245_v1 = vld [vmem:[%s11889_s5 + $0x18] sm:$0xff] }
 0x1ed   : > { %v927_v8 = vmax.f32 %v818_v0, 0.0  ;;  %v907_v9 = vadd.f32 %v906_v5, %v720_v60  ;;  %v908_v11 = vpop.f32.mrb[11].mxu1  ;;  %v10234_v0 = vld [vmem:[%s11889_s5 + $0x10] sm:$0xff]  ;;  %v1348_v5 = vpop.permute.xlu0 %1347 }
 0x1ee   : > { %v928_v14 = vmax.f32 %v820_v4, 0.0  ;;  %v909_v15 = vadd.f32 %v908_v11, %v720_v60  ;;  %v823_v17 = vpop.f32.mrb[12].mxu0  ;;  %v1353_v11 = vpop.permute.xlu1 %1352 }
 0x1ef   : > { %v9132_v20 = vpack.c.bf16 %v927_v8, %v923_v6  ;;  %v929_v22 = vmax.f32 %v907_v9, 0.0  ;;  %v825_v24 = vpop.f32.mrb[13].mxu0  ;;  %v824_v31 = vadd.f32 %v823_v17, %v725_v25 }
 0x1f0   : > { %v9130_v27 = vpack.c.bf16 %v928_v14, %v924_v13  ;;  %v930_v28 = vmax.f32 %v909_v15, 0.0  ;;  %v912_v29 = vpop.f32.mrb[12].mxu1  ;;  %v826_v35 = vadd.f32 %v825_v24, %v725_v25 }
 0x1f1   : > { %v9142_v30 = vpack.c.bf16 %v929_v22, %v925_v19  ;;  %v914_v32 = vpop.f32.mrb[13].mxu1  ;;  %v913_v37 = vadd.f32 %v912_v29, %v725_v25  ;;  %v931_v43 = vmax.f32 %v824_v31, 0.0 }
 0x1f2   : > { %v9140_v34 = vpack.c.bf16 %v930_v28, %v926_v26  ;;  %v829_v36 = vpop.f32.mrb[14].mxu0  ;;  %9131 = vmatprep.subr.bf16.mxu0 %v9130_v27  ;;  %v915_v40 = vadd.f32 %v914_v32, %v725_v25  ;;  %v932_v49 = vmax.f32 %v826_v35, 0.0 }
 0x1f3   : > { %v830_v38 = vadd.f32 %v829_v36, %v730_v33  ;;  %v831_v39 = vpop.f32.mrb[15].mxu0  ;;  %9133 = vmatpush1.bf16.msra.mxu0 %v9132_v20  ;;  %v933_v16 = vmax.f32 %v913_v37, 0.0  ;;  %v1358_v37 = vpop.permute.xlu0 %1357 }
 0x1f4   : > { %v832_v41 = vadd.f32 %v831_v39, %v730_v33  ;;  %v918_v42 = vpop.f32.mrb[14].mxu1  ;;  %9141 = vmatprep.subr.bf16.mxu1 %v9140_v34  ;;  %v934_v57 = vmax.f32 %v915_v40, 0.0 }
 0x1f5   : > { %v935_v45 = vmax.f32 %v830_v38, 0.0  ;;  %v919_v46 = vadd.f32 %v918_v42, %v730_v33  ;;  %v920_v47 = vpop.f32.mrb[15].mxu1  ;;  %9143 = vmatpush1.bf16.msra.mxu1 %v9142_v30 }
 0x1f6   : > { %v936_v50 = vmax.f32 %v832_v41, 0.0  ;;  %v921_v51 = vadd.f32 %v920_v47, %v730_v33 }
 0x1f7   : > { %v9137_v54 = vpack.c.bf16 %v935_v45, %v931_v43  ;;  %v937_v55 = vmax.f32 %v919_v46, 0.0  ;;  %v1363_v46 = vpop.permute.xlu1 %1362 }
 0x1f8   : > { %v9134_v58 = vpack.c.bf16 %v936_v50, %v932_v49  ;;  %v938_v59 = vmax.f32 %v921_v51, 0.0 }
 0x1f9   : > { %v9147_v60 = vpack.c.bf16 %v937_v55, %v933_v16 }
 0x1fa   : > { %v9144_v61 = vpack.c.bf16 %v938_v59, %v934_v57  ;;  %9136 = vmatprep.subr.msk.bf16.mxu0 %vm10200_vm5, %v9134_v58 }
 0x1fb   : > { %9139 = vmatpush1.bf16.msk.msra.mxu0 %vm10200_vm5, %v9137_v54 }
 0x1fc   : > { %9146 = vmatprep.subr.msk.bf16.mxu1 %vm10200_vm5, %v9144_v61 }
 0x1fd   : > { %9149 = vmatpush1.bf16.msk.msra.mxu1 %vm10200_vm5, %v9147_v60 }
 0x1fe   : > { %8818 = vmatmul.mubr.msk.f32.vlgmr.msra.gmra.mrb[16].mxu0 %vm1141_vm6, %v10211_v62 }
 0x1ff   : > { %1237 = vmatprep.mubr.f32.mxu0 %v11897_v10 }
 0x200   : > { %8824 = vmatmul.mubr.msk.f32.vlgmr.msra.gmra.mrb[16].mxu1 %vm1141_vm6, %v10211_v62 }
 0x201   : > { %1326 = vmatprep.mubr.f32.mxu1 %v11897_v10 }
 0x202   : > { %8819 = vmatmul.mubr.msk.f32.gmra.mrb[18].mxu0 %vm1141_vm6, %v10223_v63 }
 0x203   : > { %1243 = vmatprep.mubr.f32.mxu0 %v11897_v10 }
 0x204   : > { %8825 = vmatmul.mubr.msk.f32.gmra.mrb[18].mxu1 %vm1141_vm6, %v10223_v63 }
 0x205   : > { %1332 = vmatprep.mubr.f32.mxu1 %v11897_v10 }
 0x206   : > { %8820 = vmatmul.mubr.msk.f32.gmra.mrb[20].mxu0 %vm1141_vm6, %v10234_v0 }
 0x207   : > { %1249 = vmatprep.mubr.f32.mxu0 %v11897_v10 }
 0x208   : > { %8826 = vmatmul.mubr.msk.f32.gmra.mrb[20].mxu1 %vm1141_vm6, %v10234_v0 }
 0x209   : > { %1338 = vmatprep.mubr.f32.mxu1 %v11897_v10 }
 0x20a   : > { %8821 = vmatmul.mubr.msk.f32.gmra.mrb[22].mxu0 %vm1141_vm6, %v10245_v1 }
 0x20b   : > { %1501 = vmatprep.mubr.f32.mxu0 %v11897_v10 }
 0x20c   : > { %8827 = vmatmul.mubr.msk.f32.gmra.mrb[22].mxu1 %vm1141_vm6, %v10245_v1 }
 0x20d   : > { %1590 = vmatprep.mubr.f32.mxu1 %v11897_v10 }
 0x2d1   : > { %v1233_v2 = vpop.f32.mrb[16].mxu0 }
 0x2d2   : > { %v1235_v4 = vpop.f32.mrb[17].mxu0  ;;  %v1365_v8 = vadd.f32 %v1348_v5, %v1233_v2 }
 0x2d3   : > { %v1322_v6 = vpop.f32.mrb[16].mxu1  ;;  %v1366_v13 = vadd.f32 %v1348_v5, %v1235_v4 }
 0x2d4   : > { %v1324_v9 = vpop.f32.mrb[17].mxu1  ;;  %v1367_v15 = vadd.f32 %v1348_v5, %v1322_v6  ;;  %v1381_v25 = vmax.f32 %v1365_v8, 0.0 }
 0x2d5   : > { %v1239_v14 = vpop.f32.mrb[18].mxu0  ;;  %v1368_v20 = vadd.f32 %v1348_v5, %v1324_v9  ;;  %v1382_v29 = vmax.f32 %v1366_v13, 0.0 }
 0x2d6   : > { %v1369_v17 = vadd.f32 %v1353_v11, %v1239_v14  ;;  %v1241_v19 = vpop.f32.mrb[19].mxu0  ;;  %v1383_v33 = vmax.f32 %v1367_v15, 0.0 }
 0x2d7   : > { %v1370_v22 = vadd.f32 %v1353_v11, %v1241_v19  ;;  %v1328_v24 = vpop.f32.mrb[18].mxu1  ;;  %v1384_v38 = vmax.f32 %v1368_v20, 0.0  ;;  %v10259_v20 = vld [vmem:[%s11892_s8] sm:$0xff] }
 0x2d8   : > { %v1385_v26 = vmax.f32 %v1369_v17, 0.0  ;;  %v1371_v27 = vadd.f32 %v1353_v11, %v1328_v24  ;;  %v1330_v28 = vpop.f32.mrb[19].mxu1  ;;  %v10278_v24 = vld [vmem:[%s11892_s8 + $0x10] sm:$0xff] }
 0x2d9   : > { %v1386_v30 = vmax.f32 %v1370_v22, 0.0  ;;  %v1372_v31 = vadd.f32 %v1353_v11, %v1330_v28  ;;  %v1245_v32 = vpop.f32.mrb[20].mxu0  ;;  %v10267_v22 = vld [vmem:[%s11892_s8 + $0x8] sm:$0xff] }
 0x2da   : > { %v9152_v34 = vpack.c.bf16 %v1385_v26, %v1381_v25  ;;  %v1387_v35 = vmax.f32 %v1371_v27, 0.0  ;;  %v1247_v36 = vpop.f32.mrb[21].mxu0  ;;  %v1373_v43 = vadd.f32 %v1358_v37, %v1245_v32  ;;  %v10289_v25 = vld [vmem:[%s11892_s8 + $0x18] sm:$0xff]  ;;  %v1408_v26 = vpop.permute.xlu0 %1407 }
 0x2db   : > { %v9150_v39 = vpack.c.bf16 %v1386_v30, %v1382_v29  ;;  %v1388_v40 = vmax.f32 %v1372_v31, 0.0  ;;  %v1334_v41 = vpop.f32.mrb[20].mxu1  ;;  %v1374_v49 = vadd.f32 %v1358_v37, %v1247_v36  ;;  %v1413_v36 = vpop.permute.xlu1 %1412 }
 0x2dc   : > { %v9160_v42 = vpack.c.bf16 %v1387_v35, %v1383_v33  ;;  %v1336_v45 = vpop.f32.mrb[21].mxu1  ;;  %v1375_v51 = vadd.f32 %v1358_v37, %v1334_v41  ;;  %v1389_v59 = vmax.f32 %v1373_v43, 0.0 }
 0x2dd   : > { %v9158_v47 = vpack.c.bf16 %v1388_v40, %v1384_v38  ;;  %v1251_v50 = vpop.f32.mrb[22].mxu0  ;;  %9151 = vmatprep.subr.bf16.mxu0 %v9150_v39  ;;  %v1376_v55 = vadd.f32 %v1358_v37, %v1336_v45  ;;  %v1390_v4 = vmax.f32 %v1374_v49, 0.0 }
 0x2de   : > { %v1377_v16 = vadd.f32 %v1363_v46, %v1251_v50  ;;  %v1253_v54 = vpop.f32.mrb[23].mxu0  ;;  %9153 = vmatpush1.bf16.msra.mxu0 %v9152_v34  ;;  %v1391_v8 = vmax.f32 %v1375_v51, 0.0  ;;  %v1418_v27 = vpop.permute.xlu0 %1417 }
 0x2df   : > { %v1378_v57 = vadd.f32 %v1363_v46, %v1253_v54  ;;  %v1340_v58 = vpop.f32.mrb[22].mxu1  ;;  %9159 = vmatprep.subr.bf16.mxu1 %v9158_v47  ;;  %v1392_v13 = vmax.f32 %v1376_v55, 0.0 }
 0x2e0   : > { %v1393_v60 = vmax.f32 %v1377_v16, 0.0  ;;  %v1379_v61 = vadd.f32 %v1363_v46, %v1340_v58  ;;  %v1342_v2 = vpop.f32.mrb[23].mxu1  ;;  %9161 = vmatpush1.bf16.msra.mxu1 %v9160_v42 }
 0x2e1   : > { %v1394_v5 = vmax.f32 %v1378_v57, 0.0  ;;  %v1380_v6 = vadd.f32 %v1363_v46, %v1342_v2  ;;  %v1825_v2 = vld [vmem:[%s9906_s29 + $0x8] sm:$0xff] }
 0x2e2   : > { %v9156_v9 = vpack.c.bf16 %v1393_v60, %v1389_v59  ;;  %v1395_v11 = vmax.f32 %v1379_v61, 0.0  ;;  %v10300_v28 = vpop.permute.xlu0 %1836 }
 0x2e3   : > { %v9154_v14 = vpack.c.bf16 %v1394_v5, %v1390_v4  ;;  %v1396_v15 = vmax.f32 %v1380_v6, 0.0 }
 0x2e4   : > { %v9164_v17 = vpack.c.bf16 %v1395_v11, %v1391_v8 }
 0x2e5   : > { %v9162_v19 = vpack.c.bf16 %v1396_v15, %v1392_v13  ;;  %9155 = vmatprep.subr.bf16.mxu0 %v9154_v14  ;;  %v1423_v14 = vpop.permute.xlu1 %1422 }
 0x2e6   : > { %9157 = vmatpush1.bf16.msra.mxu0 %v9156_v9  ;;  %v10302_v29 = vpop.permute.xlu0 %1846 }
 0x2e7   : > { %9163 = vmatprep.subr.bf16.mxu1 %v9162_v19 }
 0x2e8   : > { %9165 = vmatpush1.bf16.msra.mxu1 %v9164_v17 }
 0x2e9   : > { %8828 = vmatmul.mubr.msk.f32.vlgmr.msra.gmra.mrb[24].mxu0 %vm732_vm2, %v10259_v20 }
 0x2ea   : > { %1507 = vmatprep.mubr.f32.mxu0 %v11897_v10  ;;  %v10304_v33 = vpop.permute.xlu0 %2096 }
 0x2eb   : > { %8832 = vmatmul.mubr.msk.f32.vlgmr.msra.gmra.mrb[24].mxu1 %vm732_vm2, %v10259_v20 }
 0x2ec   : > { %1596 = vmatprep.mubr.f32.mxu1 %v11897_v10 }
 0x2ed   : > { %8829 = vmatmul.mubr.msk.f32.gmra.mrb[26].mxu0 %vm732_vm2, %v10267_v22 }
 0x2ee   : > { %1513 = vmatprep.mubr.f32.mxu0 %v11897_v10  ;;  %v10306_v57 = vpop.permute.xlu0 %2106 }
 0x2ef   : > { %8833 = vmatmul.mubr.msk.f32.gmra.mrb[26].mxu1 %vm732_vm2, %v10267_v22 }
 0x2f0   : > { %1602 = vmatprep.mubr.f32.mxu1 %v11897_v10 }
 0x2f1   : > { %8830 = vmatmul.mubr.msk.f32.gmra.mrb[28].mxu0 %vm732_vm2, %v10278_v24 }
 0x2f2   : > { %1519 = vmatprep.mubr.f32.mxu0 %v11897_v10 }
 0x2f3   : > { %8834 = vmatmul.mubr.msk.f32.gmra.mrb[28].mxu1 %vm732_vm2, %v10278_v24 }
 0x2f4   : > { %1608 = vmatprep.mubr.f32.mxu1 %v11897_v10 }
 0x2f5   : > { %8831 = vmatmul.mubr.msk.f32.gmra.mrb[30].mxu0 %vm732_vm2, %v10289_v25 }
 0x2f6   : > { %1709 = vmatprep.mubr.f32.mxu0 %v11897_v10 }
 0x2f7   : > { %8835 = vmatmul.mubr.msk.f32.gmra.mrb[30].mxu1 %vm732_vm2, %v10289_v25 }
 0x2f8   : > { %1780 = vmatprep.mubr.f32.mxu1 %v11897_v10 }
 0x3bc   : > { %v1503_v30 = vpop.f32.mrb[24].mxu0 }
 0x3bd   : > { %v1505_v31 = vpop.f32.mrb[25].mxu0  ;;  %v1504_v34 = vadd.f32 %v1503_v30, %v1408_v26 }
 0x3be   : > { %v1592_v32 = vpop.f32.mrb[24].mxu1  ;;  %v1506_v37 = vadd.f32 %v1505_v31, %v1408_v26 }
 0x3bf   : > { %v1594_v35 = vpop.f32.mrb[25].mxu1  ;;  %v1593_v39 = vadd.f32 %v1592_v32, %v1408_v26  ;;  %v1615_v46 = vmax.f32 %v1504_v34, 0.0 }
 0x3c0   : > { %v1509_v38 = vpop.f32.mrb[26].mxu0  ;;  %v1595_v42 = vadd.f32 %v1594_v35, %v1408_v26  ;;  %v1616_v51 = vmax.f32 %v1506_v37, 0.0  ;;  %v1855_v26 = vcombine.high %v1825_v2, %v1825_v2  ;;  %v10310_v37 = vrot.slane %v1825_v2, %v9891_v12  ;;  %v1631_v2 = vld [vmem:[%s11894_s10] sm:$0x1] }
 0x3c1   : > { %v1510_v40 = vadd.f32 %v1509_v38, %v1413_v36  ;;  %v1511_v41 = vpop.f32.mrb[27].mxu0  ;;  %v1617_v58 = vmax.f32 %v1593_v39, 0.0  ;;  %v10312_v38 = vpop.permute.xlu0 %2726 }
 0x3c2   : > { %v1512_v43 = vadd.f32 %v1511_v41, %v1413_v36  ;;  %v1598_v45 = vpop.f32.mrb[26].mxu1  ;;  %v1618_v4 = vmax.f32 %v1595_v42, 0.0 }
 0x3c3   : > { %v1619_v47 = vmax.f32 %v1510_v40, 0.0  ;;  %v1599_v49 = vadd.f32 %v1598_v45, %v1413_v36  ;;  %v1600_v50 = vpop.f32.mrb[27].mxu1 }
 0x3c4   : > { %v1620_v16 = vmax.f32 %v1512_v43, 0.0  ;;  %v1601_v54 = vadd.f32 %v1600_v50, %v1413_v36  ;;  %v1515_v55 = vpop.f32.mrb[28].mxu0 }
 0x3c5   : > { %v9168_v59 = vpack.c.bf16 %v1619_v47, %v1615_v46  ;;  %v1621_v60 = vmax.f32 %v1599_v49, 0.0  ;;  %v1517_v61 = vpop.f32.mrb[29].mxu0  ;;  %v1516_v11 = vadd.f32 %v1515_v55, %v1418_v27  ;;  %v10315_v47 = vrot.slane %v1855_v26, %v9891_v12 }
 0x3c6   : > { %v9166_v5 = vpack.c.bf16 %v1620_v16, %v1616_v51  ;;  %v1622_v6 = vmax.f32 %v1601_v54, 0.0  ;;  %v1604_v8 = vpop.f32.mrb[28].mxu1  ;;  %v1518_v17 = vadd.f32 %v1517_v61, %v1418_v27  ;;  %v10319_v55 = vcombine.high %v10310_v37, %v10310_v37  ;;  %v10325_v61 = vpop.permute.xlu0 %2736 }
 0x3c7   : > { %v9176_v9 = vpack.c.bf16 %v1621_v60, %v1617_v58  ;;  %v1606_v13 = vpop.f32.mrb[29].mxu1  ;;  %v1605_v30 = vadd.f32 %v1604_v8, %v1418_v27  ;;  %v1623_v39 = vmax.f32 %v1516_v11, 0.0  ;;  %v10323_v60 = vcombine.high %v10315_v47, %v10315_v47  ;;  %v10379_v11 = vld [vmem:[%s11885_s1 + $0x18] sm:$0xff] }
 0x3c8   : > { %v9174_v15 = vpack.c.bf16 %v1622_v6, %v1618_v4  ;;  %v1521_v19 = vpop.f32.mrb[30].mxu0  ;;  %9167 = vmatprep.subr.bf16.mxu0 %v9166_v5  ;;  %v1607_v34 = vadd.f32 %v1606_v13, %v1418_v27  ;;  %v1624_v43 = vmax.f32 %v1518_v17, 0.0  ;;  %v10341_v4 = vld [vmem:[%s11885_s1] sm:$0xff]  ;;  %v10355_v6 = vld [vmem:[%s11885_s1 + $0x8] sm:$0xff] }
 0x3c9   : > { %v1522_v31 = vadd.f32 %v1521_v19, %v1423_v14  ;;  %v1523_v32 = vpop.f32.mrb[31].mxu0  ;;  %9169 = vmatpush1.bf16.msra.mxu0 %v9168_v59  ;;  %v1625_v27 = vmax.f32 %v1605_v30, 0.0 }
 0x3ca   : > { %v1524_v35 = vadd.f32 %v1523_v32, %v1423_v14  ;;  %v1610_v36 = vpop.f32.mrb[30].mxu1  ;;  %9175 = vmatprep.subr.bf16.mxu1 %v9174_v15  ;;  %v1626_v51 = vmax.f32 %v1607_v34, 0.0  ;;  %v10344_v5 = vpop.permute.xlu0 %2786 }
 0x3cb   : > { %v1627_v40 = vmax.f32 %v1522_v31, 0.0  ;;  %v1611_v41 = vadd.f32 %v1610_v36, %v1423_v14  ;;  %v1612_v42 = vpop.f32.mrb[31].mxu1  ;;  %9177 = vmatpush1.bf16.msra.mxu1 %v9176_v9  ;;  %v10368_v9 = vld [vmem:[%s11885_s1 + $0x10] sm:$0xff] }
 0x3cc   : > { %v1628_v45 = vmax.f32 %v1524_v35, 0.0  ;;  %v1613_v46 = vadd.f32 %v1612_v42, %v1423_v14 }
 0x3cd   : > { %v9172_v49 = vpack.c.bf16 %v1627_v40, %v1623_v39  ;;  %v1629_v50 = vmax.f32 %v1611_v41, 0.0 }
 0x3ce   : > { %v9170_v16 = vpack.c.bf16 %v1628_v45, %v1624_v43  ;;  %v1630_v54 = vmax.f32 %v1613_v46, 0.0  ;;  %v10362_v8 = vpop.permute.xlu0 %2796 }
 0x3cf   : > { %v9180_v58 = vpack.c.bf16 %v1629_v50, %v1625_v27 }
 0x3d0   : > { %v9178_v59 = vpack.c.bf16 %v1630_v54, %v1626_v51  ;;  %9171 = vmatprep.subr.bf16.mxu0 %v9170_v16 }
 0x3d1   : > { %9173 = vmatpush1.bf16.msra.mxu0 %v9172_v49 }
 0x3d2   : > { %9179 = vmatprep.subr.bf16.mxu1 %v9178_v59  ;;  %8838 = vmatprep.subr.msk.mxu0 %vm501_vm0, %v10319_v55  ;;  %v10383_v13 = vpop.permute.xlu0 %3211 }
 0x3d3   : > { %9181 = vmatpush1.bf16.msra.mxu1 %v9180_v58 }
 0x3d4   : > { %8836 = vmatmul.mubr.msk.f32.vlgmr.msra.gmra.mrb[32].mxu0 %vm732_vm2, %v1631_v2  ;;  %8844 = vmatprep.subr.msk.mxu1 %vm501_vm0, %v10323_v60 }
 0x3d5   : > { %8839 = vmatpush1.msk.msra.mxu0 %vm501_vm0, %v10310_v37  ;;  %1956 = vmatprep.mubr.f32.mxu0 %v11897_v10 }
 0x3d6   : > { %8837 = vmatmul.mubr.msk.f32.vlgmr.msra.gmra.mrb[32].mxu1 %vm732_vm2, %v1631_v2  ;;  %v10392_v14 = vpop.permute.xlu0 %3221 }
 0x3d7   : > { %8845 = vmatpush1.msk.msra.mxu1 %vm501_vm0, %v10315_v47  ;;  %2045 = vmatprep.mubr.f32.mxu1 %v11897_v10 }
 0x3d8   : > { %8840 = vmatmul.mubr.msk.f32.vlgmr.msra.gmra.mrb[34].mxu0 %vm488_vm1, %v10341_v4 }
 0x3d9   : > { %1962 = vmatprep.mubr.f32.mxu0 %v11897_v10 }
 0x3da   : > { %8846 = vmatmul.mubr.msk.f32.vlgmr.msra.gmra.mrb[34].mxu1 %vm488_vm1, %v10341_v4  ;;  %v10394_v15 = vpop.permute.xlu0 %3471 }
 0x3db   : > { %2051 = vmatprep.mubr.f32.mxu1 %v11897_v10  ;;  %11952 = vst [vmem:[#allocation6_spill] sm:$0xff] %v10394_v15 }
 0x3dc   : > { %8841 = vmatmul.mubr.msk.f32.gmra.mrb[36].mxu0 %vm488_vm1, %v10355_v6 }
 0x3dd   : > { %1968 = vmatprep.mubr.f32.mxu0 %v11897_v10 }
 0x3de   : > { %8847 = vmatmul.mubr.msk.f32.gmra.mrb[36].mxu1 %vm488_vm1, %v10355_v6  ;;  %v10396_v17 = vpop.permute.xlu0 %3481 }
 0x3df   : > { %2057 = vmatprep.mubr.f32.mxu1 %v11897_v10  ;;  %11953 = vst [vmem:[#allocation7_spill] sm:$0xff] %v10396_v17 }
 0x3e0   : > { %8842 = vmatmul.mubr.msk.f32.gmra.mrb[38].mxu0 %vm488_vm1, %v10368_v9 }
 0x3e1   : > { %1974 = vmatprep.mubr.f32.mxu0 %v11897_v10 }
 0x3e2   : > { %8848 = vmatmul.mubr.msk.f32.gmra.mrb[38].mxu1 %vm488_vm1, %v10368_v9  ;;  %v10398_v19 = vpop.permute.xlu0 %4101 }
 0x3e3   : > { %2063 = vmatprep.mubr.f32.mxu1 %v11897_v10  ;;  %11954 = vst [vmem:[#allocation8_spill] sm:$0xff] %v10398_v19 }
 0x3e4   : > { %8843 = vmatmul.mubr.msk.f32.gmra.mrb[40].mxu0 %vm488_vm1, %v10379_v11 }
 0x3e5   : > { %2190 = vmatprep.mubr.f32.mxu0 %v11897_v10 }
 0x3e6   : > { %8849 = vmatmul.mubr.msk.f32.gmra.mrb[40].mxu1 %vm488_vm1, %v10379_v11  ;;  %v10400_v26 = vpop.permute.xlu0 %4111 }
 0x3e7   : > { %2279 = vmatprep.mubr.f32.mxu1 %v11897_v10  ;;  %11955 = vst [vmem:[#allocation9_spill] sm:$0xff] %v10400_v26 }
 0x3ea   : > { %v10402_v30 = vpop.permute.xlu0 %4161 }
 0x3eb   : > { %11956 = vst [vmem:[#allocation10_spill] sm:$0xff] %v10402_v30 }
 0x3ee   : > { %v10404_v31 = vpop.permute.xlu0 %4171 }
 0x3ef   : > { %11957 = vst [vmem:[#allocation11_spill] sm:$0xff] %v10404_v31 }
 0x3f2   : > { %v10406_v32 = vpop.permute.xlu0 %4586 }
 0x3f3   : > { %11958 = vst [vmem:[#allocation12_spill] sm:$0xff] %v10406_v32 }
 0x3f6   : > { %v10408_v34 = vpop.permute.xlu0 %4596 }
 0x3f7   : > { %11959 = vst [vmem:[#allocation13_spill] sm:$0xff] %v10408_v34 }
 0x3fa   : > { %v10410_v35 = vpop.permute.xlu0 %4846 }
 0x3fb   : > { %11960 = vst [vmem:[#allocation14_spill] sm:$0xff] %v10410_v35 }
 0x3fe   : > { %v10412_v36 = vpop.permute.xlu0 %4856 }
 0x3ff   : > { %11961 = vst [vmem:[#allocation15_spill] sm:$0xff] %v10412_v36 }
 0x402   : > { %v10414_v39 = vpop.permute.xlu0 %5476 }
 0x403   : > { %11962 = vst [vmem:[#allocation16_spill] sm:$0xff] %v10414_v39 }
 0x406   : > { %v10416_v40 = vpop.permute.xlu0 %5486 }
 0x407   : > { %11963 = vst [vmem:[#allocation17_spill] sm:$0xff] %v10416_v40 }
 0x40a   : > { %v10419_v41 = vpop.permute.xlu0 %5536 }
 0x40b   : > { %11964 = vst [vmem:[#allocation18_spill] sm:$0xff] %v10419_v41 }
 0x40e   : > { %v10421_v42 = vpop.permute.xlu0 %5546 }
 0x40f   : > { %11965 = vst [vmem:[#allocation19_spill] sm:$0xff] %v10421_v42 }
 0x412   : > { %v10423_v43 = vpop.permute.xlu0 %5961 }
 0x413   : > { %11966 = vst [vmem:[#allocation20_spill] sm:$0xff] %v10423_v43 }
 0x416   : > { %v10425_v45 = vpop.permute.xlu0 %5971 }
 0x417   : > { %11967 = vst [vmem:[#allocation21_spill] sm:$0xff] %v10425_v45 }
 0x41a   : > { %v10427_v46 = vpop.permute.xlu0 %6221 }
 0x41b   : > { %11968 = vst [vmem:[#allocation22_spill] sm:$0xff] %v10427_v46 }
 0x41e   : > { %v10429_v27 = vpop.permute.xlu0 %6231 }
 0x41f   : > { %11969 = vst [vmem:[#allocation23_spill] sm:$0xff] %v10429_v27 }
 0x422   : > { %v10431_v49 = vpop.permute.xlu0 %6851 }
 0x423   : > { %11970 = vst [vmem:[#allocation24_spill] sm:$0xff] %v10431_v49 }
 0x426   : > { %v10433_v50 = vpop.permute.xlu0 %6861 }
 0x427   : > { %11971 = vst [vmem:[#allocation25_spill] sm:$0xff] %v10433_v50  ;;  %v9738_v50 = vmov 1966171168  }
 0x42a   : > { %v10435_v51 = vpop.permute.xlu0 %6911 }
 0x42b   : > { %11972 = vst [vmem:[#allocation26_spill] sm:$0xff] %v10435_v51  ;;  %v10456_v51 = vsub.s32 0, %v9873_v7 }
 0x42e   : > { %v10437_v16 = vpop.permute.xlu0 %6921 }
 0x42f   : > { %11973 = vst [vmem:[#allocation27_spill] sm:$0xff] %v10437_v16 }
 0x432   : > { %v10439_v54 = vpop.permute.xlu0 %7336 }
 0x433   : > { %11974 = vst [vmem:[#allocation28_spill] sm:$0xff] %v10439_v54  ;;  %v1798_v54 = vunpack.c.l.s4 %v9738_v50 }
 0x436   : > { %v10441_v58 = vpop.permute.xlu0 %7346 }
 0x437   : > { %11975 = vst [vmem:[#allocation29_spill] sm:$0xff] %v10441_v58 }
 0x43a   : > { %v10443_v59 = vpop.permute.xlu0 %7596 }
 0x43b   : > { %11976 = vst [vmem:[#allocation30_spill] sm:$0xff] %v10443_v59 }
 0x43e   : > { %v10445_v2 = vpop.permute.xlu0 %7606 }
 0x43f   : > { %11977 = vst [vmem:[#allocation31_spill] sm:$0xff] %v10445_v2  ;;  %v1799_v2 = vunpack.c.0.s8 %v1798_v54 }
 0x441   : > { %v10460_v35 = vsub.s32 %v1799_v2, %v9873_v7 }
 0x442   : > { %v10447_v10 = vpop.permute.xlu0 %8226 }
 0x443   : > { %11978 = vst [vmem:[#allocation32_spill] sm:$0xff] %v10447_v10 }
 0x446   : > { %v10449_v3 = vpop.permute.xlu0 %8236 }
 0x447   : > { %11979 = vst [vmem:[#allocation33_spill] sm:$0xff] %v10449_v3 }
 0x44a   : > { %v10451_v27 = vpop.permute.xlu0 %8286 }
 0x44b   : > { %11980 = vst [vmem:[#allocation34_spill] sm:$0xff] %v10451_v27 }
 0x44e   : > { %v10453_v49 = vpop.permute.xlu0 %8296 }
 0x44f   : > { %11981 = vst [vmem:[#allocation35_spill] sm:$0xff] %v10453_v49 }
 0x452   : > { %v1636_v16 = vpop.permute.xlu0 %1635 }
 0x453   : > { %v1641_v58 = vrot.slane %v1636_v16, %v10456_v51 }
 0x4a7   : > { %v1711_v46 = vpop.f32.mrb[32].mxu0 }
 0x4a8   : > { %v1712_v59 = vadd.f32 %v1711_v46, %v1641_v58  ;;  %v1713_v45 = vpop.f32.mrb[33].mxu0 }
 0x4a9   : > { %v1714_v43 = vadd.f32 %v1713_v45, %v1641_v58  ;;  %v1782_v10 = vpop.f32.mrb[32].mxu1  ;;  %v1842_v45 = vpop.permute.xlu1 %1841 }
 0x4aa   : > { %v1787_v42 = vmax.f32 %v1712_v59, 0.0  ;;  %v1783_v3 = vadd.f32 %v1782_v10, %v1641_v58  ;;  %v1784_v41 = vpop.f32.mrb[33].mxu1 }
 0x4ab   : > { %v1788_v27 = vmax.f32 %v1714_v43, 0.0  ;;  %v1785_v49 = vadd.f32 %v1784_v41, %v1641_v58  ;;  %v1958_v40 = vpop.f32.mrb[34].mxu0 }
 0x4ac   : > { %v1789_v39 = vmax.f32 %v1783_v3, 0.0  ;;  %v1960_v36 = vpop.f32.mrb[35].mxu0  ;;  %v1959_v46 = vadd.f32 %v1958_v40, %v10300_v28 }
 0x4ad   : > { %v1795_v50 = vcombine.low %v1787_v42, %v1788_v27  ;;  %v1790_v16 = vmax.f32 %v1785_v49, 0.0  ;;  %v2047_v34 = vpop.f32.mrb[34].mxu1  ;;  %v1961_v10 = vadd.f32 %v1960_v36, %v10300_v28 }
 0x4ae   : > { %v2049_v54 = vpop.f32.mrb[35].mxu1  ;;  %v2048_v3 = vadd.f32 %v2047_v34, %v10300_v28  ;;  %v2070_v58 = vmax.f32 %v1959_v46, 0.0 }
 0x4af   : > { %v1796_v32 = vcombine.low %v1789_v39, %v1790_v16  ;;  %v1964_v59 = vpop.f32.mrb[36].mxu0  ;;  %v1803_v7 = vrot.slane %v1795_v50, %v10460_v35  ;;  %v2050_v27 = vadd.f32 %v2049_v54, %v10300_v28  ;;  %v2071_v31 = vmax.f32 %v1961_v10, 0.0 }
 0x4b0   : > { %v1965_v41 = vadd.f32 %v1964_v59, %v1842_v45  ;;  %v1966_v43 = vpop.f32.mrb[37].mxu0  ;;  %v11982_v59 = vlaneseq }
 0x4b1   : > { %v1810_v42 = vrot.slane %v1796_v32, %v10460_v35  ;;  %v1967_v40 = vadd.f32 %v1966_v43, %v1842_v45  ;;  %v2053_v49 = vpop.f32.mrb[36].mxu1  ;;  %v2072_v32 = vmax.f32 %v2048_v3, 0.0 }
 0x4b2   : > { %v2074_v39 = vmax.f32 %v1965_v41, 0.0  ;;  %v2054_v2 = vadd.f32 %v2053_v49, %v1842_v45  ;;  %v2055_v36 = vpop.f32.mrb[37].mxu1  ;;  %vm10473_vm7 = vcmp.lt.s32.totalorder %v11982_v59, 512  ;;  %v2073_v41 = vmax.f32 %v2050_v27, 0.0 }
 0x4b3   : > { %v1811_v16 = vcombine.low %v1803_v7, %v1810_v42  ;;  %v2075_v30 = vmax.f32 %v1967_v40, 0.0  ;;  %v2056_v26 = vadd.f32 %v2055_v36, %v1842_v45  ;;  %v1970_v34 = vpop.f32.mrb[38].mxu0  ;;  %v1852_v40 = vpop.permute.xlu1 %1851 }
 0x4b4   : > { %v9184_v50 = vpack.c.bf16 %v2074_v39, %v2070_v58  ;;  %v2076_v28 = vmax.f32 %v2054_v2, 0.0  ;;  %v1972_v54 = vpop.f32.mrb[39].mxu0  ;;  %v1971_v45 = vadd.f32 %v1970_v34, %v10302_v29 }
 0x4b5   : > { %v1818_v46 = vrot.slane %v1811_v16, %v10460_v35  ;;  %v9182_v43 = vpack.c.bf16 %v2075_v30, %v2071_v31  ;;  %v2077_v49 = vmax.f32 %v2056_v26, 0.0  ;;  %v2059_v7 = vpop.f32.mrb[38].mxu1  ;;  %v1973_v58 = vadd.f32 %v1972_v54, %v10302_v29 }
 0x4b6   : > { %v9192_v10 = vpack.c.bf16 %v2076_v28, %v2072_v32  ;;  %v2061_v42 = vpop.f32.mrb[39].mxu1  ;;  %v2060_v30 = vadd.f32 %v2059_v7, %v10302_v29  ;;  %v2078_v16 = vmax.f32 %v1971_v45, 0.0 }
 0x4b7   : > { %1824 = vst.msk [vmem:[%s10480_s16] sm:$0xf] %vm10473_vm7, %v1818_v46  ;;  %v9190_v3 = vpack.c.bf16 %v2077_v49, %v2073_v41  ;;  %v1976_v39 = vpop.f32.mrb[40].mxu0  ;;  %9183 = vmatprep.subr.bf16.mxu0 %v9182_v43  ;;  %v2062_v27 = vadd.f32 %v2061_v42, %v10302_v29  ;;  %v2079_v28 = vmax.f32 %v1973_v58, 0.0  ;;  %v11985_v29 = vmov 0.0  }
 0x4b8   : > { %v1977_v26 = vadd.f32 %v1976_v39, %v1852_v40  ;;  %v1978_v31 = vpop.f32.mrb[41].mxu0  ;;  %9185 = vmatpush1.bf16.msra.mxu0 %v9184_v50  ;;  %v2080_v41 = vmax.f32 %v2060_v30, 0.0 }
 0x4b9   : > { %v1979_v2 = vadd.f32 %v1978_v31, %v1852_v40  ;;  %v2065_v36 = vpop.f32.mrb[40].mxu1  ;;  %9191 = vmatprep.subr.bf16.mxu1 %v9190_v3  ;;  %v2081_v7 = vmax.f32 %v2062_v27, 0.0 }
 0x4ba   : > { %v2082_v34 = vmax.f32 %v1977_v26, 0.0  ;;  %v2066_v59 = vadd.f32 %v2065_v36, %v1852_v40  ;;  %v2067_v32 = vpop.f32.mrb[41].mxu1  ;;  %9193 = vmatpush1.bf16.msra.mxu1 %v9192_v10 }
 0x4bb   : > { %v2083_v46 = vmax.f32 %v1979_v2, 0.0  ;;  %v2068_v54 = vadd.f32 %v2067_v32, %v1852_v40 }
 0x4bc   : > { %v9188_v43 = vpack.c.bf16 %v2082_v34, %v2078_v16  ;;  %v2084_v49 = vmax.f32 %v2066_v59, 0.0 }
 0x4bd   : > { %v9186_v39 = vpack.c.bf16 %v2083_v46, %v2079_v28  ;;  %v2085_v17 = vmax.f32 %v2068_v54, 0.0 }
 0x4be   : > { %v9196_v50 = vpack.c.bf16 %v2084_v49, %v2080_v41 }
 0x4bf   : > { %v9194_v15 = vpack.c.bf16 %v2085_v17, %v2081_v7  ;;  %9187 = vmatprep.subr.bf16.mxu0 %v9186_v39 }
 0x4c0   : > { %9189 = vmatpush1.bf16.msra.mxu0 %v9188_v43 }
 0x4c1   : > { %9195 = vmatprep.subr.bf16.mxu1 %v9194_v15  ;;  %8858 = vmatprep.subr.msk.mxu0 %vm501_vm0, %v10319_v55 }
 0x4c2   : > { %9197 = vmatpush1.bf16.msra.mxu1 %v9196_v50 }
 0x4c3   : > { %8850 = vmatmul.mubr.msk.f32.vlgmr.msra.gmra.mrb[42].mxu0 %vm732_vm2, %v10111_v44  ;;  %8864 = vmatprep.subr.msk.mxu1 %vm501_vm0, %v10323_v60 }
 0x4c4   : > { %2196 = vmatprep.mubr.f32.mxu0 %v11985_v29  ;;  %8859 = vmatpush1.msk.msra.mxu0 %vm501_vm0, %v10310_v37 }
 0x4c5   : > { %8854 = vmatmul.mubr.msk.f32.vlgmr.msra.gmra.mrb[42].mxu1 %vm732_vm2, %v10111_v44  ;;  %v2089_v44 = vld [vmem:[%s11887_s3 + $0x18] sm:$0x3f] }
 0x4c6   : > { %2285 = vmatprep.mubr.f32.mxu1 %v11985_v29  ;;  %8865 = vmatpush1.msk.msra.mxu1 %vm501_vm0, %v10315_v47  ;;  %v2102_v47 = vpop.permute.xlu1 %2101 }
 0x4c7   : > { %8851 = vmatmul.mubr.msk.f32.gmra.mrb[44].mxu0 %vm732_vm2, %v10123_v48 }
 0x4c8   : > { %2202 = vmatprep.mubr.f32.mxu0 %v11985_v29 }
 0x4c9   : > { %8855 = vmatmul.mubr.msk.f32.gmra.mrb[44].mxu1 %vm732_vm2, %v10123_v48 }
 0x4ca   : > { %2291 = vmatprep.mubr.f32.mxu1 %v11985_v29  ;;  %v2112_v43 = vpop.permute.xlu1 %2111 }
 0x4cb   : > { %8852 = vmatmul.mubr.msk.f32.gmra.mrb[46].mxu0 %vm732_vm2, %v10138_v18 }
 0x4cc   : > { %2208 = vmatprep.mubr.f32.mxu0 %v11985_v29 }
 0x4cd   : > { %8856 = vmatmul.mubr.msk.f32.gmra.mrb[46].mxu1 %vm732_vm2, %v10138_v18 }
 0x4ce   : > { %2297 = vmatprep.mubr.f32.mxu1 %v11985_v29 }
 0x4cf   : > { %8853 = vmatmul.mubr.msk.f32.gmra.mrb[48].mxu0 %vm732_vm2, %v2089_v44 }
 0x4d0   : > { %2408 = vmatprep.mubr.f32.mxu0 %v11985_v29 }
 0x4d1   : > { %8857 = vmatmul.mubr.msk.f32.gmra.mrb[48].mxu1 %vm732_vm2, %v2089_v44 }
 0x4d2   : > { %2497 = vmatprep.mubr.f32.mxu1 %v11985_v29 }
 0x4d3   : > { %8860 = vmatmul.mubr.msk.f32.vlgmr.msra.gmra.mrb[50].mxu0 %vm488_vm1, %v10159_v21 }
 0x4d4   : > { %2414 = vmatprep.mubr.f32.mxu0 %v11985_v29 }
 0x4d5   : > { %8866 = vmatmul.mubr.msk.f32.vlgmr.msra.gmra.mrb[50].mxu1 %vm488_vm1, %v10159_v21 }
 0x4d6   : > { %2503 = vmatprep.mubr.f32.mxu1 %v11985_v29 }
 0x4d7   : > { %8861 = vmatmul.mubr.msk.f32.gmra.mrb[52].mxu0 %vm488_vm1, %v10170_v23 }
 0x4d8   : > { %2420 = vmatprep.mubr.f32.mxu0 %v11985_v29 }
 0x4d9   : > { %8867 = vmatmul.mubr.msk.f32.gmra.mrb[52].mxu1 %vm488_vm1, %v10170_v23 }
 0x4da   : > { %2509 = vmatprep.mubr.f32.mxu1 %v11985_v29 }
 0x4db   : > { %8862 = vmatmul.mubr.msk.f32.gmra.mrb[54].mxu0 %vm488_vm1, %v10181_v52 }
 0x4dc   : > { %2426 = vmatprep.mubr.f32.mxu0 %v11985_v29 }
 0x4dd   : > { %8868 = vmatmul.mubr.msk.f32.gmra.mrb[54].mxu1 %vm488_vm1, %v10181_v52 }
 0x4de   : > { %2515 = vmatprep.mubr.f32.mxu1 %v11985_v29 }
 0x4df   : > { %8863 = vmatmul.mubr.msk.f32.gmra.mrb[56].mxu0 %vm488_vm1, %v10192_v53 }
 0x4e0   : > { %2610 = vmatprep.mubr.f32.mxu0 %v11985_v29 }
 0x4e1   : > { %8869 = vmatmul.mubr.msk.f32.gmra.mrb[56].mxu1 %vm488_vm1, %v10192_v53 }
 0x4e2   : > { %2699 = vmatprep.mubr.f32.mxu1 %v11985_v29 }
 0x596   : > { %v2192_v48 = vpop.f32.mrb[42].mxu0 }
 0x597   : > { %v2194_v18 = vpop.f32.mrb[43].mxu0  ;;  %v2193_v23 = vadd.f32 %v2192_v48, %v10304_v33 }
 0x598   : > { %v2281_v21 = vpop.f32.mrb[42].mxu1  ;;  %v2195_v52 = vadd.f32 %v2194_v18, %v10304_v33 }
 0x599   : > { %v2283_v37 = vpop.f32.mrb[43].mxu1  ;;  %v2282_v60 = vadd.f32 %v2281_v21, %v10304_v33  ;;  %v2304_v42 = vmax.f32 %v2193_v23, 0.0 }
 0x59a   : > { %v2198_v55 = vpop.f32.mrb[44].mxu0  ;;  %v2284_v10 = vadd.f32 %v2283_v37, %v10304_v33  ;;  %v2305_v30 = vmax.f32 %v2195_v52, 0.0 }
 0x59b   : > { %v2199_v15 = vadd.f32 %v2198_v55, %v2102_v47  ;;  %v2200_v17 = vpop.f32.mrb[45].mxu0  ;;  %v2306_v2 = vmax.f32 %v2282_v60, 0.0 }
 0x59c   : > { %v2201_v45 = vadd.f32 %v2200_v17, %v2102_v47  ;;  %v2287_v53 = vpop.f32.mrb[44].mxu1  ;;  %v2307_v59 = vmax.f32 %v2284_v10, 0.0 }
 0x59d   : > { %v2308_v40 = vmax.f32 %v2199_v15, 0.0  ;;  %v2288_v3 = vadd.f32 %v2287_v53, %v2102_v47  ;;  %v2289_v58 = vpop.f32.mrb[45].mxu1 }
 0x59e   : > { %v2309_v26 = vmax.f32 %v2201_v45, 0.0  ;;  %v2290_v31 = vadd.f32 %v2289_v58, %v2102_v47  ;;  %v2204_v27 = vpop.f32.mrb[46].mxu0 }
 0x59f   : > { %v9200_v36 = vpack.c.bf16 %v2308_v40, %v2304_v42  ;;  %v2310_v16 = vmax.f32 %v2288_v3, 0.0  ;;  %v2206_v34 = vpop.f32.mrb[47].mxu0  ;;  %v2205_v33 = vadd.f32 %v2204_v27, %v10306_v57  ;;  %v2732_v27 = vpop.permute.xlu1 %2731 }
 0x5a0   : > { %v9198_v32 = vpack.c.bf16 %v2309_v26, %v2305_v30  ;;  %v2311_v28 = vmax.f32 %v2290_v31, 0.0  ;;  %v2293_v46 = vpop.f32.mrb[46].mxu1  ;;  %v2207_v7 = vadd.f32 %v2206_v34, %v10306_v57 }
 0x5a1   : > { %v9210_v54 = vpack.c.bf16 %v2310_v16, %v2306_v2  ;;  %v2295_v41 = vpop.f32.mrb[47].mxu1  ;;  %v2294_v50 = vadd.f32 %v2293_v46, %v10306_v57  ;;  %v2312_v37 = vmax.f32 %v2205_v33, 0.0 }
 0x5a2   : > { %v9208_v49 = vpack.c.bf16 %v2311_v28, %v2307_v59  ;;  %v2210_v39 = vpop.f32.mrb[48].mxu0  ;;  %9199 = vmatprep.subr.bf16.mxu0 %v9198_v32  ;;  %v2296_v18 = vadd.f32 %v2295_v41, %v10306_v57  ;;  %v2313_v60 = vmax.f32 %v2207_v7, 0.0 }
 0x5a3   : > { %v2211_v44 = vadd.f32 %v2210_v39, %v2112_v43  ;;  %v2212_v48 = vpop.f32.mrb[49].mxu0  ;;  %9201 = vmatpush1.bf16.msra.mxu0 %v9200_v36  ;;  %v2314_v10 = vmax.f32 %v2294_v50, 0.0 }
 0x5a4   : > { %v2213_v21 = vadd.f32 %v2212_v48, %v2112_v43  ;;  %v2299_v23 = vpop.f32.mrb[48].mxu1  ;;  %9209 = vmatprep.subr.bf16.mxu1 %v9208_v49  ;;  %v2315_v42 = vmax.f32 %v2296_v18, 0.0 }
 0x5a5   : > { %v2316_v47 = vmax.f32 %v2211_v44, 0.0  ;;  %v2300_v52 = vadd.f32 %v2299_v23, %v2112_v43  ;;  %v2301_v55 = vpop.f32.mrb[49].mxu1  ;;  %9211 = vmatpush1.bf16.msra.mxu1 %v9210_v54 }
 0x5a6   : > { %v2317_v15 = vmax.f32 %v2213_v21, 0.0  ;;  %v2302_v17 = vadd.f32 %v2301_v55, %v2112_v43  ;;  %v2742_v55 = vpop.permute.xlu1 %2741 }
 0x5a7   : > { %v9205_v45 = vpack.c.bf16 %v2316_v47, %v2312_v37  ;;  %v2318_v53 = vmax.f32 %v2300_v52, 0.0 }
 0x5a8   : > { %v9202_v40 = vpack.c.bf16 %v2317_v15, %v2313_v60  ;;  %v2319_v3 = vmax.f32 %v2302_v17, 0.0 }
 0x5a9   : > { %v9215_v58 = vpack.c.bf16 %v2318_v53, %v2314_v10 }
 0x5aa   : > { %v9212_v30 = vpack.c.bf16 %v2319_v3, %v2315_v42  ;;  %9204 = vmatprep.subr.msk.bf16.mxu0 %vm10200_vm5, %v9202_v40 }
 0x5ab   : > { %9207 = vmatpush1.bf16.msk.msra.mxu0 %vm10200_vm5, %v9205_v45 }
 0x5ac   : > { %9214 = vmatprep.subr.msk.bf16.mxu1 %vm10200_vm5, %v9212_v30 }
 0x5ad   : > { %9217 = vmatpush1.bf16.msk.msra.mxu1 %vm10200_vm5, %v9215_v58 }
 0x5ae   : > { %8872 = vmatmul.mubr.msk.f32.vlgmr.msra.gmra.mrb[50].mxu0 %vm1141_vm6, %v10211_v62 }
 0x5af   : > { %2616 = vmatprep.mubr.f32.mxu0 %v11985_v29 }
 0x5b0   : > { %8878 = vmatmul.mubr.msk.f32.vlgmr.msra.gmra.mrb[50].mxu1 %vm1141_vm6, %v10211_v62 }
 0x5b1   : > { %2705 = vmatprep.mubr.f32.mxu1 %v11985_v29 }
 0x5b2   : > { %8873 = vmatmul.mubr.msk.f32.gmra.mrb[52].mxu0 %vm1141_vm6, %v10223_v63 }
 0x5b3   : > { %2622 = vmatprep.mubr.f32.mxu0 %v11985_v29 }
 0x5b4   : > { %8879 = vmatmul.mubr.msk.f32.gmra.mrb[52].mxu1 %vm1141_vm6, %v10223_v63 }
 0x5b5   : > { %2711 = vmatprep.mubr.f32.mxu1 %v11985_v29 }
 0x5b6   : > { %8874 = vmatmul.mubr.msk.f32.gmra.mrb[54].mxu0 %vm1141_vm6, %v10234_v0 }
 0x5b7   : > { %2628 = vmatprep.mubr.f32.mxu0 %v11985_v29 }
 0x5b8   : > { %8880 = vmatmul.mubr.msk.f32.gmra.mrb[54].mxu1 %vm1141_vm6, %v10234_v0 }
 0x5b9   : > { %2717 = vmatprep.mubr.f32.mxu1 %v11985_v29 }
 0x5ba   : > { %8875 = vmatmul.mubr.msk.f32.gmra.mrb[56].mxu0 %vm1141_vm6, %v10245_v1 }
 0x5bb   : > { %2880 = vmatprep.mubr.f32.mxu0 %v11985_v29 }
 0x5bc   : > { %8881 = vmatmul.mubr.msk.f32.gmra.mrb[56].mxu1 %vm1141_vm6, %v10245_v1 }
 0x5bd   : > { %2969 = vmatprep.mubr.f32.mxu1 %v11985_v29 }
 0x681   : > { %v2612_v62 = vpop.f32.mrb[50].mxu0 }
 0x682   : > { %v2614_v63 = vpop.f32.mrb[51].mxu0  ;;  %v2744_v26 = vadd.f32 %v10312_v38, %v2612_v62 }
 0x683   : > { %v2701_v57 = vpop.f32.mrb[50].mxu1  ;;  %v2745_v0 = vadd.f32 %v10312_v38, %v2614_v63 }
 0x684   : > { %v2703_v31 = vpop.f32.mrb[51].mxu1  ;;  %v2746_v36 = vadd.f32 %v10312_v38, %v2701_v57  ;;  %v2760_v28 = vmax.f32 %v2744_v26, 0.0 }
 0x685   : > { %v2618_v2 = vpop.f32.mrb[52].mxu0  ;;  %v2747_v59 = vadd.f32 %v10312_v38, %v2703_v31  ;;  %v2761_v41 = vmax.f32 %v2745_v0, 0.0 }
 0x686   : > { %v2748_v16 = vadd.f32 %v2732_v27, %v2618_v2  ;;  %v2620_v34 = vpop.f32.mrb[53].mxu0  ;;  %v2762_v39 = vmax.f32 %v2746_v36, 0.0 }
 0x687   : > { %v2749_v32 = vadd.f32 %v2732_v27, %v2620_v34  ;;  %v2707_v1 = vpop.f32.mrb[52].mxu1  ;;  %v2763_v18 = vmax.f32 %v2747_v59, 0.0 }
 0x688   : > { %v2764_v46 = vmax.f32 %v2748_v16, 0.0  ;;  %v2750_v54 = vadd.f32 %v2732_v27, %v2707_v1  ;;  %v2709_v33 = vpop.f32.mrb[53].mxu1 }
 0x689   : > { %v2765_v43 = vmax.f32 %v2749_v32, 0.0  ;;  %v2751_v49 = vadd.f32 %v2732_v27, %v2709_v33  ;;  %v2624_v7 = vpop.f32.mrb[54].mxu0 }
 0x68a   : > { %v9220_v50 = vpack.c.bf16 %v2764_v46, %v2760_v28  ;;  %v2766_v44 = vmax.f32 %v2750_v54, 0.0  ;;  %v2626_v48 = vpop.f32.mrb[55].mxu0  ;;  %v2752_v38 = vadd.f32 %v10325_v61, %v2624_v7  ;;  %v2792_v46 = vpop.permute.xlu1 %2791 }
 0x68b   : > { %v9218_v21 = vpack.c.bf16 %v2765_v43, %v2761_v41  ;;  %v2767_v23 = vmax.f32 %v2751_v49, 0.0  ;;  %v2713_v37 = vpop.f32.mrb[54].mxu1  ;;  %v2753_v15 = vadd.f32 %v10325_v61, %v2626_v48 }
 0x68c   : > { %v9228_v47 = vpack.c.bf16 %v2766_v44, %v2762_v39  ;;  %v2715_v52 = vpop.f32.mrb[55].mxu1  ;;  %v2754_v10 = vadd.f32 %v10325_v61, %v2713_v37  ;;  %v2768_v58 = vmax.f32 %v2752_v38, 0.0 }
 0x68d   : > { %v9226_v60 = vpack.c.bf16 %v2767_v23, %v2763_v18  ;;  %v2630_v17 = vpop.f32.mrb[56].mxu0  ;;  %9219 = vmatprep.subr.bf16.mxu0 %v9218_v21  ;;  %v2755_v42 = vadd.f32 %v10325_v61, %v2715_v52  ;;  %v2769_v57 = vmax.f32 %v2753_v15, 0.0 }
 0x68e   : > { %v2756_v45 = vadd.f32 %v2742_v55, %v2630_v17  ;;  %v2632_v53 = vpop.f32.mrb[57].mxu0  ;;  %9221 = vmatpush1.bf16.msra.mxu0 %v9220_v50  ;;  %v2770_v27 = vmax.f32 %v2754_v10, 0.0 }
 0x68f   : > { %v2757_v40 = vadd.f32 %v2742_v55, %v2632_v53  ;;  %v2719_v3 = vpop.f32.mrb[56].mxu1  ;;  %9227 = vmatprep.subr.bf16.mxu1 %v9226_v60  ;;  %v2771_v36 = vmax.f32 %v2755_v42, 0.0  ;;  %v3200_v60 = vld [vmem:[%s9906_s29 + $0x10] sm:$0xff] }
 0x690   : > { %v2772_v30 = vmax.f32 %v2756_v45, 0.0  ;;  %v2758_v62 = vadd.f32 %v2742_v55, %v2719_v3  ;;  %v2721_v63 = vpop.f32.mrb[57].mxu1  ;;  %9229 = vmatpush1.bf16.msra.mxu1 %v9228_v47 }
 0x691   : > { %v2773_v26 = vmax.f32 %v2757_v40, 0.0  ;;  %v2759_v31 = vadd.f32 %v2742_v55, %v2721_v63  ;;  %v2802_v40 = vpop.permute.xlu1 %2801 }
 0x692   : > { %v9224_v0 = vpack.c.bf16 %v2772_v30, %v2768_v58  ;;  %v2774_v2 = vmax.f32 %v2758_v62, 0.0  ;;  %v3230_v62 = vcombine.high %v3200_v60, %v3200_v60 }
 0x693   : > { %v9222_v16 = vpack.c.bf16 %v2773_v26, %v2769_v57  ;;  %v2775_v34 = vmax.f32 %v2759_v31, 0.0 }
 0x694   : > { %v9232_v59 = vpack.c.bf16 %v2774_v2, %v2770_v27  ;;  %v10627_v2 = vrot.slane %v3200_v60, %v9891_v12 }
 0x695   : > { %v9230_v32 = vpack.c.bf16 %v2775_v34, %v2771_v36  ;;  %9223 = vmatprep.subr.bf16.mxu0 %v9222_v16 }
 0x696   : > { %9225 = vmatpush1.bf16.msra.mxu0 %v9224_v0 }
 0x697   : > { %9231 = vmatprep.subr.bf16.mxu1 %v9230_v32 }
 0x698   : > { %9233 = vmatpush1.bf16.msra.mxu1 %v9232_v59 }
 0x699   : > { %8882 = vmatmul.mubr.msk.f32.vlgmr.msra.gmra.mrb[58].mxu0 %vm732_vm2, %v10259_v20 }
 0x69a   : > { %2886 = vmatprep.mubr.f32.mxu0 %v11985_v29 }
 0x69b   : > { %8886 = vmatmul.mubr.msk.f32.vlgmr.msra.gmra.mrb[58].mxu1 %vm732_vm2, %v10259_v20 }
 0x69c   : > { %2975 = vmatprep.mubr.f32.mxu1 %v11985_v29 }
 0x69d   : > { %8883 = vmatmul.mubr.msk.f32.gmra.mrb[60].mxu0 %vm732_vm2, %v10267_v22 }
 0x69e   : > { %2892 = vmatprep.mubr.f32.mxu0 %v11985_v29 }
 0x69f   : > { %8887 = vmatmul.mubr.msk.f32.gmra.mrb[60].mxu1 %vm732_vm2, %v10267_v22 }
 0x6a0   : > { %2981 = vmatprep.mubr.f32.mxu1 %v11985_v29 }
 0x6a1   : > { %8884 = vmatmul.mubr.msk.f32.gmra.mrb[62].mxu0 %vm732_vm2, %v10278_v24 }
 0x6a2   : > { %2898 = vmatprep.mubr.f32.mxu0 %v11985_v29 }
 0x6a3   : > { %8888 = vmatmul.mubr.msk.f32.gmra.mrb[62].mxu1 %vm732_vm2, %v10278_v24 }
 0x6a4   : > { %2987 = vmatprep.mubr.f32.mxu1 %v11985_v29 }
 0x6a5   : > { %8885 = vmatmul.mubr.msk.f32.gmra.mrb[64].mxu0 %vm732_vm2, %v10289_v25 }
 0x6a6   : > { %3088 = vmatprep.mubr.f32.mxu0 %v11985_v29 }
 0x6a7   : > { %8889 = vmatmul.mubr.msk.f32.gmra.mrb[64].mxu1 %vm732_vm2, %v10289_v25 }
 0x6a8   : > { %3159 = vmatprep.mubr.f32.mxu1 %v11985_v29 }
 0x76c   : > { %v2882_v20 = vpop.f32.mrb[58].mxu0 }
 0x76d   : > { %v2884_v22 = vpop.f32.mrb[59].mxu0  ;;  %v2883_v1 = vadd.f32 %v2882_v20, %v10344_v5 }
 0x76e   : > { %v2971_v61 = vpop.f32.mrb[58].mxu1  ;;  %v2885_v24 = vadd.f32 %v2884_v22, %v10344_v5 }
 0x76f   : > { %v2973_v28 = vpop.f32.mrb[59].mxu1  ;;  %v2972_v33 = vadd.f32 %v2971_v61, %v10344_v5  ;;  %v2994_v39 = vmax.f32 %v2883_v1, 0.0  ;;  %v10630_v61 = vrot.slane %v3230_v62, %v9891_v12 }
 0x770   : > { %v2888_v54 = vpop.f32.mrb[60].mxu0  ;;  %v2974_v49 = vadd.f32 %v2973_v28, %v10344_v5  ;;  %v2995_v18 = vmax.f32 %v2885_v24, 0.0 }
 0x771   : > { %v2889_v41 = vadd.f32 %v2888_v54, %v2792_v46  ;;  %v2890_v43 = vpop.f32.mrb[61].mxu0  ;;  %v2996_v47 = vmax.f32 %v2972_v33, 0.0  ;;  %v10634_v33 = vcombine.high %v10627_v2, %v10627_v2 }
 0x772   : > { %v2891_v25 = vadd.f32 %v2890_v43, %v2792_v46  ;;  %v2977_v7 = vpop.f32.mrb[60].mxu1  ;;  %v2997_v15 = vmax.f32 %v2974_v49, 0.0  ;;  %v10638_v49 = vcombine.high %v10630_v61, %v10630_v61 }
 0x773   : > { %v2998_v50 = vmax.f32 %v2889_v41, 0.0  ;;  %v2978_v44 = vadd.f32 %v2977_v7, %v2792_v46  ;;  %v2979_v48 = vpop.f32.mrb[61].mxu1 }
 0x774   : > { %v2999_v21 = vmax.f32 %v2891_v25, 0.0  ;;  %v2980_v23 = vadd.f32 %v2979_v48, %v2792_v46  ;;  %v2894_v37 = vpop.f32.mrb[62].mxu0  ;;  %v3010_v25 = vld [vmem:[%s11894_s10] sm:$0x1] }
 0x775   : > { %v9236_v38 = vpack.c.bf16 %v2998_v50, %v2994_v39  ;;  %v3000_v52 = vmax.f32 %v2978_v44, 0.0  ;;  %v2896_v55 = vpop.f32.mrb[63].mxu0  ;;  %v2895_v53 = vadd.f32 %v2894_v37, %v10362_v8 }
 0x776   : > { %v9234_v17 = vpack.c.bf16 %v2999_v21, %v2995_v18  ;;  %v3001_v10 = vmax.f32 %v2980_v23, 0.0  ;;  %v2983_v45 = vpop.f32.mrb[62].mxu1  ;;  %v2897_v58 = vadd.f32 %v2896_v55, %v10362_v8 }
 0x777   : > { %v9244_v5 = vpack.c.bf16 %v3000_v52, %v2996_v47  ;;  %v2985_v42 = vpop.f32.mrb[63].mxu1  ;;  %v2984_v63 = vadd.f32 %v2983_v45, %v10362_v8  ;;  %v3002_v36 = vmax.f32 %v2895_v53, 0.0 }
 0x778   : > { %v9242_v3 = vpack.c.bf16 %v3001_v10, %v2997_v15  ;;  %v2900_v30 = vpop.f32.mrb[64].mxu0  ;;  %9235 = vmatprep.subr.bf16.mxu0 %v9234_v17  ;;  %v2986_v31 = vadd.f32 %v2985_v42, %v10362_v8  ;;  %v3003_v32 = vmax.f32 %v2897_v58, 0.0 }
 0x779   : > { %v2901_v57 = vadd.f32 %v2900_v30, %v2802_v40  ;;  %v2902_v26 = vpop.f32.mrb[65].mxu0  ;;  %9237 = vmatpush1.bf16.msra.mxu0 %v9236_v38  ;;  %v3004_v1 = vmax.f32 %v2984_v63, 0.0 }
 0x77a   : > { %v2903_v27 = vadd.f32 %v2902_v26, %v2802_v40  ;;  %v2989_v0 = vpop.f32.mrb[64].mxu1  ;;  %9243 = vmatprep.subr.bf16.mxu1 %v9242_v3  ;;  %v3005_v46 = vmax.f32 %v2986_v31, 0.0 }
 0x77b   : > { %v3006_v16 = vmax.f32 %v2901_v57, 0.0  ;;  %v2990_v34 = vadd.f32 %v2989_v0, %v2802_v40  ;;  %v2991_v59 = vpop.f32.mrb[65].mxu1  ;;  %9245 = vmatpush1.bf16.msra.mxu1 %v9244_v5 }
 0x77c   : > { %v3007_v20 = vmax.f32 %v2903_v27, 0.0  ;;  %v2992_v22 = vadd.f32 %v2991_v59, %v2802_v40 }
 0x77d   : > { %v9240_v28 = vpack.c.bf16 %v3006_v16, %v3002_v36  ;;  %v3008_v8 = vmax.f32 %v2990_v34, 0.0 }
 0x77e   : > { %v9238_v24 = vpack.c.bf16 %v3007_v20, %v3003_v32  ;;  %v3009_v54 = vmax.f32 %v2992_v22, 0.0 }
 0x77f   : > { %v9248_v41 = vpack.c.bf16 %v3008_v8, %v3004_v1 }
 0x780   : > { %v9246_v43 = vpack.c.bf16 %v3009_v54, %v3005_v46  ;;  %9239 = vmatprep.subr.bf16.mxu0 %v9238_v24 }
 0x781   : > { %9241 = vmatpush1.bf16.msra.mxu0 %v9240_v28 }
 0x782   : > { %9247 = vmatprep.subr.bf16.mxu1 %v9246_v43  ;;  %8892 = vmatprep.subr.msk.mxu0 %vm501_vm0, %v10634_v33 }
 0x783   : > { %9249 = vmatpush1.bf16.msra.mxu1 %v9248_v41 }
 0x784   : > { %8890 = vmatmul.mubr.msk.f32.vlgmr.msra.gmra.mrb[66].mxu0 %vm732_vm2, %v3010_v25  ;;  %8898 = vmatprep.subr.msk.mxu1 %vm501_vm0, %v10638_v49 }
 0x785   : > { %8893 = vmatpush1.msk.msra.mxu0 %vm501_vm0, %v10627_v2  ;;  %3331 = vmatprep.mubr.f32.mxu0 %v11985_v29 }
 0x786   : > { %8891 = vmatmul.mubr.msk.f32.vlgmr.msra.gmra.mrb[66].mxu1 %vm732_vm2, %v3010_v25 }
 0x787   : > { %8899 = vmatpush1.msk.msra.mxu1 %vm501_vm0, %v10630_v61  ;;  %3420 = vmatprep.mubr.f32.mxu1 %v11985_v29 }
 0x788   : > { %8894 = vmatmul.mubr.msk.f32.vlgmr.msra.gmra.mrb[68].mxu0 %vm488_vm1, %v10341_v4 }
 0x789   : > { %3337 = vmatprep.mubr.f32.mxu0 %v11985_v29 }
 0x78a   : > { %8900 = vmatmul.mubr.msk.f32.vlgmr.msra.gmra.mrb[68].mxu1 %vm488_vm1, %v10341_v4  ;;  %v10672_v4 = vpop.permute.xlu1 %3216 }
 0x78b   : > { %3426 = vmatprep.mubr.f32.mxu1 %v11985_v29 }
 0x78c   : > { %8895 = vmatmul.mubr.msk.f32.gmra.mrb[70].mxu0 %vm488_vm1, %v10355_v6 }
 0x78d   : > { %3343 = vmatprep.mubr.f32.mxu0 %v11985_v29 }
 0x78e   : > { %8901 = vmatmul.mubr.msk.f32.gmra.mrb[70].mxu1 %vm488_vm1, %v10355_v6  ;;  %v10681_v6 = vpop.permute.xlu1 %3226 }
 0x78f   : > { %3432 = vmatprep.mubr.f32.mxu1 %v11985_v29 }
 0x790   : > { %8896 = vmatmul.mubr.msk.f32.gmra.mrb[72].mxu0 %vm488_vm1, %v10368_v9 }
 0x791   : > { %3349 = vmatprep.mubr.f32.mxu0 %v11985_v29 }
 0x792   : > { %8902 = vmatmul.mubr.msk.f32.gmra.mrb[72].mxu1 %vm488_vm1, %v10368_v9  ;;  %v10683_v7 = vpop.permute.xlu1 %3476 }
 0x793   : > { %3438 = vmatprep.mubr.f32.mxu1 %v11985_v29 }
 0x794   : > { %8897 = vmatmul.mubr.msk.f32.gmra.mrb[74].mxu0 %vm488_vm1, %v10379_v11 }
 0x795   : > { %3565 = vmatprep.mubr.f32.mxu0 %v11985_v29 }
 0x796   : > { %8903 = vmatmul.mubr.msk.f32.gmra.mrb[74].mxu1 %vm488_vm1, %v10379_v11  ;;  %v10685_v39 = vpop.permute.xlu1 %3486 }
 0x797   : > { %3654 = vmatprep.mubr.f32.mxu1 %v11985_v29 }
 0x79a   : > { %v10687_v9 = vpop.permute.xlu1 %4106 }
 0x79e   : > { %v10689_v50 = vpop.permute.xlu1 %4116 }
 0x7a2   : > { %v10691_v44 = vpop.permute.xlu1 %4166 }
 0x7a6   : > { %v10693_v48 = vpop.permute.xlu1 %4176 }
 0x7aa   : > { %v10695_v18 = vpop.permute.xlu1 %4591 }
 0x7ae   : > { %v10697_v21 = vpop.permute.xlu1 %4601 }
 0x7b2   : > { %v10699_v11 = vpop.permute.xlu1 %4851 }
 0x7b6   : > { %v10701_v23 = vpop.permute.xlu1 %4861 }
 0x7ba   : > { %v10703_v37 = vpop.permute.xlu1 %5481 }
 0x7be   : > { %v10705_v47 = vpop.permute.xlu1 %5491 }
 0x7c2   : > { %v10707_v38 = vpop.permute.xlu1 %5541 }
 0x7c6   : > { %v10709_v52 = vpop.permute.xlu1 %5551 }
 0x7ca   : > { %v10711_v55 = vpop.permute.xlu1 %5966 }
 0x7cb   : > { %11986 = vst [vmem:[#allocation36_spill] sm:$0xff] %v10711_v55 }
 0x7ce   : > { %v10713_v60 = vpop.permute.xlu1 %5976 }
 0x7cf   : > { %11987 = vst [vmem:[#allocation37_spill] sm:$0xff] %v10713_v60 }
 0x7d2   : > { %v10715_v15 = vpop.permute.xlu1 %6226 }
 0x7d3   : > { %11988 = vst [vmem:[#allocation38_spill] sm:$0xff] %v10715_v15 }
 0x7d6   : > { %v10717_v17 = vpop.permute.xlu1 %6236 }
 0x7d7   : > { %11989 = vst [vmem:[#allocation39_spill] sm:$0xff] %v10717_v17 }
 0x7da   : > { %v10719_v10 = vpop.permute.xlu1 %6856 }
 0x7db   : > { %11990 = vst [vmem:[#allocation40_spill] sm:$0xff] %v10719_v10 }
 0x7de   : > { %v10721_v45 = vpop.permute.xlu1 %6866 }
 0x7df   : > { %11991 = vst [vmem:[#allocation41_spill] sm:$0xff] %v10721_v45 }
 0x7e2   : > { %v10723_v5 = vpop.permute.xlu1 %6916 }
 0x7e3   : > { %11992 = vst [vmem:[#allocation42_spill] sm:$0xff] %v10723_v5 }
 0x7e6   : > { %v10725_v53 = vpop.permute.xlu1 %6926 }
 0x7e7   : > { %11993 = vst [vmem:[#allocation43_spill] sm:$0xff] %v10725_v53 }
 0x7ea   : > { %v10727_v42 = vpop.permute.xlu1 %7341 }
 0x7eb   : > { %11994 = vst [vmem:[#allocation44_spill] sm:$0xff] %v10727_v42 }
 0x7ee   : > { %v10729_v40 = vpop.permute.xlu1 %7351 }
 0x7ef   : > { %11995 = vst [vmem:[#allocation45_spill] sm:$0xff] %v10729_v40 }
 0x7f2   : > { %v10731_v3 = vpop.permute.xlu1 %7601 }
 0x7f3   : > { %11996 = vst [vmem:[#allocation46_spill] sm:$0xff] %v10731_v3  ;;  %v12005_v3 = vld [vmem:[#allocation9_spill] sm:$0xff] }
 0x7f6   : > { %v10733_v58 = vpop.permute.xlu1 %7611 }
 0x7f7   : > { %11997 = vst [vmem:[#allocation47_spill] sm:$0xff] %v10733_v58 }
 0x7fa   : > { %v10735_v30 = vpop.permute.xlu1 %8231 }
 0x7fb   : > { %11998 = vst [vmem:[#allocation48_spill] sm:$0xff] %v10735_v30 }
 0x7fe   : > { %v10737_v62 = vpop.permute.xlu1 %8241 }
 0x7ff   : > { %11999 = vst [vmem:[#allocation49_spill] sm:$0xff] %v10737_v62 }
 0x802   : > { %v10739_v63 = vpop.permute.xlu1 %8291 }
 0x803   : > { %12000 = vst [vmem:[#allocation50_spill] sm:$0xff] %v10739_v63 }
 0x806   : > { %v10741_v57 = vpop.permute.xlu1 %8301 }
 0x807   : > { %12001 = vst [vmem:[#allocation51_spill] sm:$0xff] %v10741_v57 }
 0x80a   : > { %v3015_v26 = vpop.permute.xlu1 %3014 }
 0x80b   : > { %v3020_v31 = vrot.slane %v3015_v26, %v10456_v51 }
 0x857   : > { %v3090_v27 = vpop.f32.mrb[66].mxu0 }
 0x858   : > { %v3091_v0 = vadd.f32 %v3090_v27, %v3020_v31  ;;  %v3092_v36 = vpop.f32.mrb[67].mxu0 }
 0x859   : > { %v3093_v16 = vadd.f32 %v3092_v36, %v3020_v31  ;;  %v3161_v34 = vpop.f32.mrb[66].mxu1 }
 0x85a   : > { %v3166_v59 = vmax.f32 %v3091_v0, 0.0  ;;  %v3162_v32 = vadd.f32 %v3161_v34, %v3020_v31  ;;  %v3163_v20 = vpop.f32.mrb[67].mxu1 }
 0x85b   : > { %v3167_v22 = vmax.f32 %v3093_v16, 0.0  ;;  %v3164_v1 = vadd.f32 %v3163_v20, %v3020_v31  ;;  %v3333_v28 = vpop.f32.mrb[68].mxu0 }
 0x85c   : > { %v3168_v8 = vmax.f32 %v3162_v32, 0.0  ;;  %v3335_v46 = vpop.f32.mrb[69].mxu0  ;;  %v3334_v43 = vadd.f32 %v3333_v28, %v10383_v13 }
 0x85d   : > { %v3174_v24 = vcombine.low %v3166_v59, %v3167_v22  ;;  %v3169_v54 = vmax.f32 %v3164_v1, 0.0  ;;  %v3422_v41 = vpop.f32.mrb[68].mxu1  ;;  %v3336_v27 = vadd.f32 %v3335_v46, %v10383_v13 }
 0x85e   : > { %v3424_v25 = vpop.f32.mrb[69].mxu1  ;;  %v3423_v36 = vadd.f32 %v3422_v41, %v10383_v13  ;;  %v3445_v22 = vmax.f32 %v3334_v43, 0.0 }
 0x85f   : > { %v3175_v26 = vcombine.low %v3168_v8, %v3169_v54  ;;  %v3339_v57 = vpop.f32.mrb[70].mxu0  ;;  %v3182_v31 = vrot.slane %v3174_v24, %v10460_v35  ;;  %v3425_v59 = vadd.f32 %v3424_v25, %v10383_v13  ;;  %v3446_v54 = vmax.f32 %v3336_v27, 0.0 }
 0x860   : > { %v3340_v0 = vadd.f32 %v3339_v57, %v10672_v4  ;;  %v3341_v34 = vpop.f32.mrb[71].mxu0  ;;  %v3447_v24 = vmax.f32 %v3423_v36, 0.0 }
 0x861   : > { %v3189_v16 = vrot.slane %v3175_v26, %v10460_v35  ;;  %v3342_v32 = vadd.f32 %v3341_v34, %v10672_v4  ;;  %v3428_v20 = vpop.f32.mrb[70].mxu1  ;;  %v3448_v25 = vmax.f32 %v3425_v59, 0.0 }
 0x862   : > { %v3449_v1 = vmax.f32 %v3340_v0, 0.0  ;;  %v3429_v28 = vadd.f32 %v3428_v20, %v10672_v4  ;;  %v3430_v8 = vpop.f32.mrb[71].mxu1 }
 0x863   : > { %v3190_v46 = vcombine.low %v3182_v31, %v3189_v16  ;;  %v3450_v41 = vmax.f32 %v3342_v32, 0.0  ;;  %v3431_v57 = vadd.f32 %v3430_v8, %v10672_v4  ;;  %v3345_v63 = vpop.f32.mrb[72].mxu0 }
 0x864   : > { %v9252_v62 = vpack.c.bf16 %v3449_v1, %v3445_v22  ;;  %v3451_v26 = vmax.f32 %v3429_v28, 0.0  ;;  %v3347_v30 = vpop.f32.mrb[73].mxu0  ;;  %v3346_v20 = vadd.f32 %v3345_v63, %v10392_v14 }
 0x865   : > { %v3197_v13 = vrot.slane %v3190_v46, %v10460_v35  ;;  %v9250_v34 = vpack.c.bf16 %v3450_v41, %v3446_v54  ;;  %v3452_v43 = vmax.f32 %v3431_v57, 0.0  ;;  %v3434_v0 = vpop.f32.mrb[72].mxu1  ;;  %v3348_v4 = vadd.f32 %v3347_v30, %v10392_v14 }
 0x866   : > { %v9260_v58 = vpack.c.bf16 %v3451_v26, %v3447_v24  ;;  %v3436_v31 = vpop.f32.mrb[73].mxu1  ;;  %v3435_v16 = vadd.f32 %v3434_v0, %v10392_v14  ;;  %v3453_v28 = vmax.f32 %v3346_v20, 0.0  ;;  %v10769_v0 = vld [vmem:[%s11887_s3] sm:$0xff]  ;;  %v10850_v20 = vld [vmem:[%s11890_s6 + $0x18] sm:$0xff] }
 0x867   : > { %3199 = vst.msk [vmem:[%s10480_s16 + $0x4] sm:$0xf] %vm10473_vm7, %v3197_v13  ;;  %v9258_v27 = vpack.c.bf16 %v3452_v43, %v3448_v25  ;;  %v3351_v36 = vpop.f32.mrb[74].mxu0  ;;  %9251 = vmatprep.subr.bf16.mxu0 %v9250_v34  ;;  %v3437_v22 = vadd.f32 %v3436_v31, %v10392_v14  ;;  %v3454_v30 = vmax.f32 %v3348_v4, 0.0 }
 0x868   : > { %v3352_v32 = vadd.f32 %v3351_v36, %v10681_v6  ;;  %v3353_v59 = vpop.f32.mrb[75].mxu0  ;;  %9253 = vmatpush1.bf16.msra.mxu0 %v9252_v62  ;;  %v3455_v24 = vmax.f32 %v3435_v16, 0.0  ;;  %v12002_v36 = vld [vmem:[#allocation6_spill] sm:$0xff] }
 0x869   : > { %v3354_v1 = vadd.f32 %v3353_v59, %v10681_v6  ;;  %v3440_v63 = vpop.f32.mrb[74].mxu1  ;;  %9259 = vmatprep.subr.bf16.mxu1 %v9258_v27  ;;  %v3456_v62 = vmax.f32 %v3437_v22, 0.0 }
 0x86a   : > { %v3457_v8 = vmax.f32 %v3352_v32, 0.0  ;;  %v3441_v46 = vadd.f32 %v3440_v63, %v10681_v6  ;;  %v3442_v54 = vpop.f32.mrb[75].mxu1  ;;  %9261 = vmatpush1.bf16.msra.mxu1 %v9260_v58  ;;  %v10839_v58 = vld [vmem:[%s11890_s6 + $0x10] sm:$0xff] }
 0x86b   : > { %v3458_v41 = vmax.f32 %v3354_v1, 0.0  ;;  %v3443_v57 = vadd.f32 %v3442_v54, %v10681_v6  ;;  %v10781_v6 = vld [vmem:[%s11887_s3 + $0x8] sm:$0xff] }
 0x86c   : > { %v9256_v26 = vpack.c.bf16 %v3457_v8, %v3453_v28  ;;  %v3459_v13 = vmax.f32 %v3441_v46, 0.0 }
 0x86d   : > { %v9254_v25 = vpack.c.bf16 %v3458_v41, %v3454_v30  ;;  %v3460_v14 = vmax.f32 %v3443_v57, 0.0 }
 0x86e   : > { %v9264_v34 = vpack.c.bf16 %v3459_v13, %v3455_v24 }
 0x86f   : > { %v9262_v43 = vpack.c.bf16 %v3460_v14, %v3456_v62  ;;  %9255 = vmatprep.subr.bf16.mxu0 %v9254_v25 }
 0x870   : > { %9257 = vmatpush1.bf16.msra.mxu0 %v9256_v26 }
 0x871   : > { %9263 = vmatprep.subr.bf16.mxu1 %v9262_v43  ;;  %8912 = vmatprep.subr.msk.mxu0 %vm501_vm0, %v10634_v33  ;;  %v10796_v33 = vld [vmem:[%s11887_s3 + $0x10] sm:$0xff] }
 0x872   : > { %9265 = vmatpush1.bf16.msra.mxu1 %v9264_v34 }
 0x873   : > { %8904 = vmatmul.mubr.msk.f32.vlgmr.msra.gmra.mrb[76].mxu0 %vm732_vm2, %v10769_v0  ;;  %8918 = vmatprep.subr.msk.mxu1 %vm501_vm0, %v10638_v49  ;;  %v10828_v49 = vld [vmem:[%s11890_s6 + $0x8] sm:$0xff] }
 0x874   : > { %3571 = vmatprep.mubr.f32.mxu0 %v11985_v29  ;;  %8913 = vmatpush1.msk.msra.mxu0 %vm501_vm0, %v10627_v2  ;;  %v3464_v2 = vld [vmem:[%s11887_s3 + $0x18] sm:$0x3f] }
 0x875   : > { %8908 = vmatmul.mubr.msk.f32.vlgmr.msra.gmra.mrb[76].mxu1 %vm732_vm2, %v10769_v0 }
 0x876   : > { %3660 = vmatprep.mubr.f32.mxu1 %v11985_v29  ;;  %8919 = vmatpush1.msk.msra.mxu1 %vm501_vm0, %v10630_v61  ;;  %v10817_v61 = vld [vmem:[%s11890_s6] sm:$0xff] }
 0x877   : > { %8905 = vmatmul.mubr.msk.f32.gmra.mrb[78].mxu0 %vm732_vm2, %v10781_v6 }
 0x878   : > { %3577 = vmatprep.mubr.f32.mxu0 %v11985_v29 }
 0x879   : > { %8909 = vmatmul.mubr.msk.f32.gmra.mrb[78].mxu1 %vm732_vm2, %v10781_v6 }
 0x87a   : > { %3666 = vmatprep.mubr.f32.mxu1 %v11985_v29 }
 0x87b   : > { %8906 = vmatmul.mubr.msk.f32.gmra.mrb[80].mxu0 %vm732_vm2, %v10796_v33 }
 0x87c   : > { %3583 = vmatprep.mubr.f32.mxu0 %v11985_v29 }
 0x87d   : > { %8910 = vmatmul.mubr.msk.f32.gmra.mrb[80].mxu1 %vm732_vm2, %v10796_v33 }
 0x87e   : > { %3672 = vmatprep.mubr.f32.mxu1 %v11985_v29 }
 0x87f   : > { %8907 = vmatmul.mubr.msk.f32.gmra.mrb[82].mxu0 %vm732_vm2, %v3464_v2 }
 0x880   : > { %3783 = vmatprep.mubr.f32.mxu0 %v11985_v29 }
 0x881   : > { %8911 = vmatmul.mubr.msk.f32.gmra.mrb[82].mxu1 %vm732_vm2, %v3464_v2 }
 0x882   : > { %3872 = vmatprep.mubr.f32.mxu1 %v11985_v29 }
 0x883   : > { %8914 = vmatmul.mubr.msk.f32.vlgmr.msra.gmra.mrb[84].mxu0 %vm488_vm1, %v10817_v61 }
 0x884   : > { %3789 = vmatprep.mubr.f32.mxu0 %v11985_v29 }
 0x885   : > { %8920 = vmatmul.mubr.msk.f32.vlgmr.msra.gmra.mrb[84].mxu1 %vm488_vm1, %v10817_v61 }
 0x886   : > { %3878 = vmatprep.mubr.f32.mxu1 %v11985_v29 }
 0x887   : > { %8915 = vmatmul.mubr.msk.f32.gmra.mrb[86].mxu0 %vm488_vm1, %v10828_v49 }
 0x888   : > { %3795 = vmatprep.mubr.f32.mxu0 %v11985_v29 }
 0x889   : > { %8921 = vmatmul.mubr.msk.f32.gmra.mrb[86].mxu1 %vm488_vm1, %v10828_v49 }
 0x88a   : > { %3884 = vmatprep.mubr.f32.mxu1 %v11985_v29 }
 0x88b   : > { %8916 = vmatmul.mubr.msk.f32.gmra.mrb[88].mxu0 %vm488_vm1, %v10839_v58 }
 0x88c   : > { %3801 = vmatprep.mubr.f32.mxu0 %v11985_v29 }
 0x88d   : > { %8922 = vmatmul.mubr.msk.f32.gmra.mrb[88].mxu1 %vm488_vm1, %v10839_v58 }
 0x88e   : > { %3890 = vmatprep.mubr.f32.mxu1 %v11985_v29 }
 0x88f   : > { %8917 = vmatmul.mubr.msk.f32.gmra.mrb[90].mxu0 %vm488_vm1, %v10850_v20 }
 0x890   : > { %3985 = vmatprep.mubr.f32.mxu0 %v11985_v29 }
 0x891   : > { %8923 = vmatmul.mubr.msk.f32.gmra.mrb[90].mxu1 %vm488_vm1, %v10850_v20 }
 0x892   : > { %4074 = vmatprep.mubr.f32.mxu1 %v11985_v29 }
 0x946   : > { %v3567_v31 = vpop.f32.mrb[76].mxu0 }
 0x947   : > { %v3569_v27 = vpop.f32.mrb[77].mxu0  ;;  %v3568_v16 = vadd.f32 %v3567_v31, %v12002_v36 }
 0x948   : > { %v3656_v4 = vpop.f32.mrb[76].mxu1  ;;  %v3570_v59 = vadd.f32 %v3569_v27, %v12002_v36 }
 0x949   : > { %v3658_v32 = vpop.f32.mrb[77].mxu1  ;;  %v3657_v1 = vadd.f32 %v3656_v4, %v12002_v36  ;;  %v3679_v30 = vmax.f32 %v3568_v16, 0.0 }
 0x94a   : > { %v3573_v22 = vpop.f32.mrb[78].mxu0  ;;  %v3659_v8 = vadd.f32 %v3658_v32, %v12002_v36  ;;  %v3680_v26 = vmax.f32 %v3570_v59, 0.0 }
 0x94b   : > { %v3574_v63 = vadd.f32 %v3573_v22, %v10683_v7  ;;  %v3575_v28 = vpop.f32.mrb[79].mxu0  ;;  %v3681_v14 = vmax.f32 %v3657_v1, 0.0  ;;  %v12003_v22 = vld [vmem:[#allocation7_spill] sm:$0xff] }
 0x94c   : > { %v3576_v46 = vadd.f32 %v3575_v28, %v10683_v7  ;;  %v3662_v54 = vpop.f32.mrb[78].mxu1  ;;  %v3682_v31 = vmax.f32 %v3659_v8, 0.0 }
 0x94d   : > { %v3683_v41 = vmax.f32 %v3574_v63, 0.0  ;;  %v3663_v57 = vadd.f32 %v3662_v54, %v10683_v7  ;;  %v3664_v24 = vpop.f32.mrb[79].mxu1 }
 0x94e   : > { %v3684_v13 = vmax.f32 %v3576_v46, 0.0  ;;  %v3665_v62 = vadd.f32 %v3664_v24, %v10683_v7  ;;  %v3579_v25 = vpop.f32.mrb[80].mxu0 }
 0x94f   : > { %v9268_v34 = vpack.c.bf16 %v3683_v41, %v3679_v30  ;;  %v3685_v43 = vmax.f32 %v3663_v57, 0.0  ;;  %v3581_v2 = vpop.f32.mrb[81].mxu0  ;;  %v3580_v16 = vadd.f32 %v3579_v25, %v12003_v22 }
 0x950   : > { %v9266_v27 = vpack.c.bf16 %v3684_v13, %v3680_v26  ;;  %v3686_v4 = vmax.f32 %v3665_v62, 0.0  ;;  %v3668_v36 = vpop.f32.mrb[80].mxu1  ;;  %v3582_v54 = vadd.f32 %v3581_v2, %v12003_v22 }
 0x951   : > { %v9278_v32 = vpack.c.bf16 %v3685_v43, %v3681_v14  ;;  %v3670_v63 = vpop.f32.mrb[81].mxu1  ;;  %v3669_v7 = vadd.f32 %v3668_v36, %v12003_v22  ;;  %v3687_v57 = vmax.f32 %v3580_v16, 0.0  ;;  %v10904_v16 = vld [vmem:[%s11889_s5 + $0x10] sm:$0xff] }
 0x952   : > { %v9276_v28 = vpack.c.bf16 %v3686_v4, %v3682_v31  ;;  %v3585_v59 = vpop.f32.mrb[82].mxu0  ;;  %9267 = vmatprep.subr.bf16.mxu0 %v9266_v27  ;;  %v3671_v8 = vadd.f32 %v3670_v63, %v12003_v22  ;;  %v3688_v62 = vmax.f32 %v3582_v54, 0.0  ;;  %v10915_v63 = vld [vmem:[%s11889_s5 + $0x18] sm:$0xff] }
 0x953   : > { %v3586_v1 = vadd.f32 %v3585_v59, %v10685_v39  ;;  %v3587_v46 = vpop.f32.mrb[83].mxu0  ;;  %9269 = vmatpush1.bf16.msra.mxu0 %v9268_v34  ;;  %v3689_v43 = vmax.f32 %v3669_v7, 0.0  ;;  %v12004_v7 = vld [vmem:[#allocation8_spill] sm:$0xff] }
 0x954   : > { %v3588_v30 = vadd.f32 %v3587_v46, %v10685_v39  ;;  %v3674_v41 = vpop.f32.mrb[82].mxu1  ;;  %9277 = vmatprep.subr.bf16.mxu1 %v9276_v28  ;;  %v3690_v34 = vmax.f32 %v3671_v8, 0.0 }
 0x955   : > { %v3691_v24 = vmax.f32 %v3586_v1, 0.0  ;;  %v3675_v26 = vadd.f32 %v3674_v41, %v10685_v39  ;;  %v3676_v13 = vpop.f32.mrb[83].mxu1  ;;  %9279 = vmatpush1.bf16.msra.mxu1 %v9278_v32  ;;  %v10881_v32 = vld [vmem:[%s11889_s5] sm:$0xff] }
 0x956   : > { %v3692_v25 = vmax.f32 %v3588_v30, 0.0  ;;  %v3677_v14 = vadd.f32 %v3676_v13, %v10685_v39  ;;  %v10893_v39 = vld [vmem:[%s11889_s5 + $0x8] sm:$0xff] }
 0x957   : > { %v9273_v2 = vpack.c.bf16 %v3691_v24, %v3687_v57  ;;  %v3693_v31 = vmax.f32 %v3675_v26, 0.0 }
 0x958   : > { %v9270_v27 = vpack.c.bf16 %v3692_v25, %v3688_v62  ;;  %v3694_v4 = vmax.f32 %v3677_v14, 0.0 }
 0x959   : > { %v9283_v36 = vpack.c.bf16 %v3693_v31, %v3689_v43 }
 0x95a   : > { %v9280_v22 = vpack.c.bf16 %v3694_v4, %v3690_v34  ;;  %9272 = vmatprep.subr.msk.bf16.mxu0 %vm10200_vm5, %v9270_v27 }
 0x95b   : > { %9275 = vmatpush1.bf16.msk.msra.mxu0 %vm10200_vm5, %v9273_v2 }
 0x95c   : > { %9282 = vmatprep.subr.msk.bf16.mxu1 %vm10200_vm5, %v9280_v22 }
 0x95d   : > { %9285 = vmatpush1.bf16.msk.msra.mxu1 %vm10200_vm5, %v9283_v36 }
 0x95e   : > { %8926 = vmatmul.mubr.msk.f32.vlgmr.msra.gmra.mrb[84].mxu0 %vm1141_vm6, %v10881_v32 }
 0x95f   : > { %3991 = vmatprep.mubr.f32.mxu0 %v11985_v29 }
 0x960   : > { %8932 = vmatmul.mubr.msk.f32.vlgmr.msra.gmra.mrb[84].mxu1 %vm1141_vm6, %v10881_v32 }
 0x961   : > { %4080 = vmatprep.mubr.f32.mxu1 %v11985_v29 }
 0x962   : > { %8927 = vmatmul.mubr.msk.f32.gmra.mrb[86].mxu0 %vm1141_vm6, %v10893_v39 }
 0x963   : > { %3997 = vmatprep.mubr.f32.mxu0 %v11985_v29 }
 0x964   : > { %8933 = vmatmul.mubr.msk.f32.gmra.mrb[86].mxu1 %vm1141_vm6, %v10893_v39 }
 0x965   : > { %4086 = vmatprep.mubr.f32.mxu1 %v11985_v29 }
 0x966   : > { %8928 = vmatmul.mubr.msk.f32.gmra.mrb[88].mxu0 %vm1141_vm6, %v10904_v16 }
 0x967   : > { %4003 = vmatprep.mubr.f32.mxu0 %v11985_v29 }
 0x968   : > { %8934 = vmatmul.mubr.msk.f32.gmra.mrb[88].mxu1 %vm1141_vm6, %v10904_v16 }
 0x969   : > { %4092 = vmatprep.mubr.f32.mxu1 %v11985_v29 }
 0x96a   : > { %8929 = vmatmul.mubr.msk.f32.gmra.mrb[90].mxu0 %vm1141_vm6, %v10915_v63 }
 0x96b   : > { %4255 = vmatprep.mubr.f32.mxu0 %v11985_v29 }
 0x96c   : > { %8935 = vmatmul.mubr.msk.f32.gmra.mrb[90].mxu1 %vm1141_vm6, %v10915_v63 }
 0x96d   : > { %4344 = vmatprep.mubr.f32.mxu1 %v11985_v29 }
 0xa31   : > { %v3987_v28 = vpop.f32.mrb[84].mxu0 }
 0xa32   : > { %v3989_v54 = vpop.f32.mrb[85].mxu0  ;;  %v4119_v1 = vadd.f32 %v12004_v7, %v3987_v28 }
 0xa33   : > { %v4076_v59 = vpop.f32.mrb[84].mxu1  ;;  %v4120_v8 = vadd.f32 %v12004_v7, %v3989_v54 }
 0xa34   : > { %v4078_v46 = vpop.f32.mrb[85].mxu1  ;;  %v4121_v41 = vadd.f32 %v12004_v7, %v4076_v59  ;;  %v4135_v25 = vmax.f32 %v4119_v1, 0.0 }
 0xa35   : > { %v3993_v30 = vpop.f32.mrb[86].mxu0  ;;  %v4122_v26 = vadd.f32 %v12004_v7, %v4078_v46  ;;  %v4136_v31 = vmax.f32 %v4120_v8, 0.0 }
 0xa36   : > { %v4123_v57 = vadd.f32 %v10687_v9, %v3993_v30  ;;  %v3995_v24 = vpop.f32.mrb[87].mxu0  ;;  %v4137_v36 = vmax.f32 %v4121_v41, 0.0 }
 0xa37   : > { %v4124_v13 = vadd.f32 %v10687_v9, %v3995_v24  ;;  %v4082_v62 = vpop.f32.mrb[86].mxu1  ;;  %v4138_v59 = vmax.f32 %v4122_v26, 0.0 }
 0xa38   : > { %v4139_v14 = vmax.f32 %v4123_v57, 0.0  ;;  %v4125_v43 = vadd.f32 %v10687_v9, %v4082_v62  ;;  %v4084_v2 = vpop.f32.mrb[87].mxu1 }
 0xa39   : > { %v4140_v34 = vmax.f32 %v4124_v13, 0.0  ;;  %v4126_v27 = vadd.f32 %v10687_v9, %v4084_v2  ;;  %v3999_v4 = vpop.f32.mrb[88].mxu0 }
 0xa3a   : > { %v9288_v22 = vpack.c.bf16 %v4139_v14, %v4135_v25  ;;  %v4141_v28 = vmax.f32 %v4125_v43, 0.0  ;;  %v4001_v54 = vpop.f32.mrb[89].mxu0  ;;  %v4127_v1 = vadd.f32 %v12005_v3, %v3999_v4 }
 0xa3b   : > { %v9286_v30 = vpack.c.bf16 %v4140_v34, %v4136_v31  ;;  %v4142_v7 = vmax.f32 %v4126_v27, 0.0  ;;  %v4088_v46 = vpop.f32.mrb[88].mxu1  ;;  %v4128_v62 = vadd.f32 %v12005_v3, %v4001_v54 }
 0xa3c   : > { %v9296_v24 = vpack.c.bf16 %v4141_v28, %v4137_v36  ;;  %v4090_v57 = vpop.f32.mrb[89].mxu1  ;;  %v4129_v9 = vadd.f32 %v12005_v3, %v4088_v46  ;;  %v4143_v43 = vmax.f32 %v4127_v1, 0.0  ;;  %v10975_v1 = vld [vmem:[%s11892_s8 + $0x18] sm:$0xff] }
 0xa3d   : > { %v9294_v40 = vpack.c.bf16 %v4142_v7, %v4138_v59  ;;  %v4005_v8 = vpop.f32.mrb[90].mxu0  ;;  %9287 = vmatprep.subr.bf16.mxu0 %v9286_v30  ;;  %v4130_v26 = vadd.f32 %v12005_v3, %v4090_v57  ;;  %v4144_v27 = vmax.f32 %v4128_v62, 0.0 }
 0xa3e   : > { %v4131_v41 = vadd.f32 %v10689_v50, %v4005_v8  ;;  %v4007_v13 = vpop.f32.mrb[91].mxu0  ;;  %9289 = vmatpush1.bf16.msra.mxu0 %v9288_v22  ;;  %v4145_v28 = vmax.f32 %v4129_v9, 0.0  ;;  %v12006_v9 = vld [vmem:[#allocation10_spill] sm:$0xff] }
 0xa3f   : > { %v4132_v25 = vadd.f32 %v10689_v50, %v4007_v13  ;;  %v4094_v14 = vpop.f32.mrb[90].mxu1  ;;  %9295 = vmatprep.subr.bf16.mxu1 %v9294_v40  ;;  %v4146_v22 = vmax.f32 %v4130_v26, 0.0  ;;  %v10945_v40 = vld [vmem:[%s11892_s8] sm:$0xff] }
 0xa40   : > { %v4147_v2 = vmax.f32 %v4131_v41, 0.0  ;;  %v4133_v31 = vadd.f32 %v10689_v50, %v4094_v14  ;;  %v4096_v34 = vpop.f32.mrb[91].mxu1  ;;  %9297 = vmatpush1.bf16.msra.mxu1 %v9296_v24  ;;  %v10964_v24 = vld [vmem:[%s11892_s8 + $0x10] sm:$0xff] }
 0xa41   : > { %v4148_v4 = vmax.f32 %v4132_v25, 0.0  ;;  %v4134_v36 = vadd.f32 %v10689_v50, %v4096_v34  ;;  %v10953_v50 = vld [vmem:[%s11892_s8 + $0x8] sm:$0xff] }
 0xa42   : > { %v9292_v54 = vpack.c.bf16 %v4147_v2, %v4143_v43  ;;  %v4149_v59 = vmax.f32 %v4133_v31, 0.0 }
 0xa43   : > { %v9290_v30 = vpack.c.bf16 %v4148_v4, %v4144_v27  ;;  %v4150_v3 = vmax.f32 %v4134_v36, 0.0 }
 0xa44   : > { %v9300_v7 = vpack.c.bf16 %v4149_v59, %v4145_v28 }
 0xa45   : > { %v9298_v46 = vpack.c.bf16 %v4150_v3, %v4146_v22  ;;  %9291 = vmatprep.subr.bf16.mxu0 %v9290_v30 }
 0xa46   : > { %9293 = vmatpush1.bf16.msra.mxu0 %v9292_v54 }
 0xa47   : > { %9299 = vmatprep.subr.bf16.mxu1 %v9298_v46 }
 0xa48   : > { %9301 = vmatpush1.bf16.msra.mxu1 %v9300_v7 }
 0xa49   : > { %8936 = vmatmul.mubr.msk.f32.vlgmr.msra.gmra.mrb[92].mxu0 %vm732_vm2, %v10945_v40 }
 0xa4a   : > { %4261 = vmatprep.mubr.f32.mxu0 %v11985_v29 }
 0xa4b   : > { %8940 = vmatmul.mubr.msk.f32.vlgmr.msra.gmra.mrb[92].mxu1 %vm732_vm2, %v10945_v40 }
 0xa4c   : > { %4350 = vmatprep.mubr.f32.mxu1 %v11985_v29 }
 0xa4d   : > { %8937 = vmatmul.mubr.msk.f32.gmra.mrb[94].mxu0 %vm732_vm2, %v10953_v50 }
 0xa4e   : > { %4267 = vmatprep.mubr.f32.mxu0 %v11985_v29 }
 0xa4f   : > { %8941 = vmatmul.mubr.msk.f32.gmra.mrb[94].mxu1 %vm732_vm2, %v10953_v50 }
 0xa50   : > { %4356 = vmatprep.mubr.f32.mxu1 %v11985_v29 }
 0xa51   : > { %8938 = vmatmul.mubr.msk.f32.gmra.mrb[96].mxu0 %vm732_vm2, %v10964_v24 }
 0xa52   : > { %4273 = vmatprep.mubr.f32.mxu0 %v11985_v29 }
 0xa53   : > { %8942 = vmatmul.mubr.msk.f32.gmra.mrb[96].mxu1 %vm732_vm2, %v10964_v24 }
 0xa54   : > { %4362 = vmatprep.mubr.f32.mxu1 %v11985_v29 }
 0xa55   : > { %8939 = vmatmul.mubr.msk.f32.gmra.mrb[98].mxu0 %vm732_vm2, %v10975_v1 }
 0xa56   : > { %4463 = vmatprep.mubr.f32.mxu0 %v11985_v29 }
 0xa57   : > { %8943 = vmatmul.mubr.msk.f32.gmra.mrb[98].mxu1 %vm732_vm2, %v10975_v1 }
 0xa58   : > { %4534 = vmatprep.mubr.f32.mxu1 %v11985_v29 }
 0xb1c   : > { %v4257_v57 = vpop.f32.mrb[92].mxu0 }
 0xb1d   : > { %v4259_v62 = vpop.f32.mrb[93].mxu0  ;;  %v4258_v41 = vadd.f32 %v4257_v57, %v12006_v9 }
 0xb1e   : > { %v4346_v8 = vpop.f32.mrb[92].mxu1  ;;  %v4260_v26 = vadd.f32 %v4259_v62, %v12006_v9 }
 0xb1f   : > { %v4348_v13 = vpop.f32.mrb[93].mxu1  ;;  %v4347_v14 = vadd.f32 %v4346_v8, %v12006_v9  ;;  %v4369_v4 = vmax.f32 %v4258_v41, 0.0  ;;  %v4575_v8 = vld [vmem:[%s9906_s29 + $0x18] sm:$0xff] }
 0xb20   : > { %v4263_v25 = vpop.f32.mrb[94].mxu0  ;;  %v4349_v31 = vadd.f32 %v4348_v13, %v12006_v9  ;;  %v4370_v59 = vmax.f32 %v4260_v26, 0.0  ;;  %v12007_v41 = vld [vmem:[#allocation11_spill] sm:$0xff] }
 0xb21   : > { %v4264_v43 = vadd.f32 %v4263_v25, %v10691_v44  ;;  %v4265_v2 = vpop.f32.mrb[95].mxu0  ;;  %v4371_v7 = vmax.f32 %v4347_v14, 0.0 }
 0xb22   : > { %v4266_v34 = vadd.f32 %v4265_v2, %v10691_v44  ;;  %v4352_v27 = vpop.f32.mrb[94].mxu1  ;;  %v4372_v25 = vmax.f32 %v4349_v31, 0.0 }
 0xb23   : > { %v4373_v36 = vmax.f32 %v4264_v43, 0.0  ;;  %v4353_v28 = vadd.f32 %v4352_v27, %v10691_v44  ;;  %v4354_v54 = vpop.f32.mrb[95].mxu1 }
 0xb24   : > { %v4374_v22 = vmax.f32 %v4266_v34, 0.0  ;;  %v4355_v30 = vadd.f32 %v4354_v54, %v10691_v44  ;;  %v4269_v3 = vpop.f32.mrb[96].mxu0  ;;  %v4605_v44 = vcombine.high %v4575_v8, %v4575_v8 }
 0xb25   : > { %v9304_v46 = vpack.c.bf16 %v4373_v36, %v4369_v4  ;;  %v4375_v57 = vmax.f32 %v4353_v28, 0.0  ;;  %v4271_v62 = vpop.f32.mrb[97].mxu0  ;;  %v4270_v43 = vadd.f32 %v4269_v3, %v12007_v41 }
 0xb26   : > { %v9302_v9 = vpack.c.bf16 %v4374_v22, %v4370_v59  ;;  %v4376_v13 = vmax.f32 %v4355_v30, 0.0  ;;  %v4358_v2 = vpop.f32.mrb[96].mxu1  ;;  %v4272_v26 = vadd.f32 %v4271_v62, %v12007_v41  ;;  %v11002_v59 = vrot.slane %v4575_v8, %v9891_v12 }
 0xb27   : > { %v9312_v42 = vpack.c.bf16 %v4375_v57, %v4371_v7  ;;  %v4360_v53 = vpop.f32.mrb[97].mxu1  ;;  %v4359_v14 = vadd.f32 %v4358_v2, %v12007_v41  ;;  %v4377_v22 = vmax.f32 %v4270_v43, 0.0 }
 0xb28   : > { %v9310_v27 = vpack.c.bf16 %v4376_v13, %v4372_v25  ;;  %v4275_v34 = vpop.f32.mrb[98].mxu0  ;;  %9303 = vmatprep.subr.bf16.mxu0 %v9302_v9  ;;  %v4361_v31 = vadd.f32 %v4360_v53, %v12007_v41  ;;  %v4378_v57 = vmax.f32 %v4272_v26, 0.0  ;;  %v11011_v43 = vcombine.high %v11002_v59, %v11002_v59  ;;  %v11031_v26 = vld [vmem:[%s11885_s1] sm:$0xff] }
 0xb29   : > { %v4276_v4 = vadd.f32 %v4275_v34, %v10693_v48  ;;  %v4277_v36 = vpop.f32.mrb[99].mxu0  ;;  %9305 = vmatpush1.bf16.msra.mxu0 %v9304_v46  ;;  %v11007_v46 = vrot.slane %v4605_v44, %v9891_v12  ;;  %v4379_v53 = vmax.f32 %v4359_v14, 0.0  ;;  %v11043_v44 = vld [vmem:[%s11885_s1 + $0x8] sm:$0xff]  ;;  %v11054_v14 = vld [vmem:[%s11885_s1 + $0x10] sm:$0xff] }
 0xb2a   : > { %v4278_v28 = vadd.f32 %v4277_v36, %v10693_v48  ;;  %v4364_v54 = vpop.f32.mrb[98].mxu1  ;;  %9311 = vmatprep.subr.bf16.mxu1 %v9310_v27  ;;  %v4380_v2 = vmax.f32 %v4361_v31, 0.0  ;;  %v4390_v36 = vpop.permute.xlu0 %4389 }
 0xb2b   : > { %v4381_v30 = vmax.f32 %v4276_v4, 0.0  ;;  %v4365_v3 = vadd.f32 %v4364_v54, %v10693_v48  ;;  %v4366_v7 = vpop.f32.mrb[99].mxu1  ;;  %9313 = vmatpush1.bf16.msra.mxu1 %v9312_v42  ;;  %v11015_v42 = vcombine.high %v11007_v46, %v11007_v46  ;;  %v11065_v4 = vld [vmem:[%s11885_s1 + $0x18] sm:$0xff]  ;;  %v4395_v31 = vrot.slane %v4390_v36, %v10456_v51 }
 0xb2c   : > { %v4382_v62 = vmax.f32 %v4278_v28, 0.0  ;;  %v4367_v25 = vadd.f32 %v4366_v7, %v10693_v48  ;;  %v4385_v48 = vld [vmem:[%s11894_s10] sm:$0x1] }
 0xb2d   : > { %v9308_v9 = vpack.c.bf16 %v4381_v30, %v4377_v22  ;;  %v4383_v13 = vmax.f32 %v4365_v3, 0.0 }
 0xb2e   : > { %v9306_v41 = vpack.c.bf16 %v4382_v62, %v4378_v57  ;;  %v4384_v8 = vmax.f32 %v4367_v25, 0.0 }
 0xb2f   : > { %v9316_v27 = vpack.c.bf16 %v4383_v13, %v4379_v53 }
 0xb30   : > { %v9314_v34 = vpack.c.bf16 %v4384_v8, %v4380_v2  ;;  %9307 = vmatprep.subr.bf16.mxu0 %v9306_v41 }
 0xb31   : > { %9309 = vmatpush1.bf16.msra.mxu0 %v9308_v9 }
 0xb32   : > { %9315 = vmatprep.subr.bf16.mxu1 %v9314_v34  ;;  %8946 = vmatprep.subr.msk.mxu0 %vm501_vm0, %v11011_v43  ;;  %v12008_v34 = vld [vmem:[#allocation12_spill] sm:$0xff] }
 0xb33   : > { %9317 = vmatpush1.bf16.msra.mxu1 %v9316_v27 }
 0xb34   : > { %8944 = vmatmul.mubr.msk.f32.vlgmr.msra.gmra.mrb[100].mxu0 %vm732_vm2, %v4385_v48  ;;  %8952 = vmatprep.subr.msk.mxu1 %vm501_vm0, %v11015_v42 }
 0xb35   : > { %8947 = vmatpush1.msk.msra.mxu0 %vm501_vm0, %v11002_v59  ;;  %4706 = vmatprep.mubr.f32.mxu0 %v11985_v29 }
 0xb36   : > { %8945 = vmatmul.mubr.msk.f32.vlgmr.msra.gmra.mrb[100].mxu1 %vm732_vm2, %v4385_v48 }
 0xb37   : > { %8953 = vmatpush1.msk.msra.mxu1 %vm501_vm0, %v11007_v46  ;;  %4795 = vmatprep.mubr.f32.mxu1 %v11985_v29 }
 0xb38   : > { %8948 = vmatmul.mubr.msk.f32.vlgmr.msra.gmra.mrb[102].mxu0 %vm488_vm1, %v11031_v26 }
 0xb39   : > { %4712 = vmatprep.mubr.f32.mxu0 %v11985_v29 }
 0xb3a   : > { %8954 = vmatmul.mubr.msk.f32.vlgmr.msra.gmra.mrb[102].mxu1 %vm488_vm1, %v11031_v26 }
 0xb3b   : > { %4801 = vmatprep.mubr.f32.mxu1 %v11985_v29 }
 0xb3c   : > { %8949 = vmatmul.mubr.msk.f32.gmra.mrb[104].mxu0 %vm488_vm1, %v11043_v44 }
 0xb3d   : > { %4718 = vmatprep.mubr.f32.mxu0 %v11985_v29 }
 0xb3e   : > { %8955 = vmatmul.mubr.msk.f32.gmra.mrb[104].mxu1 %vm488_vm1, %v11043_v44 }
 0xb3f   : > { %4807 = vmatprep.mubr.f32.mxu1 %v11985_v29 }
 0xb40   : > { %8950 = vmatmul.mubr.msk.f32.gmra.mrb[106].mxu0 %vm488_vm1, %v11054_v14 }
 0xb41   : > { %4724 = vmatprep.mubr.f32.mxu0 %v11985_v29 }
 0xb42   : > { %8956 = vmatmul.mubr.msk.f32.gmra.mrb[106].mxu1 %vm488_vm1, %v11054_v14 }
 0xb43   : > { %4813 = vmatprep.mubr.f32.mxu1 %v11985_v29 }
 0xb44   : > { %8951 = vmatmul.mubr.msk.f32.gmra.mrb[108].mxu0 %vm488_vm1, %v11065_v4 }
 0xb45   : > { %4940 = vmatprep.mubr.f32.mxu0 %v11985_v29 }
 0xb46   : > { %8957 = vmatmul.mubr.msk.f32.gmra.mrb[108].mxu1 %vm488_vm1, %v11065_v4 }
 0xb47   : > { %5029 = vmatprep.mubr.f32.mxu1 %v11985_v29 }
 0xc07   : > { %v4465_v28 = vpop.f32.mrb[100].mxu0 }
 0xc08   : > { %v4466_v54 = vadd.f32 %v4465_v28, %v4395_v31  ;;  %v4467_v22 = vpop.f32.mrb[101].mxu0 }
 0xc09   : > { %v4468_v30 = vadd.f32 %v4467_v22, %v4395_v31  ;;  %v4536_v3 = vpop.f32.mrb[100].mxu1 }
 0xc0a   : > { %v4541_v7 = vmax.f32 %v4466_v54, 0.0  ;;  %v4537_v57 = vadd.f32 %v4536_v3, %v4395_v31  ;;  %v4538_v62 = vpop.f32.mrb[101].mxu1 }
 0xc0b   : > { %v4542_v25 = vmax.f32 %v4468_v30, 0.0  ;;  %v4539_v53 = vadd.f32 %v4538_v62, %v4395_v31  ;;  %v4708_v9 = vpop.f32.mrb[102].mxu0 }
 0xc0c   : > { %v4543_v13 = vmax.f32 %v4537_v57, 0.0  ;;  %v4710_v2 = vpop.f32.mrb[103].mxu0  ;;  %v4709_v48 = vadd.f32 %v4708_v9, %v12008_v34 }
 0xc0d   : > { %v4549_v41 = vcombine.low %v4541_v7, %v4542_v25  ;;  %v4544_v8 = vmax.f32 %v4539_v53, 0.0  ;;  %v4797_v27 = vpop.f32.mrb[102].mxu1  ;;  %v4711_v28 = vadd.f32 %v4710_v2, %v12008_v34 }
 0xc0e   : > { %v4799_v5 = vpop.f32.mrb[103].mxu1  ;;  %v4798_v22 = vadd.f32 %v4797_v27, %v12008_v34  ;;  %v4820_v25 = vmax.f32 %v4709_v48, 0.0 }
 0xc0f   : > { %v4550_v36 = vcombine.low %v4543_v13, %v4544_v8  ;;  %v4714_v45 = vpop.f32.mrb[104].mxu0  ;;  %v4557_v31 = vrot.slane %v4549_v41, %v10460_v35  ;;  %v4800_v7 = vadd.f32 %v4799_v5, %v12008_v34  ;;  %v4821_v8 = vmax.f32 %v4711_v28, 0.0 }
 0xc10   : > { %v4715_v54 = vadd.f32 %v4714_v45, %v10695_v18  ;;  %v4716_v3 = vpop.f32.mrb[105].mxu0  ;;  %v4822_v41 = vmax.f32 %v4798_v22, 0.0 }
 0xc11   : > { %v4564_v30 = vrot.slane %v4550_v36, %v10460_v35  ;;  %v4717_v57 = vadd.f32 %v4716_v3, %v10695_v18  ;;  %v4803_v62 = vpop.f32.mrb[104].mxu1  ;;  %v4823_v34 = vmax.f32 %v4800_v7, 0.0 }
 0xc12   : > { %v4824_v53 = vmax.f32 %v4715_v54, 0.0  ;;  %v4804_v9 = vadd.f32 %v4803_v62, %v10695_v18  ;;  %v4805_v13 = vpop.f32.mrb[105].mxu1  ;;  %v12009_v62 = vld [vmem:[#allocation13_spill] sm:$0xff] }
 0xc13   : > { %v4565_v2 = vcombine.low %v4557_v31, %v4564_v30  ;;  %v4825_v27 = vmax.f32 %v4717_v57, 0.0  ;;  %v4806_v45 = vadd.f32 %v4805_v13, %v10695_v18  ;;  %v4720_v10 = vpop.f32.mrb[106].mxu0 }
 0xc14   : > { %v9320_v17 = vpack.c.bf16 %v4824_v53, %v4820_v25  ;;  %v4826_v36 = vmax.f32 %v4804_v9, 0.0  ;;  %v4722_v15 = vpop.f32.mrb[107].mxu0  ;;  %v4721_v55 = vadd.f32 %v4720_v10, %v12009_v62 }
 0xc15   : > { %v4572_v5 = vrot.slane %v4565_v2, %v10460_v35  ;;  %v9318_v3 = vpack.c.bf16 %v4825_v27, %v4821_v8  ;;  %v4827_v48 = vmax.f32 %v4806_v45, 0.0  ;;  %v4809_v54 = vpop.f32.mrb[106].mxu1  ;;  %v4723_v18 = vadd.f32 %v4722_v15, %v12009_v62 }
 0xc16   : > { %v9328_v60 = vpack.c.bf16 %v4826_v36, %v4822_v41  ;;  %v4811_v31 = vpop.f32.mrb[107].mxu1  ;;  %v4810_v30 = vadd.f32 %v4809_v54, %v12009_v62  ;;  %v4828_v9 = vmax.f32 %v4721_v55, 0.0 }
 0xc17   : > { %4574 = vst.msk [vmem:[%s10480_s16 + $0x8] sm:$0xf] %vm10473_vm7, %v4572_v5  ;;  %v9326_v28 = vpack.c.bf16 %v4827_v48, %v4823_v34  ;;  %v4726_v22 = vpop.f32.mrb[108].mxu0  ;;  %9319 = vmatprep.subr.bf16.mxu0 %v9318_v3  ;;  %v4812_v25 = vadd.f32 %v4811_v31, %v12009_v62  ;;  %v4829_v15 = vmax.f32 %v4723_v18, 0.0 }
 0xc18   : > { %v4727_v57 = vadd.f32 %v4726_v22, %v10697_v21  ;;  %v4728_v7 = vpop.f32.mrb[109].mxu0  ;;  %9321 = vmatpush1.bf16.msra.mxu0 %v9320_v17  ;;  %v4830_v41 = vmax.f32 %v4810_v30, 0.0 }
 0xc19   : > { %v4729_v53 = vadd.f32 %v4728_v7, %v10697_v21  ;;  %v4815_v10 = vpop.f32.mrb[108].mxu1  ;;  %9327 = vmatprep.subr.bf16.mxu1 %v9326_v28  ;;  %v4831_v17 = vmax.f32 %v4812_v25, 0.0 }
 0xc1a   : > { %v4832_v13 = vmax.f32 %v4727_v57, 0.0  ;;  %v4816_v2 = vadd.f32 %v4815_v10, %v10697_v21  ;;  %v4817_v8 = vpop.f32.mrb[109].mxu1  ;;  %9329 = vmatpush1.bf16.msra.mxu1 %v9328_v60 }
 0xc1b   : > { %v4833_v27 = vmax.f32 %v4729_v53, 0.0  ;;  %v4818_v45 = vadd.f32 %v4817_v8, %v10697_v21  ;;  %v4839_v21 = vld [vmem:[%s11887_s3 + $0x18] sm:$0x3f] }
 0xc1c   : > { %v9324_v36 = vpack.c.bf16 %v4832_v13, %v4828_v9  ;;  %v4834_v5 = vmax.f32 %v4816_v2, 0.0 }
 0xc1d   : > { %v9322_v34 = vpack.c.bf16 %v4833_v27, %v4829_v15  ;;  %v4835_v3 = vmax.f32 %v4818_v45, 0.0 }
 0xc1e   : > { %v9332_v48 = vpack.c.bf16 %v4834_v5, %v4830_v41  ;;  %v12011_v41 = vld [vmem:[#allocation15_spill] sm:$0xff] }
 0xc1f   : > { %v9330_v54 = vpack.c.bf16 %v4835_v3, %v4831_v17  ;;  %9323 = vmatprep.subr.bf16.mxu0 %v9322_v34 }
 0xc20   : > { %9325 = vmatpush1.bf16.msra.mxu0 %v9324_v36 }
 0xc21   : > { %9331 = vmatprep.subr.bf16.mxu1 %v9330_v54  ;;  %8966 = vmatprep.subr.msk.mxu0 %vm501_vm0, %v11011_v43 }
 0xc22   : > { %9333 = vmatpush1.bf16.msra.mxu1 %v9332_v48 }
 0xc23   : > { %8958 = vmatmul.mubr.msk.f32.vlgmr.msra.gmra.mrb[110].mxu0 %vm732_vm2, %v10769_v0  ;;  %8972 = vmatprep.subr.msk.mxu1 %vm501_vm0, %v11015_v42 }
 0xc24   : > { %4946 = vmatprep.mubr.f32.mxu0 %v11985_v29  ;;  %8967 = vmatpush1.msk.msra.mxu0 %vm501_vm0, %v11002_v59 }
 0xc25   : > { %8962 = vmatmul.mubr.msk.f32.vlgmr.msra.gmra.mrb[110].mxu1 %vm732_vm2, %v10769_v0 }
 0xc26   : > { %5035 = vmatprep.mubr.f32.mxu1 %v11985_v29  ;;  %8973 = vmatpush1.msk.msra.mxu1 %vm501_vm0, %v11007_v46 }
 0xc27   : > { %8959 = vmatmul.mubr.msk.f32.gmra.mrb[112].mxu0 %vm732_vm2, %v10781_v6 }
 0xc28   : > { %4952 = vmatprep.mubr.f32.mxu0 %v11985_v29 }
 0xc29   : > { %8963 = vmatmul.mubr.msk.f32.gmra.mrb[112].mxu1 %vm732_vm2, %v10781_v6  ;;  %v12010_v6 = vld [vmem:[#allocation14_spill] sm:$0xff] }
 0xc2a   : > { %5041 = vmatprep.mubr.f32.mxu1 %v11985_v29 }
 0xc2b   : > { %8960 = vmatmul.mubr.msk.f32.gmra.mrb[114].mxu0 %vm732_vm2, %v10796_v33 }
 0xc2c   : > { %4958 = vmatprep.mubr.f32.mxu0 %v11985_v29 }
 0xc2d   : > { %8964 = vmatmul.mubr.msk.f32.gmra.mrb[114].mxu1 %vm732_vm2, %v10796_v33 }
 0xc2e   : > { %5047 = vmatprep.mubr.f32.mxu1 %v11985_v29 }
 0xc2f   : > { %8961 = vmatmul.mubr.msk.f32.gmra.mrb[116].mxu0 %vm732_vm2, %v4839_v21 }
 0xc30   : > { %5158 = vmatprep.mubr.f32.mxu0 %v11985_v29 }
 0xc31   : > { %8965 = vmatmul.mubr.msk.f32.gmra.mrb[116].mxu1 %vm732_vm2, %v4839_v21 }
 0xc32   : > { %5247 = vmatprep.mubr.f32.mxu1 %v11985_v29 }
 0xc33   : > { %8968 = vmatmul.mubr.msk.f32.vlgmr.msra.gmra.mrb[118].mxu0 %vm488_vm1, %v10817_v61 }
 0xc34   : > { %5164 = vmatprep.mubr.f32.mxu0 %v11985_v29 }
 0xc35   : > { %8974 = vmatmul.mubr.msk.f32.vlgmr.msra.gmra.mrb[118].mxu1 %vm488_vm1, %v10817_v61 }
 0xc36   : > { %5253 = vmatprep.mubr.f32.mxu1 %v11985_v29 }
 0xc37   : > { %8969 = vmatmul.mubr.msk.f32.gmra.mrb[120].mxu0 %vm488_vm1, %v10828_v49 }
 0xc38   : > { %5170 = vmatprep.mubr.f32.mxu0 %v11985_v29 }
 0xc39   : > { %8975 = vmatmul.mubr.msk.f32.gmra.mrb[120].mxu1 %vm488_vm1, %v10828_v49 }
 0xc3a   : > { %5259 = vmatprep.mubr.f32.mxu1 %v11985_v29 }
 0xc3b   : > { %8970 = vmatmul.mubr.msk.f32.gmra.mrb[122].mxu0 %vm488_vm1, %v10839_v58 }
 0xc3c   : > { %5176 = vmatprep.mubr.f32.mxu0 %v11985_v29 }
 0xc3d   : > { %8976 = vmatmul.mubr.msk.f32.gmra.mrb[122].mxu1 %vm488_vm1, %v10839_v58 }
 0xc3e   : > { %5265 = vmatprep.mubr.f32.mxu1 %v11985_v29 }
 0xc3f   : > { %8971 = vmatmul.mubr.msk.f32.gmra.mrb[124].mxu0 %vm488_vm1, %v10850_v20 }
 0xc40   : > { %5360 = vmatprep.mubr.f32.mxu0 %v11985_v29 }
 0xc41   : > { %8977 = vmatmul.mubr.msk.f32.gmra.mrb[124].mxu1 %vm488_vm1, %v10850_v20 }
 0xc42   : > { %5449 = vmatprep.mubr.f32.mxu1 %v11985_v29 }
 0xcf6   : > { %v4942_v55 = vpop.f32.mrb[110].mxu0 }
 0xcf7   : > { %v4944_v60 = vpop.f32.mrb[111].mxu0  ;;  %v4943_v33 = vadd.f32 %v4942_v55, %v12010_v6 }
 0xcf8   : > { %v5031_v0 = vpop.f32.mrb[110].mxu1  ;;  %v4945_v49 = vadd.f32 %v4944_v60, %v12010_v6 }
 0xcf9   : > { %v5033_v61 = vpop.f32.mrb[111].mxu1  ;;  %v5032_v59 = vadd.f32 %v5031_v0, %v12010_v6  ;;  %v5054_v31 = vmax.f32 %v4943_v33, 0.0 }
 0xcfa   : > { %v4948_v58 = vpop.f32.mrb[112].mxu0  ;;  %v5034_v42 = vadd.f32 %v5033_v61, %v12010_v6  ;;  %v5055_v30 = vmax.f32 %v4945_v49, 0.0 }
 0xcfb   : > { %v4949_v46 = vadd.f32 %v4948_v58, %v10699_v11  ;;  %v4950_v43 = vpop.f32.mrb[113].mxu0  ;;  %v5056_v53 = vmax.f32 %v5032_v59, 0.0 }
 0xcfc   : > { %v4951_v20 = vadd.f32 %v4950_v43, %v10699_v11  ;;  %v5037_v62 = vpop.f32.mrb[112].mxu1  ;;  %v5057_v2 = vmax.f32 %v5034_v42, 0.0 }
 0xcfd   : > { %v5058_v28 = vmax.f32 %v4949_v46, 0.0  ;;  %v5038_v18 = vadd.f32 %v5037_v62, %v10699_v11  ;;  %v5039_v22 = vpop.f32.mrb[113].mxu1 }
 0xcfe   : > { %v5059_v57 = vmax.f32 %v4951_v20, 0.0  ;;  %v5040_v7 = vadd.f32 %v5039_v22, %v10699_v11  ;;  %v4954_v25 = vpop.f32.mrb[114].mxu0  ;;  %v12012_v22 = vld [vmem:[#allocation16_spill] sm:$0xff] }
 0xcff   : > { %v9336_v10 = vpack.c.bf16 %v5058_v28, %v5054_v31  ;;  %v5060_v9 = vmax.f32 %v5038_v18, 0.0  ;;  %v4956_v13 = vpop.f32.mrb[115].mxu0  ;;  %v4955_v36 = vadd.f32 %v4954_v25, %v12011_v41 }
 0xd00   : > { %v9334_v8 = vpack.c.bf16 %v5059_v57, %v5055_v30  ;;  %v5061_v15 = vmax.f32 %v5040_v7, 0.0  ;;  %v5043_v27 = vpop.f32.mrb[114].mxu1  ;;  %v4957_v34 = vadd.f32 %v4956_v13, %v12011_v41 }
 0xd01   : > { %v9346_v45 = vpack.c.bf16 %v5060_v9, %v5056_v53  ;;  %v5045_v5 = vpop.f32.mrb[115].mxu1  ;;  %v5044_v11 = vadd.f32 %v5043_v27, %v12011_v41  ;;  %v5062_v0 = vmax.f32 %v4955_v36, 0.0 }
 0xd02   : > { %v9344_v17 = vpack.c.bf16 %v5061_v15, %v5057_v2  ;;  %v4960_v3 = vpop.f32.mrb[116].mxu0  ;;  %9335 = vmatprep.subr.bf16.mxu0 %v9334_v8  ;;  %v5046_v21 = vadd.f32 %v5045_v5, %v12011_v41  ;;  %v5063_v49 = vmax.f32 %v4957_v34, 0.0 }
 0xd03   : > { %v4961_v48 = vadd.f32 %v4960_v3, %v10701_v23  ;;  %v4962_v54 = vpop.f32.mrb[117].mxu0  ;;  %9337 = vmatpush1.bf16.msra.mxu0 %v9336_v10  ;;  %v5064_v46 = vmax.f32 %v5044_v11, 0.0 }
 0xd04   : > { %v4963_v55 = vadd.f32 %v4962_v54, %v10701_v23  ;;  %v5049_v60 = vpop.f32.mrb[116].mxu1  ;;  %9345 = vmatprep.subr.bf16.mxu1 %v9344_v17  ;;  %v5065_v20 = vmax.f32 %v5046_v21, 0.0 }
 0xd05   : > { %v5066_v6 = vmax.f32 %v4961_v48, 0.0  ;;  %v5050_v33 = vadd.f32 %v5049_v60, %v10701_v23  ;;  %v5051_v61 = vpop.f32.mrb[117].mxu1  ;;  %9347 = vmatpush1.bf16.msra.mxu1 %v9346_v45 }
 0xd06   : > { %v5067_v58 = vmax.f32 %v4963_v55, 0.0  ;;  %v5052_v59 = vadd.f32 %v5051_v61, %v10701_v23 }
 0xd07   : > { %v9341_v43 = vpack.c.bf16 %v5066_v6, %v5062_v0  ;;  %v5068_v42 = vmax.f32 %v5050_v33, 0.0  ;;  %v12013_v0 = vld [vmem:[#allocation17_spill] sm:$0xff] }
 0xd08   : > { %v9338_v62 = vpack.c.bf16 %v5067_v58, %v5063_v49  ;;  %v5069_v31 = vmax.f32 %v5052_v59, 0.0 }
 0xd09   : > { %v9351_v28 = vpack.c.bf16 %v5068_v42, %v5064_v46 }
 0xd0a   : > { %v9348_v18 = vpack.c.bf16 %v5069_v31, %v5065_v20  ;;  %9340 = vmatprep.subr.msk.bf16.mxu0 %vm10200_vm5, %v9338_v62 }
 0xd0b   : > { %9343 = vmatpush1.bf16.msk.msra.mxu0 %vm10200_vm5, %v9341_v43 }
 0xd0c   : > { %9350 = vmatprep.subr.msk.bf16.mxu1 %vm10200_vm5, %v9348_v18 }
 0xd0d   : > { %9353 = vmatpush1.bf16.msk.msra.mxu1 %vm10200_vm5, %v9351_v28 }
 0xd0e   : > { %8980 = vmatmul.mubr.msk.f32.vlgmr.msra.gmra.mrb[118].mxu0 %vm1141_vm6, %v10881_v32 }
 0xd0f   : > { %5366 = vmatprep.mubr.f32.mxu0 %v11985_v29 }
 0xd10   : > { %8986 = vmatmul.mubr.msk.f32.vlgmr.msra.gmra.mrb[118].mxu1 %vm1141_vm6, %v10881_v32 }
 0xd11   : > { %5455 = vmatprep.mubr.f32.mxu1 %v11985_v29 }
 0xd12   : > { %8981 = vmatmul.mubr.msk.f32.gmra.mrb[120].mxu0 %vm1141_vm6, %v10893_v39 }
 0xd13   : > { %5372 = vmatprep.mubr.f32.mxu0 %v11985_v29 }
 0xd14   : > { %8987 = vmatmul.mubr.msk.f32.gmra.mrb[120].mxu1 %vm1141_vm6, %v10893_v39 }
 0xd15   : > { %5461 = vmatprep.mubr.f32.mxu1 %v11985_v29 }
 0xd16   : > { %8982 = vmatmul.mubr.msk.f32.gmra.mrb[122].mxu0 %vm1141_vm6, %v10904_v16 }
 0xd17   : > { %5378 = vmatprep.mubr.f32.mxu0 %v11985_v29 }
 0xd18   : > { %8988 = vmatmul.mubr.msk.f32.gmra.mrb[122].mxu1 %vm1141_vm6, %v10904_v16 }
 0xd19   : > { %5467 = vmatprep.mubr.f32.mxu1 %v11985_v29 }
 0xd1a   : > { %8983 = vmatmul.mubr.msk.f32.gmra.mrb[124].mxu0 %vm1141_vm6, %v10915_v63 }
 0xd1b   : > { %5630 = vmatprep.mubr.f32.mxu0 %v11985_v29 }
 0xd1c   : > { %8989 = vmatmul.mubr.msk.f32.gmra.mrb[124].mxu1 %vm1141_vm6, %v10915_v63 }
 0xd1d   : > { %5719 = vmatprep.mubr.f32.mxu1 %v11985_v29 }
 0xde1   : > { %v5362_v23 = vpop.f32.mrb[118].mxu0 }
 0xde2   : > { %v5364_v32 = vpop.f32.mrb[119].mxu0  ;;  %v5494_v30 = vadd.f32 %v12012_v22, %v5362_v23 }
 0xde3   : > { %v5451_v39 = vpop.f32.mrb[118].mxu1  ;;  %v5495_v16 = vadd.f32 %v12012_v22, %v5364_v32 }
 0xde4   : > { %v5453_v57 = vpop.f32.mrb[119].mxu1  ;;  %v5496_v25 = vadd.f32 %v12012_v22, %v5451_v39  ;;  %v5510_v2 = vmax.f32 %v5494_v30, 0.0 }
 0xde5   : > { %v5368_v7 = vpop.f32.mrb[120].mxu0  ;;  %v5497_v9 = vadd.f32 %v12012_v22, %v5453_v57  ;;  %v5511_v45 = vmax.f32 %v5495_v16, 0.0 }
 0xde6   : > { %v5498_v53 = vadd.f32 %v10703_v37, %v5368_v7  ;;  %v5370_v10 = vpop.f32.mrb[121].mxu0  ;;  %v5512_v17 = vmax.f32 %v5496_v25, 0.0 }
 0xde7   : > { %v5499_v63 = vadd.f32 %v10703_v37, %v5370_v10  ;;  %v5457_v13 = vpop.f32.mrb[120].mxu1  ;;  %v5513_v48 = vmax.f32 %v5497_v9, 0.0  ;;  %v12014_v9 = vld [vmem:[#allocation18_spill] sm:$0xff] }
 0xde8   : > { %v5514_v8 = vmax.f32 %v5498_v53, 0.0  ;;  %v5500_v15 = vadd.f32 %v10703_v37, %v5457_v13  ;;  %v5459_v27 = vpop.f32.mrb[121].mxu1 }
 0xde9   : > { %v5515_v41 = vmax.f32 %v5499_v63, 0.0  ;;  %v5501_v36 = vadd.f32 %v10703_v37, %v5459_v27  ;;  %v5374_v5 = vpop.f32.mrb[122].mxu0 }
 0xdea   : > { %v9356_v34 = vpack.c.bf16 %v5514_v8, %v5510_v2  ;;  %v5516_v3 = vmax.f32 %v5500_v15, 0.0  ;;  %v5376_v11 = vpop.f32.mrb[123].mxu0  ;;  %v5502_v6 = vadd.f32 %v12013_v0, %v5374_v5 }
 0xdeb   : > { %v9354_v54 = vpack.c.bf16 %v5515_v41, %v5511_v45  ;;  %v5517_v21 = vmax.f32 %v5501_v36, 0.0  ;;  %v5463_v55 = vpop.f32.mrb[122].mxu1  ;;  %v5503_v49 = vadd.f32 %v12013_v0, %v5376_v11 }
 0xdec   : > { %v9364_v60 = vpack.c.bf16 %v5516_v3, %v5512_v17  ;;  %v5465_v33 = vpop.f32.mrb[123].mxu1  ;;  %v5504_v37 = vadd.f32 %v12013_v0, %v5463_v55  ;;  %v5518_v62 = vmax.f32 %v5502_v6, 0.0  ;;  %v5950_v6 = vld [vmem:[%s9906_s29 + $0x20] sm:$0xff] }
 0xded   : > { %v9362_v61 = vpack.c.bf16 %v5517_v21, %v5513_v48  ;;  %v5380_v58 = vpop.f32.mrb[124].mxu0  ;;  %9355 = vmatprep.subr.bf16.mxu0 %v9354_v54  ;;  %v5505_v43 = vadd.f32 %v12013_v0, %v5465_v33  ;;  %v5519_v23 = vmax.f32 %v5503_v49, 0.0 }
 0xdee   : > { %v5506_v59 = vadd.f32 %v10705_v47, %v5380_v58  ;;  %v5382_v46 = vpop.f32.mrb[125].mxu0  ;;  %9357 = vmatpush1.bf16.msra.mxu0 %v9356_v34  ;;  %v5520_v22 = vmax.f32 %v5504_v37, 0.0 }
 0xdef   : > { %v5507_v42 = vadd.f32 %v10705_v47, %v5382_v46  ;;  %v5469_v20 = vpop.f32.mrb[124].mxu1  ;;  %9363 = vmatprep.subr.bf16.mxu1 %v9362_v61  ;;  %v5521_v16 = vmax.f32 %v5505_v43, 0.0 }
 0xdf0   : > { %v5522_v31 = vmax.f32 %v5506_v59, 0.0  ;;  %v5508_v28 = vadd.f32 %v10705_v47, %v5469_v20  ;;  %v5471_v18 = vpop.f32.mrb[125].mxu1  ;;  %9365 = vmatpush1.bf16.msra.mxu1 %v9364_v60  ;;  %v12015_v59 = vld [vmem:[#allocation19_spill] sm:$0xff] }
 0xdf1   : > { %v5523_v32 = vmax.f32 %v5507_v42, 0.0  ;;  %v5509_v39 = vadd.f32 %v10705_v47, %v5471_v18 }
 0xdf2   : > { %v9360_v30 = vpack.c.bf16 %v5522_v31, %v5518_v62  ;;  %v5524_v57 = vmax.f32 %v5508_v28, 0.0 }
 0xdf3   : > { %v9358_v7 = vpack.c.bf16 %v5523_v32, %v5519_v23  ;;  %v5525_v25 = vmax.f32 %v5509_v39, 0.0 }
 0xdf4   : > { %v9368_v53 = vpack.c.bf16 %v5524_v57, %v5520_v22  ;;  %v11260_v22 = vrot.slane %v5950_v6, %v9891_v12 }
 0xdf5   : > { %v9366_v10 = vpack.c.bf16 %v5525_v25, %v5521_v16  ;;  %9359 = vmatprep.subr.bf16.mxu0 %v9358_v7 }
 0xdf6   : > { %9361 = vmatpush1.bf16.msra.mxu0 %v9360_v30 }
 0xdf7   : > { %9367 = vmatprep.subr.bf16.mxu1 %v9366_v10 }
 0xdf8   : > { %9369 = vmatpush1.bf16.msra.mxu1 %v9368_v53 }
 0xdf9   : > { %8990 = vmatmul.mubr.msk.f32.vlgmr.msra.gmra.mrb[126].mxu0 %vm732_vm2, %v10945_v40 }
 0xdfa   : > { %5636 = vmatprep.mubr.f32.mxu0 %v11985_v29 }
 0xdfb   : > { %8994 = vmatmul.mubr.msk.f32.vlgmr.msra.gmra.mrb[126].mxu1 %vm732_vm2, %v10945_v40 }
 0xdfc   : > { %5725 = vmatprep.mubr.f32.mxu1 %v11985_v29 }
 0xdfd   : > { %8991 = vmatmul.mubr.msk.f32.gmra.mrb[128].mxu0 %vm732_vm2, %v10953_v50 }
 0xdfe   : > { %5642 = vmatprep.mubr.f32.mxu0 %v11985_v29 }
 0xdff   : > { %8995 = vmatmul.mubr.msk.f32.gmra.mrb[128].mxu1 %vm732_vm2, %v10953_v50 }
 0xe00   : > { %5731 = vmatprep.mubr.f32.mxu1 %v11985_v29 }
 0xe01   : > { %8992 = vmatmul.mubr.msk.f32.gmra.mrb[130].mxu0 %vm732_vm2, %v10964_v24 }
 0xe02   : > { %5648 = vmatprep.mubr.f32.mxu0 %v11985_v29 }
 0xe03   : > { %8996 = vmatmul.mubr.msk.f32.gmra.mrb[130].mxu1 %vm732_vm2, %v10964_v24 }
 0xe04   : > { %5737 = vmatprep.mubr.f32.mxu1 %v11985_v29 }
 0xe05   : > { %8993 = vmatmul.mubr.msk.f32.gmra.mrb[132].mxu0 %vm732_vm2, %v10975_v1 }
 0xe06   : > { %5838 = vmatprep.mubr.f32.mxu0 %v11985_v29 }
 0xe07   : > { %8997 = vmatmul.mubr.msk.f32.gmra.mrb[132].mxu1 %vm732_vm2, %v10975_v1 }
 0xe08   : > { %5909 = vmatprep.mubr.f32.mxu1 %v11985_v29 }
 0xecc   : > { %v5632_v47 = vpop.f32.mrb[126].mxu0 }
 0xecd   : > { %v5634_v40 = vpop.f32.mrb[127].mxu0  ;;  %v5633_v63 = vadd.f32 %v5632_v47, %v12014_v9 }
 0xece   : > { %v5721_v50 = vpop.f32.mrb[126].mxu1  ;;  %v5635_v24 = vadd.f32 %v5634_v40, %v12014_v9 }
 0xecf   : > { %v5723_v13 = vpop.f32.mrb[127].mxu1  ;;  %v5722_v8 = vadd.f32 %v5721_v50, %v12014_v9  ;;  %v5744_v36 = vmax.f32 %v5633_v63, 0.0 }
 0xed0   : > { %v5638_v2 = vpop.f32.mrb[128].mxu0  ;;  %v5724_v45 = vadd.f32 %v5723_v13, %v12014_v9  ;;  %v5745_v3 = vmax.f32 %v5635_v24, 0.0 }
 0xed1   : > { %v5639_v15 = vadd.f32 %v5638_v2, %v10707_v38  ;;  %v5640_v27 = vpop.f32.mrb[129].mxu0  ;;  %v5746_v21 = vmax.f32 %v5722_v8, 0.0  ;;  %v11269_v2 = vcombine.high %v11260_v22, %v11260_v22 }
 0xed2   : > { %v5641_v1 = vadd.f32 %v5640_v27, %v10707_v38  ;;  %v5727_v41 = vpop.f32.mrb[128].mxu1  ;;  %v5747_v33 = vmax.f32 %v5724_v45, 0.0 }
 0xed3   : > { %v5748_v5 = vmax.f32 %v5639_v15, 0.0  ;;  %v5728_v17 = vadd.f32 %v5727_v41, %v10707_v38  ;;  %v5729_v34 = vpop.f32.mrb[129].mxu1 }
 0xed4   : > { %v5749_v11 = vmax.f32 %v5641_v1, 0.0  ;;  %v5730_v48 = vadd.f32 %v5729_v34, %v10707_v38  ;;  %v5644_v54 = vpop.f32.mrb[130].mxu0  ;;  %v5980_v38 = vcombine.high %v5950_v6, %v5950_v6 }
 0xed5   : > { %v9372_v55 = vpack.c.bf16 %v5748_v5, %v5744_v36  ;;  %v5750_v60 = vmax.f32 %v5728_v17, 0.0  ;;  %v5646_v0 = vpop.f32.mrb[131].mxu0  ;;  %v5645_v46 = vadd.f32 %v5644_v54, %v12015_v59 }
 0xed6   : > { %v9370_v61 = vpack.c.bf16 %v5749_v11, %v5745_v3  ;;  %v5751_v49 = vmax.f32 %v5730_v48, 0.0  ;;  %v5733_v58 = vpop.f32.mrb[130].mxu1  ;;  %v5647_v20 = vadd.f32 %v5646_v0, %v12015_v59  ;;  %v11265_v47 = vrot.slane %v5980_v38, %v9891_v12  ;;  %v12016_v0 = vld [vmem:[#allocation20_spill] sm:$0xff] }
 0xed7   : > { %v9380_v37 = vpack.c.bf16 %v5750_v60, %v5746_v21  ;;  %v5735_v43 = vpop.f32.mrb[131].mxu1  ;;  %v5734_v31 = vadd.f32 %v5733_v58, %v12015_v59  ;;  %v5752_v30 = vmax.f32 %v5645_v46, 0.0 }
 0xed8   : > { %v9378_v42 = vpack.c.bf16 %v5751_v49, %v5747_v33  ;;  %v5650_v62 = vpop.f32.mrb[132].mxu0  ;;  %9371 = vmatprep.subr.bf16.mxu0 %v9370_v61  ;;  %v5736_v23 = vadd.f32 %v5735_v43, %v12015_v59  ;;  %v5753_v25 = vmax.f32 %v5647_v20, 0.0  ;;  %v11273_v27 = vcombine.high %v11265_v47, %v11265_v47  ;;  %v12017_v59 = vld [vmem:[#allocation36_spill] sm:$0xff] }
 0xed9   : > { %v5651_v28 = vadd.f32 %v5650_v62, %v10709_v52  ;;  %v5652_v18 = vpop.f32.mrb[133].mxu0  ;;  %9373 = vmatpush1.bf16.msra.mxu0 %v9372_v55  ;;  %v5754_v40 = vmax.f32 %v5734_v31, 0.0 }
 0xeda   : > { %v5653_v32 = vadd.f32 %v5652_v18, %v10709_v52  ;;  %v5739_v39 = vpop.f32.mrb[132].mxu1  ;;  %9379 = vmatprep.subr.bf16.mxu1 %v9378_v42  ;;  %v5755_v63 = vmax.f32 %v5736_v23, 0.0 }
 0xedb   : > { %v5756_v57 = vmax.f32 %v5651_v28, 0.0  ;;  %v5740_v16 = vadd.f32 %v5739_v39, %v10709_v52  ;;  %v5741_v7 = vpop.f32.mrb[133].mxu1  ;;  %9381 = vmatpush1.bf16.msra.mxu1 %v9380_v37 }
 0xedc   : > { %v5757_v53 = vmax.f32 %v5653_v32, 0.0  ;;  %v5742_v10 = vadd.f32 %v5741_v7, %v10709_v52  ;;  %v5760_v52 = vld [vmem:[%s11894_s10] sm:$0x1] }
 0xedd   : > { %v9376_v50 = vpack.c.bf16 %v5756_v57, %v5752_v30  ;;  %v5758_v9 = vmax.f32 %v5740_v16, 0.0 }
 0xede   : > { %v9374_v13 = vpack.c.bf16 %v5757_v53, %v5753_v25  ;;  %v5759_v24 = vmax.f32 %v5742_v10, 0.0 }
 0xedf   : > { %v9384_v8 = vpack.c.bf16 %v5758_v9, %v5754_v40 }
 0xee0   : > { %v9382_v15 = vpack.c.bf16 %v5759_v24, %v5755_v63  ;;  %9375 = vmatprep.subr.bf16.mxu0 %v9374_v13 }
 0xee1   : > { %9377 = vmatpush1.bf16.msra.mxu0 %v9376_v50 }
 0xee2   : > { %9383 = vmatprep.subr.bf16.mxu1 %v9382_v15  ;;  %9000 = vmatprep.subr.msk.mxu0 %vm501_vm0, %v11269_v2  ;;  %v12018_v15 = vld [vmem:[#allocation21_spill] sm:$0xff] }
 0xee3   : > { %9385 = vmatpush1.bf16.msra.mxu1 %v9384_v8 }
 0xee4   : > { %8998 = vmatmul.mubr.msk.f32.vlgmr.msra.gmra.mrb[134].mxu0 %vm732_vm2, %v5760_v52  ;;  %9006 = vmatprep.subr.msk.mxu1 %vm501_vm0, %v11273_v27 }
 0xee5   : > { %9001 = vmatpush1.msk.msra.mxu0 %vm501_vm0, %v11260_v22  ;;  %6081 = vmatprep.mubr.f32.mxu0 %v11985_v29 }
 0xee6   : > { %8999 = vmatmul.mubr.msk.f32.vlgmr.msra.gmra.mrb[134].mxu1 %vm732_vm2, %v5760_v52 }
 0xee7   : > { %9007 = vmatpush1.msk.msra.mxu1 %vm501_vm0, %v11265_v47  ;;  %6170 = vmatprep.mubr.f32.mxu1 %v11985_v29 }
 0xee8   : > { %9002 = vmatmul.mubr.msk.f32.vlgmr.msra.gmra.mrb[136].mxu0 %vm488_vm1, %v11031_v26 }
 0xee9   : > { %6087 = vmatprep.mubr.f32.mxu0 %v11985_v29 }
 0xeea   : > { %9008 = vmatmul.mubr.msk.f32.vlgmr.msra.gmra.mrb[136].mxu1 %vm488_vm1, %v11031_v26  ;;  %v5765_v26 = vpop.permute.xlu1 %5764 }
 0xeeb   : > { %6176 = vmatprep.mubr.f32.mxu1 %v11985_v29 }
 0xeec   : > { %9003 = vmatmul.mubr.msk.f32.gmra.mrb[138].mxu0 %vm488_vm1, %v11043_v44 }
 0xeed   : > { %6093 = vmatprep.mubr.f32.mxu0 %v11985_v29 }
 0xeee   : > { %9009 = vmatmul.mubr.msk.f32.gmra.mrb[138].mxu1 %vm488_vm1, %v11043_v44  ;;  %v5770_v44 = vrot.slane %v5765_v26, %v10456_v51 }
 0xeef   : > { %6182 = vmatprep.mubr.f32.mxu1 %v11985_v29 }
 0xef0   : > { %9004 = vmatmul.mubr.msk.f32.gmra.mrb[140].mxu0 %vm488_vm1, %v11054_v14 }
 0xef1   : > { %6099 = vmatprep.mubr.f32.mxu0 %v11985_v29 }
 0xef2   : > { %9010 = vmatmul.mubr.msk.f32.gmra.mrb[140].mxu1 %vm488_vm1, %v11054_v14 }
 0xef3   : > { %6188 = vmatprep.mubr.f32.mxu1 %v11985_v29 }
 0xef4   : > { %9005 = vmatmul.mubr.msk.f32.gmra.mrb[142].mxu0 %vm488_vm1, %v11065_v4 }
 0xef5   : > { %6315 = vmatprep.mubr.f32.mxu0 %v11985_v29 }
 0xef6   : > { %9011 = vmatmul.mubr.msk.f32.gmra.mrb[142].mxu1 %vm488_vm1, %v11065_v4 }
 0xef7   : > { %6404 = vmatprep.mubr.f32.mxu1 %v11985_v29 }
 0xfb7   : > { %v5840_v45 = vpop.f32.mrb[134].mxu0 }
 0xfb8   : > { %v5841_v1 = vadd.f32 %v5840_v45, %v5770_v44  ;;  %v5842_v41 = vpop.f32.mrb[135].mxu0 }
 0xfb9   : > { %v5843_v36 = vadd.f32 %v5842_v41, %v5770_v44  ;;  %v5911_v14 = vpop.f32.mrb[134].mxu1 }
 0xfba   : > { %v5916_v5 = vmax.f32 %v5841_v1, 0.0  ;;  %v5912_v17 = vadd.f32 %v5911_v14, %v5770_v44  ;;  %v5913_v34 = vpop.f32.mrb[135].mxu1 }
 0xfbb   : > { %v5917_v3 = vmax.f32 %v5843_v36, 0.0  ;;  %v5914_v11 = vadd.f32 %v5913_v34, %v5770_v44  ;;  %v6083_v48 = vpop.f32.mrb[136].mxu0  ;;  %v12019_v36 = vld [vmem:[#allocation37_spill] sm:$0xff] }
 0xfbc   : > { %v5918_v54 = vmax.f32 %v5912_v17, 0.0  ;;  %v6085_v21 = vpop.f32.mrb[137].mxu0  ;;  %v6084_v6 = vadd.f32 %v6083_v48, %v12016_v0 }
 0xfbd   : > { %v5924_v55 = vcombine.low %v5916_v5, %v5917_v3  ;;  %v5919_v4 = vmax.f32 %v5914_v11, 0.0  ;;  %v6172_v60 = vpop.f32.mrb[136].mxu1  ;;  %v6086_v49 = vadd.f32 %v6085_v21, %v12016_v0 }
 0xfbe   : > { %v6174_v33 = vpop.f32.mrb[137].mxu1  ;;  %v6173_v37 = vadd.f32 %v6172_v60, %v12016_v0  ;;  %v6195_v28 = vmax.f32 %v6084_v6, 0.0 }
 0xfbf   : > { %v5925_v61 = vcombine.low %v5918_v54, %v5919_v4  ;;  %v6089_v58 = vpop.f32.mrb[138].mxu0  ;;  %v5932_v42 = vrot.slane %v5924_v55, %v10460_v35  ;;  %v6175_v62 = vadd.f32 %v6174_v33, %v12016_v0  ;;  %v6196_v30 = vmax.f32 %v6086_v49, 0.0 }
 0xfc0   : > { %v6090_v46 = vadd.f32 %v6089_v58, %v12017_v59  ;;  %v6091_v43 = vpop.f32.mrb[139].mxu0  ;;  %v6197_v25 = vmax.f32 %v6173_v37, 0.0 }
 0xfc1   : > { %v5939_v20 = vrot.slane %v5925_v61, %v10460_v35  ;;  %v6092_v38 = vadd.f32 %v6091_v43, %v12017_v59  ;;  %v6178_v31 = vpop.f32.mrb[138].mxu1  ;;  %v6198_v9 = vmax.f32 %v6175_v62, 0.0  ;;  %v11352_v43 = vld [vmem:[%s11887_s3 + $0x8] sm:$0xff] }
 0xfc2   : > { %v6199_v18 = vmax.f32 %v6090_v46, 0.0  ;;  %v6179_v23 = vadd.f32 %v6178_v31, %v12017_v59  ;;  %v6180_v32 = vpop.f32.mrb[139].mxu1  ;;  %v11340_v46 = vld [vmem:[%s11887_s3] sm:$0xff] }
 0xfc3   : > { %v5940_v39 = vcombine.low %v5932_v42, %v5939_v20  ;;  %v6200_v57 = vmax.f32 %v6092_v38, 0.0  ;;  %v6181_v16 = vadd.f32 %v6180_v32, %v12017_v59  ;;  %v6095_v7 = vpop.f32.mrb[140].mxu0  ;;  %v11410_v42 = vld [vmem:[%s11890_s6 + $0x10] sm:$0xff]  ;;  %v11421_v20 = vld [vmem:[%s11890_s6 + $0x18] sm:$0xff] }
 0xfc4   : > { %v9388_v53 = vpack.c.bf16 %v6199_v18, %v6195_v28  ;;  %v6201_v10 = vmax.f32 %v6179_v23, 0.0  ;;  %v6097_v40 = vpop.f32.mrb[141].mxu0  ;;  %v6096_v52 = vadd.f32 %v6095_v7, %v12018_v15  ;;  %v12020_v28 = vld [vmem:[#allocation22_spill] sm:$0xff] }
 0xfc5   : > { %v5947_v50 = vrot.slane %v5940_v39, %v10460_v35  ;;  %v9386_v63 = vpack.c.bf16 %v6200_v57, %v6196_v30  ;;  %v6202_v13 = vmax.f32 %v6181_v16, 0.0  ;;  %v6184_v24 = vpop.f32.mrb[140].mxu1  ;;  %v6098_v45 = vadd.f32 %v6097_v40, %v12018_v15  ;;  %v12021_v57 = vld [vmem:[#allocation38_spill] sm:$0xff] }
 0xfc6   : > { %v9396_v8 = vpack.c.bf16 %v6201_v10, %v6197_v25  ;;  %v6186_v26 = vpop.f32.mrb[141].mxu1  ;;  %v6185_v41 = vadd.f32 %v6184_v24, %v12018_v15  ;;  %v6203_v11 = vmax.f32 %v6096_v52, 0.0 }
 0xfc7   : > { %5949 = vst.msk [vmem:[%s10480_s16 + $0xc] sm:$0xf] %vm10473_vm7, %v5947_v50  ;;  %v9394_v44 = vpack.c.bf16 %v6202_v13, %v6198_v9  ;;  %v6101_v1 = vpop.f32.mrb[142].mxu0  ;;  %9387 = vmatprep.subr.bf16.mxu0 %v9386_v63  ;;  %v6187_v17 = vadd.f32 %v6186_v26, %v12018_v15  ;;  %v6204_v55 = vmax.f32 %v6098_v45, 0.0 }
 0xfc8   : > { %v6102_v14 = vadd.f32 %v6101_v1, %v12019_v36  ;;  %v6103_v5 = vpop.f32.mrb[143].mxu0  ;;  %9389 = vmatpush1.bf16.msra.mxu0 %v9388_v53  ;;  %v6205_v0 = vmax.f32 %v6185_v41, 0.0 }
 0xfc9   : > { %v6104_v34 = vadd.f32 %v6103_v5, %v12019_v36  ;;  %v6190_v3 = vpop.f32.mrb[142].mxu1  ;;  %9395 = vmatprep.subr.bf16.mxu1 %v9394_v44  ;;  %v6206_v61 = vmax.f32 %v6187_v17, 0.0  ;;  %v12022_v17 = vld [vmem:[#allocation23_spill] sm:$0xff] }
 0xfca   : > { %v6207_v48 = vmax.f32 %v6102_v14, 0.0  ;;  %v6191_v54 = vadd.f32 %v6190_v3, %v12019_v36  ;;  %v6192_v21 = vpop.f32.mrb[143].mxu1  ;;  %9397 = vmatpush1.bf16.msra.mxu1 %v9396_v8 }
 0xfcb   : > { %v6208_v4 = vmax.f32 %v6104_v34, 0.0  ;;  %v6193_v60 = vadd.f32 %v6192_v21, %v12019_v36 }
 0xfcc   : > { %v9392_v6 = vpack.c.bf16 %v6207_v48, %v6203_v11  ;;  %v6209_v33 = vmax.f32 %v6191_v54, 0.0 }
 0xfcd   : > { %v9390_v49 = vpack.c.bf16 %v6208_v4, %v6204_v55  ;;  %v6210_v58 = vmax.f32 %v6193_v60, 0.0  ;;  %v12023_v55 = vld [vmem:[#allocation39_spill] sm:$0xff] }
 0xfce   : > { %v9400_v37 = vpack.c.bf16 %v6209_v33, %v6205_v0 }
 0xfcf   : > { %v9398_v59 = vpack.c.bf16 %v6210_v58, %v6206_v61  ;;  %9391 = vmatprep.subr.bf16.mxu0 %v9390_v49 }
 0xfd0   : > { %9393 = vmatpush1.bf16.msra.mxu0 %v9392_v6 }
 0xfd1   : > { %9399 = vmatprep.subr.bf16.mxu1 %v9398_v59  ;;  %9020 = vmatprep.subr.msk.mxu0 %vm501_vm0, %v11269_v2  ;;  %v11367_v2 = vld [vmem:[%s11887_s3 + $0x10] sm:$0xff] }
 0xfd2   : > { %9401 = vmatpush1.bf16.msra.mxu1 %v9400_v37 }
 0xfd3   : > { %9012 = vmatmul.mubr.msk.f32.vlgmr.msra.gmra.mrb[144].mxu0 %vm732_vm2, %v11340_v46  ;;  %9026 = vmatprep.subr.msk.mxu1 %vm501_vm0, %v11273_v27  ;;  %v11399_v27 = vld [vmem:[%s11890_s6 + $0x8] sm:$0xff] }
 0xfd4   : > { %6321 = vmatprep.mubr.f32.mxu0 %v11985_v29  ;;  %9021 = vmatpush1.msk.msra.mxu0 %vm501_vm0, %v11260_v22  ;;  %v6214_v22 = vld [vmem:[%s11887_s3 + $0x18] sm:$0x3f] }
 0xfd5   : > { %9016 = vmatmul.mubr.msk.f32.vlgmr.msra.gmra.mrb[144].mxu1 %vm732_vm2, %v11340_v46 }
 0xfd6   : > { %6410 = vmatprep.mubr.f32.mxu1 %v11985_v29  ;;  %9027 = vmatpush1.msk.msra.mxu1 %vm501_vm0, %v11265_v47  ;;  %v11388_v47 = vld [vmem:[%s11890_s6] sm:$0xff] }
 0xfd7   : > { %9013 = vmatmul.mubr.msk.f32.gmra.mrb[146].mxu0 %vm732_vm2, %v11352_v43 }
 0xfd8   : > { %6327 = vmatprep.mubr.f32.mxu0 %v11985_v29 }
 0xfd9   : > { %9017 = vmatmul.mubr.msk.f32.gmra.mrb[146].mxu1 %vm732_vm2, %v11352_v43 }
 0xfda   : > { %6416 = vmatprep.mubr.f32.mxu1 %v11985_v29 }
 0xfdb   : > { %9014 = vmatmul.mubr.msk.f32.gmra.mrb[148].mxu0 %vm732_vm2, %v11367_v2 }
 0xfdc   : > { %6333 = vmatprep.mubr.f32.mxu0 %v11985_v29 }
 0xfdd   : > { %9018 = vmatmul.mubr.msk.f32.gmra.mrb[148].mxu1 %vm732_vm2, %v11367_v2 }
 0xfde   : > { %6422 = vmatprep.mubr.f32.mxu1 %v11985_v29 }
 0xfdf   : > { %9015 = vmatmul.mubr.msk.f32.gmra.mrb[150].mxu0 %vm732_vm2, %v6214_v22 }
 0xfe0   : > { %6533 = vmatprep.mubr.f32.mxu0 %v11985_v29 }
 0xfe1   : > { %9019 = vmatmul.mubr.msk.f32.gmra.mrb[150].mxu1 %vm732_vm2, %v6214_v22 }
 0xfe2   : > { %6622 = vmatprep.mubr.f32.mxu1 %v11985_v29 }
 0xfe3   : > { %9022 = vmatmul.mubr.msk.f32.vlgmr.msra.gmra.mrb[152].mxu0 %vm488_vm1, %v11388_v47 }
 0xfe4   : > { %6539 = vmatprep.mubr.f32.mxu0 %v11985_v29 }
 0xfe5   : > { %9028 = vmatmul.mubr.msk.f32.vlgmr.msra.gmra.mrb[152].mxu1 %vm488_vm1, %v11388_v47 }
 0xfe6   : > { %6628 = vmatprep.mubr.f32.mxu1 %v11985_v29 }
 0xfe7   : > { %9023 = vmatmul.mubr.msk.f32.gmra.mrb[154].mxu0 %vm488_vm1, %v11399_v27 }
 0xfe8   : > { %6545 = vmatprep.mubr.f32.mxu0 %v11985_v29 }
 0xfe9   : > { %9029 = vmatmul.mubr.msk.f32.gmra.mrb[154].mxu1 %vm488_vm1, %v11399_v27 }
 0xfea   : > { %6634 = vmatprep.mubr.f32.mxu1 %v11985_v29 }
 0xfeb   : > { %9024 = vmatmul.mubr.msk.f32.gmra.mrb[156].mxu0 %vm488_vm1, %v11410_v42 }
 0xfec   : > { %6551 = vmatprep.mubr.f32.mxu0 %v11985_v29 }
 0xfed   : > { %9030 = vmatmul.mubr.msk.f32.gmra.mrb[156].mxu1 %vm488_vm1, %v11410_v42 }
 0xfee   : > { %6640 = vmatprep.mubr.f32.mxu1 %v11985_v29 }
 0xfef   : > { %9025 = vmatmul.mubr.msk.f32.gmra.mrb[158].mxu0 %vm488_vm1, %v11421_v20 }
 0xff0   : > { %6735 = vmatprep.mubr.f32.mxu0 %v11985_v29 }
 0xff1   : > { %9031 = vmatmul.mubr.msk.f32.gmra.mrb[158].mxu1 %vm488_vm1, %v11421_v20 }
 0xff2   : > { %6824 = vmatprep.mubr.f32.mxu1 %v11985_v29 }
0x10a6   : > { %v6317_v62 = vpop.f32.mrb[144].mxu0 }
0x10a7   : > { %v6319_v38 = vpop.f32.mrb[145].mxu0  ;;  %v6318_v18 = vadd.f32 %v6317_v62, %v12020_v28 }
0x10a8   : > { %v6406_v31 = vpop.f32.mrb[144].mxu1  ;;  %v6320_v32 = vadd.f32 %v6319_v38, %v12020_v28 }
0x10a9   : > { %v6408_v23 = vpop.f32.mrb[145].mxu1  ;;  %v6407_v30 = vadd.f32 %v6406_v31, %v12020_v28  ;;  %v6429_v40 = vmax.f32 %v6318_v18, 0.0 }
0x10aa   : > { %v6323_v39 = vpop.f32.mrb[146].mxu0  ;;  %v6409_v25 = vadd.f32 %v6408_v23, %v12020_v28  ;;  %v6430_v13 = vmax.f32 %v6320_v32, 0.0 }
0x10ab   : > { %v6324_v16 = vadd.f32 %v6323_v39, %v12021_v57  ;;  %v6325_v7 = vpop.f32.mrb[147].mxu0  ;;  %v6431_v52 = vmax.f32 %v6407_v30, 0.0 }
0x10ac   : > { %v6326_v53 = vadd.f32 %v6325_v7, %v12021_v57  ;;  %v6412_v10 = vpop.f32.mrb[146].mxu1  ;;  %v6432_v1 = vmax.f32 %v6409_v25, 0.0  ;;  %v11475_v7 = vld [vmem:[%s11889_s5 + $0x10] sm:$0xff]  ;;  %v11486_v25 = vld [vmem:[%s11889_s5 + $0x18] sm:$0xff] }
0x10ad   : > { %v6433_v50 = vmax.f32 %v6324_v16, 0.0  ;;  %v6413_v9 = vadd.f32 %v6412_v10, %v12021_v57  ;;  %v6414_v63 = vpop.f32.mrb[147].mxu1  ;;  %v11464_v16 = vld [vmem:[%s11889_s5 + $0x8] sm:$0xff] }
0x10ae   : > { %v6434_v24 = vmax.f32 %v6326_v53, 0.0  ;;  %v6415_v8 = vadd.f32 %v6414_v63, %v12021_v57  ;;  %v6329_v15 = vpop.f32.mrb[148].mxu0  ;;  %v11452_v57 = vld [vmem:[%s11889_s5] sm:$0xff] }
0x10af   : > { %v9404_v26 = vpack.c.bf16 %v6433_v50, %v6429_v40  ;;  %v6435_v44 = vmax.f32 %v6413_v9, 0.0  ;;  %v6331_v45 = vpop.f32.mrb[149].mxu0  ;;  %v6330_v34 = vadd.f32 %v6329_v15, %v12022_v17  ;;  %v12024_v50 = vld [vmem:[#allocation24_spill] sm:$0xff] }
0x10b0   : > { %v9402_v41 = vpack.c.bf16 %v6434_v24, %v6430_v13  ;;  %v6436_v36 = vmax.f32 %v6415_v8, 0.0  ;;  %v6418_v14 = vpop.f32.mrb[148].mxu1  ;;  %v6332_v48 = vadd.f32 %v6331_v45, %v12022_v17  ;;  %v12025_v15 = vld [vmem:[#allocation40_spill] sm:$0xff] }
0x10b1   : > { %v9414_v5 = vpack.c.bf16 %v6435_v44, %v6431_v52  ;;  %v6420_v3 = vpop.f32.mrb[149].mxu1  ;;  %v6419_v21 = vadd.f32 %v6418_v14, %v12022_v17  ;;  %v6437_v61 = vmax.f32 %v6330_v34, 0.0 }
0x10b2   : > { %v9412_v11 = vpack.c.bf16 %v6436_v36, %v6432_v1  ;;  %v6335_v54 = vpop.f32.mrb[150].mxu0  ;;  %9403 = vmatprep.subr.bf16.mxu0 %v9402_v41  ;;  %v6421_v0 = vadd.f32 %v6420_v3, %v12022_v17  ;;  %v6438_v59 = vmax.f32 %v6332_v48, 0.0 }
0x10b3   : > { %v6336_v4 = vadd.f32 %v6335_v54, %v12023_v55  ;;  %v6337_v60 = vpop.f32.mrb[151].mxu0  ;;  %9405 = vmatpush1.bf16.msra.mxu0 %v9404_v26  ;;  %v6439_v38 = vmax.f32 %v6419_v21, 0.0 }
0x10b4   : > { %v6338_v6 = vadd.f32 %v6337_v60, %v12023_v55  ;;  %v6424_v33 = vpop.f32.mrb[150].mxu1  ;;  %9413 = vmatprep.subr.bf16.mxu1 %v9412_v11  ;;  %v6440_v18 = vmax.f32 %v6421_v0, 0.0 }
0x10b5   : > { %v6441_v49 = vmax.f32 %v6336_v4, 0.0  ;;  %v6425_v58 = vadd.f32 %v6424_v33, %v12023_v55  ;;  %v6426_v37 = vpop.f32.mrb[151].mxu1  ;;  %9415 = vmatpush1.bf16.msra.mxu1 %v9414_v5 }
0x10b6   : > { %v6442_v22 = vmax.f32 %v6338_v6, 0.0  ;;  %v6427_v62 = vadd.f32 %v6426_v37, %v12023_v55 }
0x10b7   : > { %v9409_v31 = vpack.c.bf16 %v6441_v49, %v6437_v61  ;;  %v6443_v28 = vmax.f32 %v6425_v58, 0.0  ;;  %v12026_v61 = vld [vmem:[#allocation25_spill] sm:$0xff] }
0x10b8   : > { %v9406_v23 = vpack.c.bf16 %v6442_v22, %v6438_v59  ;;  %v6444_v32 = vmax.f32 %v6427_v62, 0.0 }
0x10b9   : > { %v9419_v39 = vpack.c.bf16 %v6443_v28, %v6439_v38  ;;  %v12027_v38 = vld [vmem:[#allocation41_spill] sm:$0xff] }
0x10ba   : > { %v9416_v30 = vpack.c.bf16 %v6444_v32, %v6440_v18  ;;  %9408 = vmatprep.subr.msk.bf16.mxu0 %vm10200_vm5, %v9406_v23 }
0x10bb   : > { %9411 = vmatpush1.bf16.msk.msra.mxu0 %vm10200_vm5, %v9409_v31 }
0x10bc   : > { %9418 = vmatprep.subr.msk.bf16.mxu1 %vm10200_vm5, %v9416_v30 }
0x10bd   : > { %9421 = vmatpush1.bf16.msk.msra.mxu1 %vm10200_vm5, %v9419_v39 }
0x10be   : > { %9034 = vmatmul.mubr.msk.f32.vlgmr.msra.gmra.mrb[152].mxu0 %vm1141_vm6, %v11452_v57 }
0x10bf   : > { %6741 = vmatprep.mubr.f32.mxu0 %v11985_v29 }
0x10c0   : > { %9040 = vmatmul.mubr.msk.f32.vlgmr.msra.gmra.mrb[152].mxu1 %vm1141_vm6, %v11452_v57 }
0x10c1   : > { %6830 = vmatprep.mubr.f32.mxu1 %v11985_v29 }
0x10c2   : > { %9035 = vmatmul.mubr.msk.f32.gmra.mrb[154].mxu0 %vm1141_vm6, %v11464_v16 }
0x10c3   : > { %6747 = vmatprep.mubr.f32.mxu0 %v11985_v29 }
0x10c4   : > { %9041 = vmatmul.mubr.msk.f32.gmra.mrb[154].mxu1 %vm1141_vm6, %v11464_v16 }
0x10c5   : > { %6836 = vmatprep.mubr.f32.mxu1 %v11985_v29 }
0x10c6   : > { %9036 = vmatmul.mubr.msk.f32.gmra.mrb[156].mxu0 %vm1141_vm6, %v11475_v7 }
0x10c7   : > { %6753 = vmatprep.mubr.f32.mxu0 %v11985_v29 }
0x10c8   : > { %9042 = vmatmul.mubr.msk.f32.gmra.mrb[156].mxu1 %vm1141_vm6, %v11475_v7 }
0x10c9   : > { %6842 = vmatprep.mubr.f32.mxu1 %v11985_v29 }
0x10ca   : > { %9037 = vmatmul.mubr.msk.f32.gmra.mrb[158].mxu0 %vm1141_vm6, %v11486_v25 }
0x10cb   : > { %7005 = vmatprep.mubr.f32.mxu0 %v11985_v29 }
0x10cc   : > { %9043 = vmatmul.mubr.msk.f32.gmra.mrb[158].mxu1 %vm1141_vm6, %v11486_v25 }
0x10cd   : > { %7094 = vmatprep.mubr.f32.mxu1 %v11985_v29 }
0x1191   : > { %v6737_v53 = vpop.f32.mrb[152].mxu0 }
0x1192   : > { %v6739_v10 = vpop.f32.mrb[153].mxu0  ;;  %v6869_v9 = vadd.f32 %v12024_v50, %v6737_v53 }
0x1193   : > { %v6826_v40 = vpop.f32.mrb[152].mxu1  ;;  %v6870_v13 = vadd.f32 %v12024_v50, %v6739_v10 }
0x1194   : > { %v6828_v63 = vpop.f32.mrb[153].mxu1  ;;  %v6871_v8 = vadd.f32 %v12024_v50, %v6826_v40  ;;  %v6885_v41 = vmax.f32 %v6869_v9, 0.0 }
0x1195   : > { %v6743_v24 = vpop.f32.mrb[154].mxu0  ;;  %v6872_v44 = vadd.f32 %v12024_v50, %v6828_v63  ;;  %v6886_v17 = vmax.f32 %v6870_v13, 0.0 }
0x1196   : > { %v6873_v52 = vadd.f32 %v12025_v15, %v6743_v24  ;;  %v6745_v26 = vpop.f32.mrb[155].mxu0  ;;  %v6887_v48 = vmax.f32 %v6871_v8, 0.0 }
0x1197   : > { %v6874_v45 = vadd.f32 %v12025_v15, %v6745_v26  ;;  %v6832_v1 = vpop.f32.mrb[154].mxu1  ;;  %v6888_v4 = vmax.f32 %v6872_v44, 0.0 }
0x1198   : > { %v6889_v36 = vmax.f32 %v6873_v52, 0.0  ;;  %v6875_v14 = vadd.f32 %v12025_v15, %v6832_v1  ;;  %v6834_v5 = vpop.f32.mrb[155].mxu1  ;;  %v11524_v1 = vld [vmem:[%s11892_s8 + $0x8] sm:$0xff] }
0x1199   : > { %v6890_v34 = vmax.f32 %v6874_v45, 0.0  ;;  %v6876_v3 = vadd.f32 %v12025_v15, %v6834_v5  ;;  %v6749_v11 = vpop.f32.mrb[156].mxu0  ;;  %v11516_v45 = vld [vmem:[%s11892_s8] sm:$0xff] }
0x119a   : > { %v9424_v54 = vpack.c.bf16 %v6889_v36, %v6885_v41  ;;  %v6891_v21 = vmax.f32 %v6875_v14, 0.0  ;;  %v6751_v55 = vpop.f32.mrb[157].mxu0  ;;  %v6877_v49 = vadd.f32 %v12026_v61, %v6749_v11  ;;  %v11535_v41 = vld [vmem:[%s11892_s8 + $0x10] sm:$0xff]  ;;  %v11546_v36 = vld [vmem:[%s11892_s8 + $0x18] sm:$0xff] }
0x119b   : > { %v9422_v60 = vpack.c.bf16 %v6890_v34, %v6886_v17  ;;  %v6892_v0 = vmax.f32 %v6876_v3, 0.0  ;;  %v6838_v6 = vpop.f32.mrb[156].mxu1  ;;  %v6878_v59 = vadd.f32 %v12026_v61, %v6751_v55  ;;  %v12028_v34 = vld [vmem:[#allocation26_spill] sm:$0xff] }
0x119c   : > { %v9432_v33 = vpack.c.bf16 %v6891_v21, %v6887_v48  ;;  %v6840_v58 = vpop.f32.mrb[157].mxu1  ;;  %v6879_v62 = vadd.f32 %v12026_v61, %v6838_v6  ;;  %v6893_v39 = vmax.f32 %v6877_v49, 0.0  ;;  %v12029_v55 = vld [vmem:[#allocation42_spill] sm:$0xff] }
0x119d   : > { %v9430_v37 = vpack.c.bf16 %v6892_v0, %v6888_v4  ;;  %v6755_v22 = vpop.f32.mrb[158].mxu0  ;;  %9423 = vmatprep.subr.bf16.mxu0 %v9422_v60  ;;  %v6880_v18 = vadd.f32 %v12026_v61, %v6840_v58  ;;  %v6894_v40 = vmax.f32 %v6878_v59, 0.0 }
0x119e   : > { %v6881_v31 = vadd.f32 %v12027_v38, %v6755_v22  ;;  %v6757_v28 = vpop.f32.mrb[159].mxu0  ;;  %9425 = vmatpush1.bf16.msra.mxu0 %v9424_v54  ;;  %v6895_v63 = vmax.f32 %v6879_v62, 0.0 }
0x119f   : > { %v6882_v23 = vadd.f32 %v12027_v38, %v6757_v28  ;;  %v6844_v32 = vpop.f32.mrb[158].mxu1  ;;  %9431 = vmatprep.subr.bf16.mxu1 %v9430_v37  ;;  %v6896_v8 = vmax.f32 %v6880_v18, 0.0 }
0x11a0   : > { %v6897_v30 = vmax.f32 %v6881_v31, 0.0  ;;  %v6883_v53 = vadd.f32 %v12027_v38, %v6844_v32  ;;  %v6846_v10 = vpop.f32.mrb[159].mxu1  ;;  %9433 = vmatpush1.bf16.msra.mxu1 %v9432_v33  ;;  %v7325_v32 = vld [vmem:[%s9906_s29 + $0x28] sm:$0xff]  ;;  %s11829_s29 = scalar_lea.sflag [#allocation4], %s419_s30 }
0x11a1   : > { %v6898_v50 = vmax.f32 %v6882_v23, 0.0  ;;  %v6884_v9 = vadd.f32 %v12027_v38, %v6846_v10 }
0x11a2   : > { %v9428_v13 = vpack.c.bf16 %v6897_v30, %v6893_v39  ;;  %v6899_v24 = vmax.f32 %v6883_v53, 0.0 }
0x11a3   : > { %v9426_v15 = vpack.c.bf16 %v6898_v50, %v6894_v40  ;;  %v6900_v52 = vmax.f32 %v6884_v9, 0.0  ;;  %v12030_v50 = vld [vmem:[#allocation27_spill] sm:$0xff] }
0x11a4   : > { %v9436_v26 = vpack.c.bf16 %v6899_v24, %v6895_v63 }
0x11a5   : > { %v9434_v44 = vpack.c.bf16 %v6900_v52, %v6896_v8  ;;  %9427 = vmatprep.subr.bf16.mxu0 %v9426_v15  ;;  %v7355_v15 = vcombine.high %v7325_v32, %v7325_v32 }
0x11a6   : > { %9429 = vmatpush1.bf16.msra.mxu0 %v9428_v13 }
0x11a7   : > { %9435 = vmatprep.subr.bf16.mxu1 %v9434_v44 }
0x11a8   : > { %9437 = vmatpush1.bf16.msra.mxu1 %v9436_v26  ;;  %v12031_v26 = vld [vmem:[#allocation43_spill] sm:$0xff] }
0x11a9   : > { %9044 = vmatmul.mubr.msk.f32.vlgmr.msra.gmra.mrb[160].mxu0 %vm732_vm2, %v11516_v45 }
0x11aa   : > { %7011 = vmatprep.mubr.f32.mxu0 %v11985_v29 }
0x11ab   : > { %9048 = vmatmul.mubr.msk.f32.vlgmr.msra.gmra.mrb[160].mxu1 %vm732_vm2, %v11516_v45 }
0x11ac   : > { %7100 = vmatprep.mubr.f32.mxu1 %v11985_v29 }
0x11ad   : > { %9045 = vmatmul.mubr.msk.f32.gmra.mrb[162].mxu0 %vm732_vm2, %v11524_v1 }
0x11ae   : > { %7017 = vmatprep.mubr.f32.mxu0 %v11985_v29 }
0x11af   : > { %9049 = vmatmul.mubr.msk.f32.gmra.mrb[162].mxu1 %vm732_vm2, %v11524_v1 }
0x11b0   : > { %7106 = vmatprep.mubr.f32.mxu1 %v11985_v29 }
0x11b1   : > { %9046 = vmatmul.mubr.msk.f32.gmra.mrb[164].mxu0 %vm732_vm2, %v11535_v41 }
0x11b2   : > { %7023 = vmatprep.mubr.f32.mxu0 %v11985_v29 }
0x11b3   : > { %9050 = vmatmul.mubr.msk.f32.gmra.mrb[164].mxu1 %vm732_vm2, %v11535_v41 }
0x11b4   : > { %7112 = vmatprep.mubr.f32.mxu1 %v11985_v29 }
0x11b5   : > { %9047 = vmatmul.mubr.msk.f32.gmra.mrb[166].mxu0 %vm732_vm2, %v11546_v36 }
0x11b6   : > { %7213 = vmatprep.mubr.f32.mxu0 %v11985_v29 }
0x11b7   : > { %9051 = vmatmul.mubr.msk.f32.gmra.mrb[166].mxu1 %vm732_vm2, %v11546_v36 }
0x11b8   : > { %7284 = vmatprep.mubr.f32.mxu1 %v11985_v29 }
0x127c   : > { %v7007_v14 = vpop.f32.mrb[160].mxu0 }
0x127d   : > { %v7009_v5 = vpop.f32.mrb[161].mxu0  ;;  %v7008_v3 = vadd.f32 %v7007_v14, %v12028_v34 }
0x127e   : > { %v7096_v17 = vpop.f32.mrb[160].mxu1  ;;  %v7010_v48 = vadd.f32 %v7009_v5, %v12028_v34 }
0x127f   : > { %v7098_v11 = vpop.f32.mrb[161].mxu1  ;;  %v7097_v21 = vadd.f32 %v7096_v17, %v12028_v34  ;;  %v7119_v61 = vmax.f32 %v7008_v3, 0.0  ;;  %v11573_v3 = vrot.slane %v7325_v32, %v9891_v12  ;;  %v7140_v32 = vpop.permute.xlu0 %7139 }
0x1280   : > { %v7013_v54 = vpop.f32.mrb[162].mxu0  ;;  %v7099_v0 = vadd.f32 %v7098_v11, %v12028_v34  ;;  %v7120_v59 = vmax.f32 %v7010_v48, 0.0 }
0x1281   : > { %v7014_v4 = vadd.f32 %v7013_v54, %v12029_v55  ;;  %v7015_v60 = vpop.f32.mrb[163].mxu0  ;;  %v7121_v31 = vmax.f32 %v7097_v21, 0.0 }
0x1282   : > { %v7016_v6 = vadd.f32 %v7015_v60, %v12029_v55  ;;  %v7102_v33 = vpop.f32.mrb[162].mxu1  ;;  %v7122_v39 = vmax.f32 %v7099_v0, 0.0  ;;  %v11578_v0 = vrot.slane %v7355_v15, %v9891_v12  ;;  %v7135_v12 = vld [vmem:[%s11894_s10] sm:$0x1] }
0x1283   : > { %v7123_v49 = vmax.f32 %v7014_v4, 0.0  ;;  %v7103_v58 = vadd.f32 %v7102_v33, %v12029_v55  ;;  %v7104_v37 = vpop.f32.mrb[163].mxu1 }
0x1284   : > { %v7124_v22 = vmax.f32 %v7016_v6, 0.0  ;;  %v7105_v62 = vadd.f32 %v7104_v37, %v12029_v55  ;;  %v7019_v38 = vpop.f32.mrb[164].mxu0 }
0x1285   : > { %v9440_v28 = vpack.c.bf16 %v7123_v49, %v7119_v61  ;;  %v7125_v18 = vmax.f32 %v7103_v58, 0.0  ;;  %v7021_v23 = vpop.f32.mrb[165].mxu0  ;;  %v7020_v9 = vadd.f32 %v7019_v38, %v12030_v50  ;;  %v11586_v38 = vcombine.high %v11578_v0, %v11578_v0 }
0x1286   : > { %v9438_v30 = vpack.c.bf16 %v7124_v22, %v7120_v59  ;;  %v7126_v53 = vmax.f32 %v7105_v62, 0.0  ;;  %v7108_v10 = vpop.f32.mrb[164].mxu1  ;;  %v7022_v24 = vadd.f32 %v7021_v23, %v12030_v50  ;;  %v11582_v59 = vcombine.high %v11573_v3, %v11573_v3  ;;  %v7329_v23 = vld [vmem:[%s11885_s1 + $0x18] sm:$0xff] }
0x1287   : > { %v9448_v40 = vpack.c.bf16 %v7125_v18, %v7121_v31  ;;  %v7110_v63 = vpop.f32.mrb[165].mxu1  ;;  %v7109_v52 = vadd.f32 %v7108_v10, %v12030_v50  ;;  %v7127_v11 = vmax.f32 %v7020_v9, 0.0  ;;  %v7326_v31 = vld [vmem:[%s11885_s1] sm:$0xff]  ;;  %v7328_v18 = vld [vmem:[%s11885_s1 + $0x10] sm:$0xff] }
0x1288   : > { %v9446_v13 = vpack.c.bf16 %v7126_v53, %v7122_v39  ;;  %v7025_v8 = vpop.f32.mrb[166].mxu0  ;;  %9439 = vmatprep.subr.bf16.mxu0 %v9438_v30  ;;  %v7111_v5 = vadd.f32 %v7110_v63, %v12030_v50  ;;  %v7128_v55 = vmax.f32 %v7022_v24, 0.0  ;;  %v7145_v39 = vrot.slane %v7140_v32, %v10456_v51 }
0x1289   : > { %v7026_v44 = vadd.f32 %v7025_v8, %v12031_v26  ;;  %v7027_v14 = vpop.f32.mrb[167].mxu0  ;;  %9441 = vmatpush1.bf16.msra.mxu0 %v9440_v28  ;;  %v7129_v6 = vmax.f32 %v7109_v52, 0.0  ;;  %v7327_v28 = vld [vmem:[%s11885_s1 + $0x8] sm:$0xff] }
0x128a   : > { %v7028_v17 = vadd.f32 %v7027_v14, %v12031_v26  ;;  %v7114_v34 = vpop.f32.mrb[166].mxu1  ;;  %9447 = vmatprep.subr.bf16.mxu1 %v9446_v13  ;;  %v7130_v49 = vmax.f32 %v7111_v5, 0.0 }
0x128b   : > { %v7131_v48 = vmax.f32 %v7026_v44, 0.0  ;;  %v7115_v54 = vadd.f32 %v7114_v34, %v12031_v26  ;;  %v7116_v21 = vpop.f32.mrb[167].mxu1  ;;  %9449 = vmatpush1.bf16.msra.mxu1 %v9448_v40 }
0x128c   : > { %v7132_v4 = vmax.f32 %v7028_v17, 0.0  ;;  %v7117_v60 = vadd.f32 %v7116_v21, %v12031_v26  ;;  %v12032_v17 = vld [vmem:[#allocation28_spill] sm:$0xff] }
0x128d   : > { %v9444_v33 = vpack.c.bf16 %v7131_v48, %v7127_v11  ;;  %v7133_v61 = vmax.f32 %v7115_v54, 0.0 }
0x128e   : > { %v9442_v58 = vpack.c.bf16 %v7132_v4, %v7128_v55  ;;  %v7134_v37 = vmax.f32 %v7117_v60, 0.0  ;;  %v12033_v4 = vld [vmem:[#allocation44_spill] sm:$0xff] }
0x128f   : > { %v9452_v22 = vpack.c.bf16 %v7133_v61, %v7129_v6 }
0x1290   : > { %v9450_v62 = vpack.c.bf16 %v7134_v37, %v7130_v49  ;;  %9443 = vmatprep.subr.bf16.mxu0 %v9442_v58 }
0x1291   : > { %9445 = vmatpush1.bf16.msra.mxu0 %v9444_v33 }
0x1292   : > { %9451 = vmatprep.subr.bf16.mxu1 %v9450_v62  ;;  %9054 = vmatprep.subr.msk.mxu0 %vm501_vm0, %v11582_v59 }
0x1293   : > { %9453 = vmatpush1.bf16.msra.mxu1 %v9452_v22 }
0x1294   : > { %9052 = vmatmul.mubr.msk.f32.vlgmr.msra.gmra.mrb[168].mxu0 %vm732_vm2, %v7135_v12  ;;  %9060 = vmatprep.subr.msk.mxu1 %vm501_vm0, %v11586_v38 }
0x1295   : > { %9055 = vmatpush1.msk.msra.mxu0 %vm501_vm0, %v11573_v3  ;;  %7456 = vmatprep.mubr.f32.mxu0 %v11985_v29 }
0x1296   : > { %9053 = vmatmul.mubr.msk.f32.vlgmr.msra.gmra.mrb[168].mxu1 %vm732_vm2, %v7135_v12 }
0x1297   : > { %9061 = vmatpush1.msk.msra.mxu1 %vm501_vm0, %v11578_v0  ;;  %7545 = vmatprep.mubr.f32.mxu1 %v11985_v29 }
0x1298   : > { %9056 = vmatmul.mubr.msk.f32.vlgmr.msra.gmra.mrb[170].mxu0 %vm488_vm1, %v7326_v31 }
0x1299   : > { %7462 = vmatprep.mubr.f32.mxu0 %v11985_v29 }
0x129a   : > { %9062 = vmatmul.mubr.msk.f32.vlgmr.msra.gmra.mrb[170].mxu1 %vm488_vm1, %v7326_v31 }
0x129b   : > { %7551 = vmatprep.mubr.f32.mxu1 %v11985_v29 }
0x129c   : > { %9057 = vmatmul.mubr.msk.f32.gmra.mrb[172].mxu0 %vm488_vm1, %v7327_v28 }
0x129d   : > { %7468 = vmatprep.mubr.f32.mxu0 %v11985_v29 }
0x129e   : > { %9063 = vmatmul.mubr.msk.f32.gmra.mrb[172].mxu1 %vm488_vm1, %v7327_v28 }
0x129f   : > { %7557 = vmatprep.mubr.f32.mxu1 %v11985_v29 }
0x12a0   : > { %9058 = vmatmul.mubr.msk.f32.gmra.mrb[174].mxu0 %vm488_vm1, %v7328_v18 }
0x12a1   : > { %7474 = vmatprep.mubr.f32.mxu0 %v11985_v29 }
0x12a2   : > { %9064 = vmatmul.mubr.msk.f32.gmra.mrb[174].mxu1 %vm488_vm1, %v7328_v18 }
0x12a3   : > { %7563 = vmatprep.mubr.f32.mxu1 %v11985_v29 }
0x12a4   : > { %9059 = vmatmul.mubr.msk.f32.gmra.mrb[176].mxu0 %vm488_vm1, %v7329_v23 }
0x12a5   : > { %7690 = vmatprep.mubr.f32.mxu0 %v11985_v29 }
0x12a6   : > { %9065 = vmatmul.mubr.msk.f32.gmra.mrb[176].mxu1 %vm488_vm1, %v7329_v23 }
0x12a7   : > { %7779 = vmatprep.mubr.f32.mxu1 %v11985_v29 }
0x1367   : > { %v7215_v30 = vpop.f32.mrb[168].mxu0 }
0x1368   : > { %v7216_v53 = vadd.f32 %v7215_v30, %v7145_v39  ;;  %v7217_v10 = vpop.f32.mrb[169].mxu0 }
0x1369   : > { %v7218_v40 = vadd.f32 %v7217_v10, %v7145_v39  ;;  %v7286_v50 = vpop.f32.mrb[168].mxu1 }
0x136a   : > { %v7291_v9 = vmax.f32 %v7216_v53, 0.0  ;;  %v7287_v63 = vadd.f32 %v7286_v50, %v7145_v39  ;;  %v7288_v13 = vpop.f32.mrb[169].mxu1 }
0x136b   : > { %v7292_v24 = vmax.f32 %v7218_v40, 0.0  ;;  %v7289_v8 = vadd.f32 %v7288_v13, %v7145_v39  ;;  %v7458_v15 = vpop.f32.mrb[170].mxu0 }
0x136c   : > { %v7293_v52 = vmax.f32 %v7287_v63, 0.0  ;;  %v7460_v26 = vpop.f32.mrb[171].mxu0  ;;  %v7459_v34 = vadd.f32 %v7458_v15, %v12032_v17  ;;  %v12034_v15 = vld [vmem:[#allocation29_spill] sm:$0xff] }
0x136d   : > { %v7299_v44 = vcombine.low %v7291_v9, %v7292_v24  ;;  %v7294_v14 = vmax.f32 %v7289_v8, 0.0  ;;  %v7547_v5 = vpop.f32.mrb[170].mxu1  ;;  %v7461_v54 = vadd.f32 %v7460_v26, %v12032_v17 }
0x136e   : > { %v7549_v11 = vpop.f32.mrb[171].mxu1  ;;  %v7548_v55 = vadd.f32 %v7547_v5, %v12032_v17  ;;  %v7570_v22 = vmax.f32 %v7459_v34, 0.0  ;;  %v12035_v34 = vld [vmem:[#allocation45_spill] sm:$0xff] }
0x136f   : > { %v7300_v48 = vcombine.low %v7293_v52, %v7294_v14  ;;  %v7464_v21 = vpop.f32.mrb[172].mxu0  ;;  %v7307_v33 = vrot.slane %v7299_v44, %v10460_v35  ;;  %v7550_v49 = vadd.f32 %v7549_v11, %v12032_v17  ;;  %v7571_v18 = vmax.f32 %v7461_v54, 0.0 }
0x1370   : > { %v7465_v60 = vadd.f32 %v7464_v21, %v12033_v4  ;;  %v7466_v6 = vpop.f32.mrb[173].mxu0  ;;  %v7572_v30 = vmax.f32 %v7548_v55, 0.0 }
0x1371   : > { %v7314_v61 = vrot.slane %v7300_v48, %v10460_v35  ;;  %v7467_v58 = vadd.f32 %v7466_v6, %v12033_v4  ;;  %v7553_v37 = vpop.f32.mrb[172].mxu1  ;;  %v7573_v9 = vmax.f32 %v7550_v49, 0.0 }
0x1372   : > { %v7574_v62 = vmax.f32 %v7465_v60, 0.0  ;;  %v7554_v12 = vadd.f32 %v7553_v37, %v12033_v4  ;;  %v7555_v31 = vpop.f32.mrb[173].mxu1 }
0x1373   : > { %v7315_v28 = vcombine.low %v7307_v33, %v7314_v61  ;;  %v7575_v23 = vmax.f32 %v7467_v58, 0.0  ;;  %v7556_v32 = vadd.f32 %v7555_v31, %v12033_v4  ;;  %v7470_v39 = vpop.f32.mrb[174].mxu0 }
0x1374   : > { %v9456_v53 = vpack.c.bf16 %v7574_v62, %v7570_v22  ;;  %v7576_v10 = vmax.f32 %v7554_v12, 0.0  ;;  %v7472_v40 = vpop.f32.mrb[175].mxu0  ;;  %v7471_v52 = vadd.f32 %v7470_v39, %v12034_v15 }
0x1375   : > { %v7322_v50 = vrot.slane %v7315_v28, %v10460_v35  ;;  %v9454_v63 = vpack.c.bf16 %v7575_v23, %v7571_v18  ;;  %v7577_v13 = vmax.f32 %v7556_v32, 0.0  ;;  %v7559_v24 = vpop.f32.mrb[174].mxu1  ;;  %v7473_v14 = vadd.f32 %v7472_v40, %v12034_v15  ;;  %v12037_v32 = vld [vmem:[#allocation46_spill] sm:$0xff] }
0x1376   : > { %v9464_v8 = vpack.c.bf16 %v7576_v10, %v7572_v30  ;;  %v7561_v26 = vpop.f32.mrb[175].mxu1  ;;  %v7560_v17 = vadd.f32 %v7559_v24, %v12034_v15  ;;  %v7578_v4 = vmax.f32 %v7471_v52, 0.0 }
0x1377   : > { %7324 = vst.msk [vmem:[%s10480_s16 + $0x10] sm:$0xf] %vm10473_vm7, %v7322_v50  ;;  %v9462_v44 = vpack.c.bf16 %v7577_v13, %v7573_v9  ;;  %v7476_v5 = vpop.f32.mrb[176].mxu0  ;;  %9455 = vmatprep.subr.bf16.mxu0 %v9454_v63  ;;  %v7562_v54 = vadd.f32 %v7561_v26, %v12034_v15  ;;  %v7579_v61 = vmax.f32 %v7473_v14, 0.0 }
0x1378   : > { %v7477_v11 = vadd.f32 %v7476_v5, %v12035_v34  ;;  %v7478_v48 = vpop.f32.mrb[177].mxu0  ;;  %9457 = vmatpush1.bf16.msra.mxu0 %v9456_v53  ;;  %v7580_v37 = vmax.f32 %v7560_v17, 0.0 }
0x1379   : > { %v7479_v21 = vadd.f32 %v7478_v48, %v12035_v34  ;;  %v7565_v55 = vpop.f32.mrb[176].mxu1  ;;  %9463 = vmatprep.subr.bf16.mxu1 %v9462_v44  ;;  %v7581_v12 = vmax.f32 %v7562_v54, 0.0  ;;  %v12038_v54 = vld [vmem:[#allocation31_spill] sm:$0xff] }
0x137a   : > { %v7582_v60 = vmax.f32 %v7477_v11, 0.0  ;;  %v7566_v6 = vadd.f32 %v7565_v55, %v12035_v34  ;;  %v7567_v33 = vpop.f32.mrb[177].mxu1  ;;  %9465 = vmatpush1.bf16.msra.mxu1 %v9464_v8 }
0x137b   : > { %v7583_v49 = vmax.f32 %v7479_v21, 0.0  ;;  %v7568_v58 = vadd.f32 %v7567_v33, %v12035_v34 }
0x137c   : > { %v9460_v22 = vpack.c.bf16 %v7582_v60, %v7578_v4  ;;  %v7584_v62 = vmax.f32 %v7566_v6, 0.0 }
0x137d   : > { %v9458_v31 = vpack.c.bf16 %v7583_v49, %v7579_v61  ;;  %v7585_v28 = vmax.f32 %v7568_v58, 0.0  ;;  %v12039_v61 = vld [vmem:[#allocation47_spill] sm:$0xff] }
0x137e   : > { %v9468_v18 = vpack.c.bf16 %v7584_v62, %v7580_v37 }
0x137f   : > { %v9466_v23 = vpack.c.bf16 %v7585_v28, %v7581_v12  ;;  %9459 = vmatprep.subr.bf16.mxu0 %v9458_v31 }
0x1380   : > { %9461 = vmatpush1.bf16.msra.mxu0 %v9460_v22 }
0x1381   : > { %9467 = vmatprep.subr.bf16.mxu1 %v9466_v23  ;;  %9074 = vmatprep.subr.msk.mxu0 %vm501_vm0, %v11582_v59 }
0x1382   : > { %9469 = vmatpush1.bf16.msra.mxu1 %v9468_v18 }
0x1383   : > { %9066 = vmatmul.mubr.msk.f32.vlgmr.msra.gmra.mrb[178].mxu0 %vm732_vm2, %v11340_v46  ;;  %9080 = vmatprep.subr.msk.mxu1 %vm501_vm0, %v11586_v38 }
0x1384   : > { %7696 = vmatprep.mubr.f32.mxu0 %v11985_v29  ;;  %9075 = vmatpush1.msk.msra.mxu0 %vm501_vm0, %v11573_v3 }
0x1385   : > { %9070 = vmatmul.mubr.msk.f32.vlgmr.msra.gmra.mrb[178].mxu1 %vm732_vm2, %v11340_v46  ;;  %v7589_v46 = vld [vmem:[%s11887_s3 + $0x18] sm:$0x3f] }
0x1386   : > { %7785 = vmatprep.mubr.f32.mxu1 %v11985_v29  ;;  %9081 = vmatpush1.msk.msra.mxu1 %vm501_vm0, %v11578_v0 }
0x1387   : > { %9067 = vmatmul.mubr.msk.f32.gmra.mrb[180].mxu0 %vm732_vm2, %v11352_v43 }
0x1388   : > { %7702 = vmatprep.mubr.f32.mxu0 %v11985_v29 }
0x1389   : > { %9071 = vmatmul.mubr.msk.f32.gmra.mrb[180].mxu1 %vm732_vm2, %v11352_v43 }
0x138a   : > { %7791 = vmatprep.mubr.f32.mxu1 %v11985_v29 }
0x138b   : > { %9068 = vmatmul.mubr.msk.f32.gmra.mrb[182].mxu0 %vm732_vm2, %v11367_v2 }
0x138c   : > { %7708 = vmatprep.mubr.f32.mxu0 %v11985_v29 }
0x138d   : > { %9072 = vmatmul.mubr.msk.f32.gmra.mrb[182].mxu1 %vm732_vm2, %v11367_v2 }
0x138e   : > { %7797 = vmatprep.mubr.f32.mxu1 %v11985_v29 }
0x138f   : > { %9069 = vmatmul.mubr.msk.f32.gmra.mrb[184].mxu0 %vm732_vm2, %v7589_v46 }
0x1390   : > { %7908 = vmatprep.mubr.f32.mxu0 %v11985_v29 }
0x1391   : > { %9073 = vmatmul.mubr.msk.f32.gmra.mrb[184].mxu1 %vm732_vm2, %v7589_v46 }
0x1392   : > { %7997 = vmatprep.mubr.f32.mxu1 %v11985_v29 }
0x1393   : > { %9076 = vmatmul.mubr.msk.f32.vlgmr.msra.gmra.mrb[186].mxu0 %vm488_vm1, %v11388_v47 }
0x1394   : > { %7914 = vmatprep.mubr.f32.mxu0 %v11985_v29 }
0x1395   : > { %9082 = vmatmul.mubr.msk.f32.vlgmr.msra.gmra.mrb[186].mxu1 %vm488_vm1, %v11388_v47 }
0x1396   : > { %8003 = vmatprep.mubr.f32.mxu1 %v11985_v29 }
0x1397   : > { %9077 = vmatmul.mubr.msk.f32.gmra.mrb[188].mxu0 %vm488_vm1, %v11399_v27 }
0x1398   : > { %7920 = vmatprep.mubr.f32.mxu0 %v11985_v29 }
0x1399   : > { %9083 = vmatmul.mubr.msk.f32.gmra.mrb[188].mxu1 %vm488_vm1, %v11399_v27  ;;  %v12036_v27 = vld [vmem:[#allocation30_spill] sm:$0xff] }
0x139a   : > { %8009 = vmatprep.mubr.f32.mxu1 %v11985_v29 }
0x139b   : > { %9078 = vmatmul.mubr.msk.f32.gmra.mrb[190].mxu0 %vm488_vm1, %v11410_v42 }
0x139c   : > { %7926 = vmatprep.mubr.f32.mxu0 %v11985_v29 }
0x139d   : > { %9084 = vmatmul.mubr.msk.f32.gmra.mrb[190].mxu1 %vm488_vm1, %v11410_v42 }
0x139e   : > { %8015 = vmatprep.mubr.f32.mxu1 %v11985_v29 }
0x139f   : > { %9079 = vmatmul.mubr.msk.f32.gmra.mrb[192].mxu0 %vm488_vm1, %v11421_v20 }
0x13a0   : > { %8110 = vmatprep.mubr.f32.mxu0 %v11985_v29 }
0x13a1   : > { %9085 = vmatmul.mubr.msk.f32.gmra.mrb[192].mxu1 %vm488_vm1, %v11421_v20 }
0x13a2   : > { %8199 = vmatprep.mubr.f32.mxu1 %v11985_v29 }
0x1456   : > { %v7692_v43 = vpop.f32.mrb[178].mxu0 }
0x1457   : > { %v7694_v2 = vpop.f32.mrb[179].mxu0  ;;  %v7693_v3 = vadd.f32 %v7692_v43, %v12036_v27 }
0x1458   : > { %v7781_v47 = vpop.f32.mrb[178].mxu1  ;;  %v7695_v42 = vadd.f32 %v7694_v2, %v12036_v27 }
0x1459   : > { %v7783_v0 = vpop.f32.mrb[179].mxu1  ;;  %v7782_v38 = vadd.f32 %v7781_v47, %v12036_v27  ;;  %v7804_v40 = vmax.f32 %v7693_v3, 0.0 }
0x145a   : > { %v7698_v59 = vpop.f32.mrb[180].mxu0  ;;  %v7784_v53 = vadd.f32 %v7783_v0, %v12036_v27  ;;  %v7805_v13 = vmax.f32 %v7695_v42, 0.0 }
0x145b   : > { %v7699_v39 = vadd.f32 %v7698_v59, %v12037_v32  ;;  %v7700_v30 = vpop.f32.mrb[181].mxu0  ;;  %v7806_v52 = vmax.f32 %v7782_v38, 0.0 }
0x145c   : > { %v7701_v20 = vadd.f32 %v7700_v30, %v12037_v32  ;;  %v7787_v10 = vpop.f32.mrb[180].mxu1  ;;  %v7807_v5 = vmax.f32 %v7784_v53, 0.0 }
0x145d   : > { %v7808_v50 = vmax.f32 %v7699_v39, 0.0  ;;  %v7788_v9 = vadd.f32 %v7787_v10, %v12037_v32  ;;  %v7789_v63 = vpop.f32.mrb[181].mxu1  ;;  %v12041_v10 = vld [vmem:[#allocation48_spill] sm:$0xff] }
0x145e   : > { %v7809_v24 = vmax.f32 %v7701_v20, 0.0  ;;  %v7790_v8 = vadd.f32 %v7789_v63, %v12037_v32  ;;  %v7704_v15 = vpop.f32.mrb[182].mxu0  ;;  %v12040_v32 = vld [vmem:[#allocation32_spill] sm:$0xff] }
0x145f   : > { %v9472_v26 = vpack.c.bf16 %v7808_v50, %v7804_v40  ;;  %v7810_v44 = vmax.f32 %v7788_v9, 0.0  ;;  %v7706_v14 = vpop.f32.mrb[183].mxu0  ;;  %v7705_v21 = vadd.f32 %v7704_v15, %v12038_v54 }
0x1460   : > { %v9470_v17 = vpack.c.bf16 %v7809_v24, %v7805_v13  ;;  %v7811_v34 = vmax.f32 %v7790_v8, 0.0  ;;  %v7793_v11 = vpop.f32.mrb[182].mxu1  ;;  %v7707_v60 = vadd.f32 %v7706_v14, %v12038_v54 }
0x1461   : > { %v9482_v48 = vpack.c.bf16 %v7810_v44, %v7806_v52  ;;  %v7795_v55 = vpop.f32.mrb[183].mxu1  ;;  %v7794_v33 = vadd.f32 %v7793_v11, %v12038_v54  ;;  %v7812_v12 = vmax.f32 %v7705_v21, 0.0 }
0x1462   : > { %v9480_v4 = vpack.c.bf16 %v7811_v34, %v7807_v5  ;;  %v7710_v6 = vpop.f32.mrb[184].mxu0  ;;  %9471 = vmatprep.subr.bf16.mxu0 %v9470_v17  ;;  %v7796_v37 = vadd.f32 %v7795_v55, %v12038_v54  ;;  %v7813_v23 = vmax.f32 %v7707_v60, 0.0  ;;  %v12042_v60 = vld [vmem:[#allocation33_spill] sm:$0xff] }
0x1463   : > { %v7711_v49 = vadd.f32 %v7710_v6, %v12039_v61  ;;  %v7712_v58 = vpop.f32.mrb[185].mxu0  ;;  %9473 = vmatpush1.bf16.msra.mxu0 %v9472_v26  ;;  %v7814_v2 = vmax.f32 %v7794_v33, 0.0 }
0x1464   : > { %v7713_v22 = vadd.f32 %v7712_v58, %v12039_v61  ;;  %v7799_v62 = vpop.f32.mrb[184].mxu1  ;;  %9481 = vmatprep.subr.bf16.mxu1 %v9480_v4  ;;  %v7815_v3 = vmax.f32 %v7796_v37, 0.0 }
0x1465   : > { %v7816_v31 = vmax.f32 %v7711_v49, 0.0  ;;  %v7800_v28 = vadd.f32 %v7799_v62, %v12039_v61  ;;  %v7801_v18 = vpop.f32.mrb[185].mxu1  ;;  %9483 = vmatpush1.bf16.msra.mxu1 %v9482_v48 }
0x1466   : > { %v7817_v46 = vmax.f32 %v7713_v22, 0.0  ;;  %v7802_v43 = vadd.f32 %v7801_v18, %v12039_v61  ;;  %v12043_v22 = vld [vmem:[#allocation49_spill] sm:$0xff] }
0x1467   : > { %v9477_v47 = vpack.c.bf16 %v7816_v31, %v7812_v12  ;;  %v7818_v27 = vmax.f32 %v7800_v28, 0.0 }
0x1468   : > { %v9474_v0 = vpack.c.bf16 %v7817_v46, %v7813_v23  ;;  %v7819_v42 = vmax.f32 %v7802_v43, 0.0 }
0x1469   : > { %v9487_v59 = vpack.c.bf16 %v7818_v27, %v7814_v2 }
0x146a   : > { %v9484_v38 = vpack.c.bf16 %v7819_v42, %v7815_v3  ;;  %9476 = vmatprep.subr.msk.bf16.mxu0 %vm10200_vm5, %v9474_v0 }
0x146b   : > { %9479 = vmatpush1.bf16.msk.msra.mxu0 %vm10200_vm5, %v9477_v47 }
0x146c   : > { %9486 = vmatprep.subr.msk.bf16.mxu1 %vm10200_vm5, %v9484_v38 }
0x146d   : > { %9489 = vmatpush1.bf16.msk.msra.mxu1 %vm10200_vm5, %v9487_v59 }
0x146e   : > { %9088 = vmatmul.mubr.msk.f32.vlgmr.msra.gmra.mrb[186].mxu0 %vm1141_vm6, %v11452_v57 }
0x146f   : > { %8116 = vmatprep.mubr.f32.mxu0 %v11985_v29 }
0x1470   : > { %9094 = vmatmul.mubr.msk.f32.vlgmr.msra.gmra.mrb[186].mxu1 %vm1141_vm6, %v11452_v57 }
0x1471   : > { %8205 = vmatprep.mubr.f32.mxu1 %v11985_v29 }
0x1472   : > { %9089 = vmatmul.mubr.msk.f32.gmra.mrb[188].mxu0 %vm1141_vm6, %v11464_v16 }
0x1473   : > { %8122 = vmatprep.mubr.f32.mxu0 %v11985_v29 }
0x1474   : > { %9095 = vmatmul.mubr.msk.f32.gmra.mrb[188].mxu1 %vm1141_vm6, %v11464_v16 }
0x1475   : > { %8211 = vmatprep.mubr.f32.mxu1 %v11985_v29 }
0x1476   : > { %9090 = vmatmul.mubr.msk.f32.gmra.mrb[190].mxu0 %vm1141_vm6, %v11475_v7 }
0x1477   : > { %8128 = vmatprep.mubr.f32.mxu0 %v11985_v29 }
0x1478   : > { %9096 = vmatmul.mubr.msk.f32.gmra.mrb[190].mxu1 %vm1141_vm6, %v11475_v7 }
0x1479   : > { %8217 = vmatprep.mubr.f32.mxu1 %v11985_v29 }
0x147a   : > { %9091 = vmatmul.mubr.msk.f32.gmra.mrb[192].mxu0 %vm1141_vm6, %v11486_v25 }
0x147b   : > { %8380 = vmatprep.mubr.f32.mxu0 %v11985_v29 }
0x147c   : > { %9097 = vmatmul.mubr.msk.f32.gmra.mrb[192].mxu1 %vm1141_vm6, %v11486_v25 }
0x147d   : > { %8469 = vmatprep.mubr.f32.mxu1 %v11985_v29 }
0x1541   : > { %v8112_v56 = vpop.f32.mrb[186].mxu0 }
0x1542   : > { %v8114_v57 = vpop.f32.mrb[187].mxu0  ;;  %v8244_v39 = vadd.f32 %v12040_v32, %v8112_v56 }
0x1543   : > { %v8201_v16 = vpop.f32.mrb[186].mxu1  ;;  %v8245_v7 = vadd.f32 %v12040_v32, %v8114_v57 }
0x1544   : > { %v8203_v30 = vpop.f32.mrb[187].mxu1  ;;  %v8246_v20 = vadd.f32 %v12040_v32, %v8201_v16  ;;  %v8260_v13 = vmax.f32 %v8244_v39, 0.0 }
0x1545   : > { %v8118_v53 = vpop.f32.mrb[188].mxu0  ;;  %v8247_v9 = vadd.f32 %v12040_v32, %v8203_v30  ;;  %v8261_v52 = vmax.f32 %v8245_v7, 0.0  ;;  %v12044_v30 = vld [vmem:[#allocation34_spill] sm:$0xff] }
0x1546   : > { %v8248_v40 = vadd.f32 %v12041_v10, %v8118_v53  ;;  %v8120_v50 = vpop.f32.mrb[189].mxu0  ;;  %v8262_v5 = vmax.f32 %v8246_v20, 0.0 }
0x1547   : > { %v8249_v25 = vadd.f32 %v12041_v10, %v8120_v50  ;;  %v8207_v63 = vpop.f32.mrb[188].mxu1  ;;  %v8263_v48 = vmax.f32 %v8247_v9, 0.0 }
0x1548   : > { %v8264_v24 = vmax.f32 %v8248_v40, 0.0  ;;  %v8250_v8 = vadd.f32 %v12041_v10, %v8207_v63  ;;  %v8209_v15 = vpop.f32.mrb[189].mxu1  ;;  %v12045_v40 = vld [vmem:[#allocation50_spill] sm:$0xff] }
0x1549   : > { %v8265_v26 = vmax.f32 %v8249_v25, 0.0  ;;  %v8251_v44 = vadd.f32 %v12041_v10, %v8209_v15  ;;  %v8124_v14 = vpop.f32.mrb[190].mxu0 }
0x154a   : > { %v9492_v17 = vpack.c.bf16 %v8264_v24, %v8260_v13  ;;  %v8266_v34 = vmax.f32 %v8250_v8, 0.0  ;;  %v8126_v11 = vpop.f32.mrb[191].mxu0  ;;  %v8252_v6 = vadd.f32 %v12042_v60, %v8124_v14 }
0x154b   : > { %v9490_v54 = vpack.c.bf16 %v8265_v26, %v8261_v52  ;;  %v8267_v21 = vmax.f32 %v8251_v44, 0.0  ;;  %v8213_v55 = vpop.f32.mrb[190].mxu1  ;;  %v8253_v49 = vadd.f32 %v12042_v60, %v8126_v11 }
0x154c   : > { %v9500_v4 = vpack.c.bf16 %v8266_v34, %v8262_v5  ;;  %v8215_v33 = vpop.f32.mrb[191].mxu1  ;;  %v8254_v37 = vadd.f32 %v12042_v60, %v8213_v55  ;;  %v8268_v23 = vmax.f32 %v8252_v6, 0.0 }
0x154d   : > { %v9498_v61 = vpack.c.bf16 %v8267_v21, %v8263_v48  ;;  %v8130_v58 = vpop.f32.mrb[192].mxu0  ;;  %9491 = vmatprep.subr.bf16.mxu0 %v9490_v54  ;;  %v8255_v31 = vadd.f32 %v12042_v60, %v8215_v33  ;;  %v8269_v47 = vmax.f32 %v8253_v49, 0.0 }
0x154e   : > { %v8256_v62 = vadd.f32 %v12043_v22, %v8130_v58  ;;  %v8132_v12 = vpop.f32.mrb[193].mxu0  ;;  %9493 = vmatpush1.bf16.msra.mxu0 %v9492_v17  ;;  %v8270_v0 = vmax.f32 %v8254_v37, 0.0  ;;  %v12047_v37 = vld [vmem:[#allocation51_spill] sm:$0xff] }
0x154f   : > { %v8257_v28 = vadd.f32 %v12043_v22, %v8132_v12  ;;  %v8219_v18 = vpop.f32.mrb[192].mxu1  ;;  %9499 = vmatprep.subr.bf16.mxu1 %v9498_v61  ;;  %v8271_v38 = vmax.f32 %v8255_v31, 0.0 }
0x1550   : > { %v8272_v46 = vmax.f32 %v8256_v62, 0.0  ;;  %v8258_v43 = vadd.f32 %v12043_v22, %v8219_v18  ;;  %v8221_v2 = vpop.f32.mrb[193].mxu1  ;;  %9501 = vmatpush1.bf16.msra.mxu1 %v9500_v4  ;;  %v12046_v4 = vld [vmem:[#allocation35_spill] sm:$0xff] }
0x1551   : > { %v8273_v27 = vmax.f32 %v8257_v28, 0.0  ;;  %v8259_v3 = vadd.f32 %v12043_v22, %v8221_v2 }
0x1552   : > { %v9496_v42 = vpack.c.bf16 %v8272_v46, %v8268_v23  ;;  %v8274_v59 = vmax.f32 %v8258_v43, 0.0 }
0x1553   : > { %v9494_v56 = vpack.c.bf16 %v8273_v27, %v8269_v47  ;;  %v8275_v57 = vmax.f32 %v8259_v3, 0.0 }
0x1554   : > { %v9504_v16 = vpack.c.bf16 %v8274_v59, %v8270_v0 }
0x1555   : > { %v9502_v32 = vpack.c.bf16 %v8275_v57, %v8271_v38  ;;  %9495 = vmatprep.subr.bf16.mxu0 %v9494_v56 }
0x1556   : > { %9497 = vmatpush1.bf16.msra.mxu0 %v9496_v42 }
0x1557   : > { %9503 = vmatprep.subr.bf16.mxu1 %v9502_v32  ;;  %v8510_v32 = vld [vmem:[%s11894_s10] sm:$0x1] }
0x1558   : > { %9505 = vmatpush1.bf16.msra.mxu1 %v9504_v16 }
0x1559   : > { %9098 = vmatmul.mubr.msk.f32.vlgmr.msra.gmra.mrb[194].mxu0 %vm732_vm2, %v11516_v45 }
0x155a   : > { %8386 = vmatprep.mubr.f32.mxu0 %v11985_v29 }
0x155b   : > { %9102 = vmatmul.mubr.msk.f32.vlgmr.msra.gmra.mrb[194].mxu1 %vm732_vm2, %v11516_v45 }
0x155c   : > { %8475 = vmatprep.mubr.f32.mxu1 %v11985_v29 }
0x155d   : > { %9099 = vmatmul.mubr.msk.f32.gmra.mrb[196].mxu0 %vm732_vm2, %v11524_v1 }
0x155e   : > { %8392 = vmatprep.mubr.f32.mxu0 %v11985_v29 }
0x155f   : > { %9103 = vmatmul.mubr.msk.f32.gmra.mrb[196].mxu1 %vm732_vm2, %v11524_v1 }
0x1560   : > { %8481 = vmatprep.mubr.f32.mxu1 %v11985_v29 }
0x1561   : > { %9100 = vmatmul.mubr.msk.f32.gmra.mrb[198].mxu0 %vm732_vm2, %v11535_v41 }
0x1562   : > { %8398 = vmatprep.mubr.f32.mxu0 %v11985_v29 }
0x1563   : > { %9104 = vmatmul.mubr.msk.f32.gmra.mrb[198].mxu1 %vm732_vm2, %v11535_v41 }
0x1564   : > { %8487 = vmatprep.mubr.f32.mxu1 %v11985_v29 }
0x1565   : > { %9101 = vmatmul.mubr.msk.f32.gmra.mrb[200].mxu0 %vm732_vm2, %v11546_v36 }
0x1566   : > { %8588 = vmatprep.mubr.f32.mxu0 %v11985_v29 }
0x1567   : > { %9105 = vmatmul.mubr.msk.f32.gmra.mrb[200].mxu1 %vm732_vm2, %v11546_v36 }
0x1568   : > { %8659 = vmatprep.mubr.f32.mxu1 %v11985_v29 }
0x162c   : > { %v8382_v45 = vpop.f32.mrb[194].mxu0 }
0x162d   : > { %v8384_v1 = vpop.f32.mrb[195].mxu0  ;;  %v8383_v7 = vadd.f32 %v8382_v45, %v12044_v30  ;;  %v8515_v45 = vpop.permute.xlu1 %8514 }
0x162e   : > { %v8471_v39 = vpop.f32.mrb[194].mxu1  ;;  %v8385_v41 = vadd.f32 %v8384_v1, %v12044_v30  ;;  %v8520_v1 = vrot.slane %v8515_v45, %v10456_v51 }
0x162f   : > { %v8473_v53 = vpop.f32.mrb[195].mxu1  ;;  %v8472_v10 = vadd.f32 %v8471_v39, %v12044_v30  ;;  %v8494_v29 = vmax.f32 %v8383_v7, 0.0 }
0x1630   : > { %v8388_v20 = vpop.f32.mrb[196].mxu0  ;;  %v8474_v25 = vadd.f32 %v8473_v53, %v12044_v30  ;;  %v8495_v15 = vmax.f32 %v8385_v41, 0.0 }
0x1631   : > { %v8389_v50 = vadd.f32 %v8388_v20, %v12045_v40  ;;  %v8390_v9 = vpop.f32.mrb[197].mxu0  ;;  %v8496_v14 = vmax.f32 %v8472_v10, 0.0 }
0x1632   : > { %v8391_v36 = vadd.f32 %v8390_v9, %v12045_v40  ;;  %v8477_v63 = vpop.f32.mrb[196].mxu1  ;;  %v8497_v11 = vmax.f32 %v8474_v25, 0.0 }
0x1633   : > { %v8498_v13 = vmax.f32 %v8389_v50, 0.0  ;;  %v8478_v24 = vadd.f32 %v8477_v63, %v12045_v40  ;;  %v8479_v8 = vpop.f32.mrb[197].mxu1 }
0x1634   : > { %v8499_v52 = vmax.f32 %v8391_v36, 0.0  ;;  %v8480_v26 = vadd.f32 %v8479_v8, %v12045_v40  ;;  %v8394_v44 = vpop.f32.mrb[198].mxu0 }
0x1635   : > { %v9508_v5 = vpack.c.bf16 %v8498_v13, %v8494_v29  ;;  %v8500_v17 = vmax.f32 %v8478_v24, 0.0  ;;  %v8396_v34 = vpop.f32.mrb[199].mxu0  ;;  %v8395_v60 = vadd.f32 %v8394_v44, %v12046_v4 }
0x1636   : > { %v9506_v48 = vpack.c.bf16 %v8499_v52, %v8495_v15  ;;  %v8501_v54 = vmax.f32 %v8480_v26, 0.0  ;;  %v8483_v21 = vpop.f32.mrb[198].mxu1  ;;  %v8397_v61 = vadd.f32 %v8396_v34, %v12046_v4 }
0x1637   : > { %v9516_v55 = vpack.c.bf16 %v8500_v17, %v8496_v14  ;;  %v8485_v6 = vpop.f32.mrb[199].mxu1  ;;  %v8484_v58 = vadd.f32 %v8483_v21, %v12046_v4  ;;  %v8502_v18 = vmax.f32 %v8395_v60, 0.0 }
0x1638   : > { %v9514_v33 = vpack.c.bf16 %v8501_v54, %v8497_v11  ;;  %v8400_v49 = vpop.f32.mrb[200].mxu0  ;;  %9507 = vmatprep.subr.bf16.mxu0 %v9506_v48  ;;  %v8486_v12 = vadd.f32 %v8485_v6, %v12046_v4  ;;  %v8503_v2 = vmax.f32 %v8397_v61, 0.0 }
0x1639   : > { %v8401_v22 = vadd.f32 %v8400_v49, %v12047_v37  ;;  %v8402_v62 = vpop.f32.mrb[201].mxu0  ;;  %9509 = vmatpush1.bf16.msra.mxu0 %v9508_v5  ;;  %v8504_v3 = vmax.f32 %v8484_v58, 0.0 }
0x163a   : > { %v8403_v31 = vadd.f32 %v8402_v62, %v12047_v37  ;;  %v8489_v28 = vpop.f32.mrb[200].mxu1  ;;  %9515 = vmatprep.subr.bf16.mxu1 %v9514_v33  ;;  %v8505_v59 = vmax.f32 %v8486_v12, 0.0 }
0x163b   : > { %v8506_v23 = vmax.f32 %v8401_v22, 0.0  ;;  %v8490_v46 = vadd.f32 %v8489_v28, %v12047_v37  ;;  %v8491_v43 = vpop.f32.mrb[201].mxu1  ;;  %9517 = vmatpush1.bf16.msra.mxu1 %v9516_v55 }
0x163c   : > { %v8507_v47 = vmax.f32 %v8403_v31, 0.0  ;;  %v8492_v27 = vadd.f32 %v8491_v43, %v12047_v37 }
0x163d   : > { %v9512_v0 = vpack.c.bf16 %v8506_v23, %v8502_v18  ;;  %v8508_v42 = vmax.f32 %v8490_v46, 0.0 }
0x163e   : > { %v9510_v38 = vpack.c.bf16 %v8507_v47, %v8503_v2  ;;  %v8509_v56 = vmax.f32 %v8492_v27, 0.0 }
0x163f   : > { %v9520_v57 = vpack.c.bf16 %v8508_v42, %v8504_v3 }
0x1640   : > { %v9518_v16 = vpack.c.bf16 %v8509_v56, %v8505_v59  ;;  %9511 = vmatprep.subr.bf16.mxu0 %v9510_v38 }
0x1641   : > { %9513 = vmatpush1.bf16.msra.mxu0 %v9512_v0 }
0x1642   : > { %9519 = vmatprep.subr.bf16.mxu1 %v9518_v16 }
0x1643   : > { %9521 = vmatpush1.bf16.msra.mxu1 %v9520_v57 }
0x1644   : > { %9106 = vmatmul.mubr.msk.f32.vlgmr.msra.gmra.mrb[202].mxu0 %vm732_vm2, %v8510_v32 }
0x1646   : > { %9107 = vmatmul.mubr.msk.f32.vlgmr.msra.gmra.mrb[202].mxu1 %vm732_vm2, %v8510_v32 }
0x1717   : > { %v8590_v39 = vpop.f32.mrb[202].mxu0 }
0x1718   : > { %v8591_v30 = vadd.f32 %v8590_v39, %v8520_v1  ;;  %v8592_v7 = vpop.f32.mrb[203].mxu0 }
0x1719   : > { %v8593_v53 = vadd.f32 %v8592_v7, %v8520_v1  ;;  %v8661_v41 = vpop.f32.mrb[202].mxu1 }
0x171a   : > { %v8666_v20 = vmax.f32 %v8591_v30, 0.0  ;;  %v8662_v10 = vadd.f32 %v8661_v41, %v8520_v1  ;;  %v8663_v40 = vpop.f32.mrb[203].mxu1 }
0x171b   : > { %v8667_v50 = vmax.f32 %v8593_v53, 0.0  ;;  %v8664_v9 = vadd.f32 %v8663_v40, %v8520_v1 }
0x171c   : > { %v8668_v25 = vmax.f32 %v8662_v10, 0.0 }
0x171d   : > { %v8674_v36 = vcombine.low %v8666_v20, %v8667_v50  ;;  %v8669_v63 = vmax.f32 %v8664_v9, 0.0 }
0x171f   : > { %v8675_v29 = vcombine.low %v8668_v25, %v8669_v63  ;;  %v8682_v13 = vrot.slane %v8674_v36, %v10460_v35 }
0x1721   : > { %v8689_v51 = vrot.slane %v8675_v29, %v10460_v35  ;;  %8707 = sbr.rel (!%p9846_p5) target bundleno = 5955 (0x1743), region = 72 }
0x1723   : > { %v8690_v24 = vcombine.low %v8682_v13, %v8689_v51 }
0x1725   : > { %v8697_v8 = vrot.slane %v8690_v24, %v10460_v35 }
0x1727   : > { %8699 = vst.msk [vmem:[%s10480_s16 + $0x14] sm:$0xf] %vm10473_vm7, %v8697_v8 }
0x1728   : > { %s12053_s27 = smov (!%p8710_p11, %s8709_s27), 24 }
0x1729   : > { %s11834_s17 = sshll.u32 %s12053_s27, 4 }
0x172a   : > { %s8714_s18 = ssub.s32 384, %s11834_s17 }
0x172b   : > { %8715 = vsyncadd %s11829_s29, %s8714_s18  ;;  %p9109_p12 = scmp.ne.s32.totalorder %s11834_s17, 0  ;;  %s9113_s30 = smul.u32 384, %s9829_s11 }
0x172c   : > { %s8720_s19 = sshll.u32 %s10480_s16, 4  ;;  %s9739_s27 = smov [#allocation3]   ;;  %s8721_s19 = int_to_ptr.vmem [resolvable:$true] %s8720_s19 }
0x172d   : > { %s11844_s22 = scalar_lea.hbm %s11896_s12, %s9113_s30  ;;  %s9670_s20 = scalar_lea.vmem %s8721_s19, %s11834_s17 }
0x172e   : > { %p9671_p13 = scmp.ne.s32.totalorder %s8721_s19, %s9670_s20  ;;  %s9674_s18 = sshll.u32 %s9739_s27, 4  ;;  %s9675_s18 = int_to_ptr.vmem [resolvable:$false] %s9674_s18 }
0x172f   : > { %s9676_s0 = scalar_lea.vmem %s9675_s18, 768  ;;  %p9677_p2 = scmp.lt.s32.totalorder %s8721_s19, %s9675_s18 }
0x1730   : > { %p9672_p0 = pnand %p9671_p13, %p9109_p12  ;;  %p9678_p3 = scmp.lt.s32.totalorder %s9676_s0, %s9670_s20 }
0x1732   : > { %p9673_p1 = pneg %p9672_p0  ;;  %p9679_p4 = por %p9678_p3, %p9677_p2 }
0x1734   : > { %p9680_p5 = pnand %p9679_p4, %p9673_p1 }
0x1736   : > { %9683 = shalt.err (!%p9680_p5)
}
0x1737   : > { %s9684_s11 = scalar_lea.hbm %s11844_s22, %s11834_s17  ;;  %s9688_s14 = scalar_lea.hbm %s11896_s12, 752 }
0x1738   : > { %p9685_p7 = scmp.ne.s32.totalorder %s11844_s22, %s9684_s11  ;;  %p9689_p10 = scmp.lt.u32.totalorder %s11844_s22, %s11896_s12 }
0x1739   : > { %p9690_p11 = scmp.lt.u32.totalorder %s9688_s14, %s9684_s11  ;;  %p9692_p0 = scmp.lt.u32.totalorder %s9684_s11, %s11844_s22 }
0x173a   : > { %p9686_p8 = pnand %p9685_p7, %p9109_p12 }
0x173b   : > { %p9691_p13 = por %p9690_p11, %p9689_p10 }
0x173c   : > { %p9687_p9 = pneg %p9686_p8 }
0x173d   : > { %p9693_p1 = por %p9692_p0, %p9691_p13 }
0x173f   : > { %p9694_p2 = pnand %p9693_p1, %p9687_p9 }
0x1741   : > { %9697 = shalt.err (!%p9694_p2)
}
0x1742   : > { %8723 = dma.vmem_to_hbm [thread:$0]  (%p9109_p12), %s8721_s19, %s11834_s17, %s11844_s22, %s11829_s29  }
0x1743 PF: > { %p9624_p3 = scmp.ge.s32.totalorder %s9732_s26, 2  ;;  %s8732_s20 = sand.u32 1, %s9720_s23  }
0x1744   : > { %s8733_s27 = scalar_lea.sflag [#allocation4], %s8732_s20 }
0x1745   : > { %p9621_p4 = pnand %p9624_p3, %p9850_p6 }
0x1747   : > { %9715 = dma.done.wait (!%p9621_p4), %s8733_s27, 384  }
0x1748   : > { %9717 = vsyncadd (!%p9621_p4), %s8733_s27, 4294966912  ;;  %p24_p5 = scmp.ge.s32.totalorder %s9833_s28, 4   ;;  %s12048_s23 = smov %s9724_s24 }
0x1749   : > { %s12049_s24 = smov %s9728_s25  ;;  %s12050_s25 = smov %s9844_s13 }
0x174a   : > { %s12051_s26 = smov %s9833_s28  ;;  %26 = sbr.rel (!%p24_p5) target bundleno = 6 (0x6), region = 103 }
0x1751   :  { %8738 = vsyncpa [#allocation4], 1 }
0x1752   :  { %8740 = vsyncpa [#allocation4 + $0x1], 1 }

</bundles_post_ra>
